<compile_context>
chip_gen: v5e
topology: v5e:2x2
jax: 0.10.0
libtpu: 0.0.40
codegen_flags: <defaults>
</compile_context>

<pallas_src>
import functools

import jax
import jax.numpy as jnp
from jax.experimental import pallas as pl
from jax.experimental.pallas import tpu as pltpu


# ----------------------------- kernel helpers -----------------------------

def _layer_norm(x, g, b, eps=1e-12):
    # f32 VPU math (v5e has no bf16 VPU).
    mu = jnp.mean(x, axis=-1, keepdims=True)
    d = x - mu
    var = jnp.mean(d * d, axis=-1, keepdims=True)
    return d * jax.lax.rsqrt(var + eps) * g + b


def _gelu(x):
    # tanh-approximate GELU; explicit multiplies (no pow lowering).
    # TODO(synk): PyTorch BERT uses exact erf GELU; small numeric deviation.
    c = 0.7978845608028654  # sqrt(2/pi)
    return 0.5 * x * (1.0 + jnp.tanh(c * (x + 0.044715 * (x * x * x))))


# ------------------------------- the kernel -------------------------------

def bert_classifier_kernel(valid_ref,                     # scalar-prefetch (SMEM)
                           x_ref,                         # [Bt, S, H] activations (bf16)
                           ln0_g, ln0_b,
                           wqkv, bqkv, wo, bo,
                           ln1_g, ln1_b,
                           w1, b1, w2, b2,
                           ln2_g, ln2_b,
                           wp, bp, wc, bc,
                           out_ref,                       # [1, Bt, C_PAD]
                           k_sc, v_sc, m_sc, l_sc, acc_sc,
                           *, num_heads, kv_tile):
    blk = pl.program_id(0)
    x = x_ref[...].astype(jnp.float32)                     # [Bt, S, H]
    Bt, S, H = x.shape
    n = num_heads
    hd = H // n
    scale = float(hd) ** -0.5
    n_kv_tiles_total = S // kv_tile

    x2 = x.reshape(Bt * S, H)                              # fatten M for the MXU

    # --- embedding layer-norm ----------------------------------------------
    h = _layer_norm(x2, ln0_g[...], ln0_b[...])            # [Bt*S, H] f32
    hb = h.astype(jnp.bfloat16)

    # --- fused QKV projection (one MXU weight push, bf16 operands) ----------
    qkv = jnp.dot(hb, wqkv[...], preferred_element_type=jnp.float32) + bqkv[...]
    q = qkv[:, :H] * scale          # fold softmax scale into q (O(S*H), not O(S^2))
    k = qkv[:, H:2 * H]
    v = qkv[:, 2 * H:]

    # constant iota hoisted out of the KV loop (broadcasts are not CSE'd)
    key_iota = jax.lax.broadcasted_iota(jnp.int32, (1, 1, kv_tile), 2)

    # --- per-sequence KV-tiled masked attention (online softmax) ------------
    ctx_rows = []
    for i in range(Bt):
        r0 = i * S
        # [S,H] -> [n,S,hd]: reshape + swapaxes (no per-head stack/concat copies)
        q3 = jnp.swapaxes(q[r0:r0 + S].reshape(S, n, hd), 0, 1).astype(jnp.bfloat16)
        k_sc[...] = jnp.swapaxes(k[r0:r0 + S].reshape(S, n, hd), 0, 1).astype(jnp.bfloat16)
        v_sc[...] = jnp.swapaxes(v[r0:r0 + S].reshape(S, n, hd), 0, 1).astype(jnp.bfloat16)

        m_sc[...] = jnp.full_like(m_sc, -jnp.inf)
        l_sc[...] = jnp.zeros_like(l_sc)
        acc_sc[...] = jnp.zeros_like(acc_sc)

        vl = valid_ref[blk * Bt + i]
        # KV-tile skipping: only visit tiles that contain valid key positions.
        n_tiles = jnp.clip(pl.cdiv(vl, kv_tile), 1, n_kv_tiles_total)

        @pl.loop(0, n_tiles)
        def _(t):
            start = pl.multiple_of(t * kv_tile, kv_tile)
            kt = k_sc[:, pl.ds(start, kv_tile), :]          # [n, kv, hd] bf16
            vt = v_sc[:, pl.ds(start, kv_tile), :]
            neg = jnp.where(key_iota + start < vl, 0.0, -1e9).astype(jnp.float32)
            s = jnp.einsum('nqd,nkd->nqk', q3, kt,
                           preferred_element_type=jnp.float32) + neg
            m_new = jnp.maximum(m_sc[...], jnp.max(s, axis=-1, keepdims=True))
            alpha = jnp.exp(m_sc[...] - m_new)
            p = jnp.exp(s - m_new)                          # f32 exp (v5e-safe)
            l_sc[...] = alpha * l_sc[...] + jnp.sum(p, axis=-1, keepdims=True)
            acc_sc[...] = alpha * acc_sc[...] + jnp.einsum(
                'nqk,nkd->nqd', p.astype(jnp.bfloat16), vt,
                preferred_element_type=jnp.float32)
            m_sc[...] = m_new

        # reciprocal applied to ctx [n,S,hd], not to p [n,S,S]
        ctx = acc_sc[...] * pl.reciprocal(l_sc[...], approx=True)
        ctx_rows.append(jnp.swapaxes(ctx, 0, 1).reshape(S, H))   # back to [S, H]

    ctx2d = jnp.concatenate(ctx_rows, axis=0) if Bt > 1 else ctx_rows[0]  # [Bt*S, H]

    # --- full-width output projection, residual + LN, GELU FFN, LN ----------
    attn = jnp.dot(ctx2d.astype(jnp.bfloat16), wo[...],
                   preferred_element_type=jnp.float32) + bo[...]
    h1 = _layer_norm(h + attn, ln1_g[...], ln1_b[...])
    ff = _gelu(jnp.dot(h1.astype(jnp.bfloat16), w1[...],
                       preferred_element_type=jnp.float32) + b1[...])
    ff = jnp.dot(ff.astype(jnp.bfloat16), w2[...],
                 preferred_element_type=jnp.float32) + b2[...]
    h2 = _layer_norm(h1 + ff, ln2_g[...], ln2_b[...])

    # --- pooler + classifier on the Bt [CLS] rows (lane-dense C_PAD output) --
    # Only key positions are masked; padded query rows never feed the pooler
    # (only [CLS] does), matching the reference semantics.
    cls = jnp.concatenate([h2[i * S:i * S + 1, :] for i in range(Bt)], axis=0)  # [Bt,H]
    pooled = jnp.tanh(jnp.dot(cls.astype(jnp.bfloat16), wp[...],
                              preferred_element_type=jnp.float32) + bp[...])
    # TODO(synk): dropout (dr_rate) is a no-op at inference; not emitted here.
    logits = jnp.dot(pooled.astype(jnp.bfloat16), wc[...],
                     preferred_element_type=jnp.float32) + bc[...]   # [Bt, C_PAD]
    out_ref[0] = logits.astype(out_ref.dtype)


# ------------------------------ JAX wrapper -------------------------------

def init_params(key, vocab, seq, hidden, inter, classes, n_segments=2):
    std = 0.02
    ks = iter(jax.random.split(key, 32))

    def nrm(shape):
        return (std * jax.random.normal(next(ks), shape)).astype(jnp.float32)

    return dict(
        word_emb=nrm((vocab, hidden)),
        seg_emb=nrm((n_segments, hidden)),
        pos_emb=nrm((seq, hidden)),
        ln0_g=jnp.ones((1, hidden), jnp.float32),
        ln0_b=jnp.zeros((1, hidden), jnp.float32),
        wq=nrm((hidden, hidden)), bq=jnp.zeros((1, hidden), jnp.float32),
        wk=nrm((hidden, hidden)), bk=jnp.zeros((1, hidden), jnp.float32),
        wv=nrm((hidden, hidden)), bv=jnp.zeros((1, hidden), jnp.float32),
        wo=nrm((hidden, hidden)), bo=jnp.zeros((1, hidden), jnp.float32),
        ln1_g=jnp.ones((1, hidden), jnp.float32),
        ln1_b=jnp.zeros((1, hidden), jnp.float32),
        w1=nrm((hidden, inter)), b1=jnp.zeros((1, inter), jnp.float32),
        w2=nrm((inter, hidden)), b2=jnp.zeros((1, hidden), jnp.float32),
        ln2_g=jnp.ones((1, hidden), jnp.float32),
        ln2_b=jnp.zeros((1, hidden), jnp.float32),
        wp=nrm((hidden, hidden)), bp=jnp.zeros((1, hidden), jnp.float32),
        wc=nrm((hidden, classes)), bc=jnp.zeros((1, classes), jnp.float32),
    )


def _prep_kernel_params(params, num_classes, lane_pad=128):
    """Fused bf16 QKV, bf16 MXU weights, f32 biases/LN, lane-padded classifier."""
    H = params['wq'].shape[0]
    c_pad = ((num_classes + lane_pad - 1) // lane_pad) * lane_pad
    wc = jnp.zeros((H, c_pad), jnp.float32).at[:, :num_classes].set(params['wc'])
    bc = jnp.zeros((1, c_pad), jnp.float32).at[:, :num_classes].set(params['bc'])
    wqkv = jnp.concatenate([params['wq'], params['wk'], params['wv']], axis=1)
    bqkv = jnp.concatenate([params['bq'], params['bk'], params['bv']], axis=1)
    bf = lambda w: w.astype(jnp.bfloat16)
    kernel_params = [
        params['ln0_g'], params['ln0_b'],
        bf(wqkv), bqkv, bf(params['wo']), params['bo'],
        params['ln1_g'], params['ln1_b'],
        bf(params['w1']), params['b1'], bf(params['w2']), params['b2'],
        params['ln2_g'], params['ln2_b'],
        bf(params['wp']), params['bp'], bf(wc), bc,
    ]
    return kernel_params, c_pad


def _vmem_capacity_bytes():
    try:
        return int(pltpu.get_tpu_info().vmem_capacity_bytes)
    except Exception:               # older jax / non-TPU trace context
        return 64 * 1024 * 1024


def bert_classifier_forward(token_ids, valid_length, segment_ids, params,
                            num_heads=2, num_classes=7, block_batch=None):
    B, S = token_ids.shape
    H = params['wq'].shape[0]
    n = num_heads
    hd = H // n

    # embedding gather (plain-JAX glue: data-dependent gather); ship bf16 to
    # halve the per-block HBM->VMEM DMA (LN math is upcast to f32 in-kernel).
    x = (params['word_emb'][token_ids]
         + params['seg_emb'][segment_ids]
         + params['pos_emb'][None, :S, :]).astype(jnp.bfloat16)    # [B, S, H]

    cap = _vmem_capacity_bytes()
    # generation-aware scoped-VMEM limit: ~96 MiB on v5e/v6e, ~48 MiB on v7x
    vmem_limit = int(cap * 3 // 4)

    if block_batch is None:
        # fatten matmul M: Bt*S rows per block; keep Bt modest on v7x (64 MiB VMEM)
        want = 4 if cap >= 96 * 1024 * 1024 else 2
        block_batch = next(bt for bt in (want, 2, 1) if B % bt == 0)
    Bt = block_batch
    assert B % Bt == 0
    nblk = B // Bt

    kv_tile = S if S <= 128 else 128
    assert S % kv_tile == 0

    kernel_params, c_pad = _prep_kernel_params(params, num_classes)

    def _weight_spec(arr, single_buffer):
        nd = arr.ndim
        if single_buffer:
            # resident weights are fetched once: single-buffer to halve weight VMEM
            return pl.BlockSpec(arr.shape, lambda *_: (0,) * nd,
                                pipeline_mode=pl.Buffered(1))
        return pl.BlockSpec(arr.shape, lambda *_: (0,) * nd)

    x_spec = pl.BlockSpec((Bt, S, H), lambda b, vl: (b, 0, 0))
    out_spec = pl.BlockSpec((1, Bt, c_pad), lambda b, vl: (b, 0, 0))
    scratch = [
        pltpu.VMEM((n, S, hd), jnp.bfloat16),   # k (per-sequence, reused)
        pltpu.VMEM((n, S, hd), jnp.bfloat16),   # v
        pltpu.VMEM((n, S, 1), jnp.float32),     # running max
        pltpu.VMEM((n, S, 1), jnp.float32),     # running denom
        pltpu.VMEM((n, S, hd), jnp.float32),    # attention accumulator
    ]

    def _run(single_buffer_weights):
        in_specs = ([x_spec]
                    + [_weight_spec(a, single_buffer_weights) for a in kernel_params])
        grid_spec = pltpu.PrefetchScalarGridSpec(
            num_scalar_prefetch=1,                  # valid_length -> SMEM
            grid=(nblk,),
            in_specs=in_specs,
            out_specs=out_spec,
            scratch_shapes=scratch,
        )
        out = pl.pallas_call(
            functools.partial(bert_classifier_kernel,
                              num_heads=num_heads, kv_tile=kv_tile),
            out_shape=jax.ShapeDtypeStruct((nblk, Bt, c_pad), jnp.float32),
            grid_spec=grid_spec,
            compiler_params=pltpu.CompilerParams(
                dimension_semantics=("parallel",),  # shards batch blocks over TCs
                vmem_limit_bytes=vmem_limit,
            ),
        )(valid_length.astype(jnp.int32), x, *kernel_params)
        return jax.block_until_ready(out)

    try:
        out = _run(True)
    except Exception:
        # pipeline_mode=pl.Buffered(1) unsupported on this jax build: fall back
        # to default double-buffered resident weights (correct, more VMEM).
        out = _run(False)

    # lane-dense (Bt, 128) logits slab -> [B, num_classes]
    return out.reshape(B, c_pad)[:, :num_classes]


# ---------------------------------- main -----------------------------------

if __name__ == "__main__":
    B, S, H, INTER, HEADS, CLASSES, VOCAB = 2, 8, 32, 64, 2, 7, 50

    key = jax.random.PRNGKey(0)
    k_tok, k_param = jax.random.split(key)

    token_ids = jax.random.randint(k_tok, (B, S), 0, VOCAB, dtype=jnp.int32)
    valid_length = jnp.array([S, 5], dtype=jnp.int32)
    segment_ids = jnp.zeros((B, S), dtype=jnp.int32)

    params = init_params(k_param, vocab=VOCAB, seq=S, hidden=H,
                         inter=INTER, classes=CLASSES)

    logits = bert_classifier_forward(token_ids, valid_length, segment_ids,
                                     params, num_heads=HEADS,
                                     num_classes=CLASSES)
    jax.block_until_ready(logits)
    assert logits.shape == (B, CLASSES) and logits.dtype == jnp.float32
    print("KERNEL_OK")
</pallas_src>

<mosaic_0001>
module attributes {stable_mosaic.version = 11 : i64} {
  func.func @bert_classifier_kernel(%arg0: i32, %arg1: memref<2xi32, #tpu.memory_space<smem>>, %arg2: memref<2x8x32xbf16, #tpu.memory_space<vmem>>, %arg3: memref<1x32xf32, #tpu.memory_space<vmem>>, %arg4: memref<1x32xf32, #tpu.memory_space<vmem>>, %arg5: memref<32x96xbf16, #tpu.memory_space<vmem>>, %arg6: memref<1x96xf32, #tpu.memory_space<vmem>>, %arg7: memref<32x32xbf16, #tpu.memory_space<vmem>>, %arg8: memref<1x32xf32, #tpu.memory_space<vmem>>, %arg9: memref<1x32xf32, #tpu.memory_space<vmem>>, %arg10: memref<1x32xf32, #tpu.memory_space<vmem>>, %arg11: memref<32x64xbf16, #tpu.memory_space<vmem>>, %arg12: memref<1x64xf32, #tpu.memory_space<vmem>>, %arg13: memref<64x32xbf16, #tpu.memory_space<vmem>>, %arg14: memref<1x32xf32, #tpu.memory_space<vmem>>, %arg15: memref<1x32xf32, #tpu.memory_space<vmem>>, %arg16: memref<1x32xf32, #tpu.memory_space<vmem>>, %arg17: memref<32x32xbf16, #tpu.memory_space<vmem>>, %arg18: memref<1x32xf32, #tpu.memory_space<vmem>>, %arg19: memref<32x128xbf16, #tpu.memory_space<vmem>>, %arg20: memref<1x128xf32, #tpu.memory_space<vmem>>, %arg21: memref<1x2x128xf32, #tpu.memory_space<vmem>>, %arg22: memref<2x8x16xbf16, #tpu.memory_space<vmem>>, %arg23: memref<2x8x16xbf16, #tpu.memory_space<vmem>>, %arg24: memref<2x8x1xf32, #tpu.memory_space<vmem>>, %arg25: memref<2x8x1xf32, #tpu.memory_space<vmem>>, %arg26: memref<2x8x16xf32, #tpu.memory_space<vmem>>) attributes {dimension_semantics = [#tpu.dimension_semantics<parallel>], iteration_bounds = array<i64: 1>, scalar_prefetch = 1 : i64, scratch_operands = 5 : i64, tpu.core_type = #tpu.core_type<tc>, window_params = [{transform_indices = @transform_0, window_bounds = array<i64: 2, 8, 32>}, {pipeline_mode = #tpu.pipeline_mode<synchronous>, transform_indices = @transform_1, window_bounds = array<i64: 1, 32>}, {pipeline_mode = #tpu.pipeline_mode<synchronous>, transform_indices = @transform_2, window_bounds = array<i64: 1, 32>}, {pipeline_mode = #tpu.pipeline_mode<synchronous>, transform_indices = @transform_3, window_bounds = array<i64: 32, 96>}, {pipeline_mode = #tpu.pipeline_mode<synchronous>, transform_indices = @transform_4, window_bounds = array<i64: 1, 96>}, {pipeline_mode = #tpu.pipeline_mode<synchronous>, transform_indices = @transform_5, window_bounds = array<i64: 32, 32>}, {pipeline_mode = #tpu.pipeline_mode<synchronous>, transform_indices = @transform_6, window_bounds = array<i64: 1, 32>}, {pipeline_mode = #tpu.pipeline_mode<synchronous>, transform_indices = @transform_7, window_bounds = array<i64: 1, 32>}, {pipeline_mode = #tpu.pipeline_mode<synchronous>, transform_indices = @transform_8, window_bounds = array<i64: 1, 32>}, {pipeline_mode = #tpu.pipeline_mode<synchronous>, transform_indices = @transform_9, window_bounds = array<i64: 32, 64>}, {pipeline_mode = #tpu.pipeline_mode<synchronous>, transform_indices = @transform_10, window_bounds = array<i64: 1, 64>}, {pipeline_mode = #tpu.pipeline_mode<synchronous>, transform_indices = @transform_11, window_bounds = array<i64: 64, 32>}, {pipeline_mode = #tpu.pipeline_mode<synchronous>, transform_indices = @transform_12, window_bounds = array<i64: 1, 32>}, {pipeline_mode = #tpu.pipeline_mode<synchronous>, transform_indices = @transform_13, window_bounds = array<i64: 1, 32>}, {pipeline_mode = #tpu.pipeline_mode<synchronous>, transform_indices = @transform_14, window_bounds = array<i64: 1, 32>}, {pipeline_mode = #tpu.pipeline_mode<synchronous>, transform_indices = @transform_15, window_bounds = array<i64: 32, 32>}, {pipeline_mode = #tpu.pipeline_mode<synchronous>, transform_indices = @transform_16, window_bounds = array<i64: 1, 32>}, {pipeline_mode = #tpu.pipeline_mode<synchronous>, transform_indices = @transform_17, window_bounds = array<i64: 32, 128>}, {pipeline_mode = #tpu.pipeline_mode<synchronous>, transform_indices = @transform_18, window_bounds = array<i64: 1, 128>}, {transform_indices = @transform_19, window_bounds = array<i64: 1, 2, 128>}]} {
    %c0 = arith.constant 0 : index
    %c0_0 = arith.constant 0 : index
    %c0_1 = arith.constant 0 : index
    %0 = vector.load %arg2[%c0, %c0_0, %c0_1] : memref<2x8x32xbf16, #tpu.memory_space<vmem>>, vector<2x8x32xbf16>
    %1 = arith.extf %0 : vector<2x8x32xbf16> to vector<2x8x32xf32>
    %2 = vector.shape_cast %1 : vector<2x8x32xf32> to vector<16x32xf32>
    %c0_2 = arith.constant 0 : index
    %c0_3 = arith.constant 0 : index
    %3 = vector.load %arg3[%c0_2, %c0_3] : memref<1x32xf32, #tpu.memory_space<vmem>>, vector<1x32xf32>
    %c0_4 = arith.constant 0 : index
    %c0_5 = arith.constant 0 : index
    %4 = vector.load %arg4[%c0_4, %c0_5] : memref<1x32xf32, #tpu.memory_space<vmem>>, vector<1x32xf32>
    %cst = arith.constant dense<0.000000e+00> : vector<16xf32>
    %5 = vector.multi_reduction <add>, %2, %cst [1] : vector<16x32xf32> to vector<16xf32>
    %6 = vector.shape_cast %5 : vector<16xf32> to vector<16x1xf32>
    %cst_6 = arith.constant 3.200000e+01 : f32
    %7 = vector.broadcast %cst_6 : f32 to vector<16x1xf32>
    %8 = arith.divf %6, %7 : vector<16x1xf32>
    %9 = vector.broadcast %8 : vector<16x1xf32> to vector<16x32xf32>
    %10 = arith.subf %2, %9 : vector<16x32xf32>
    %11 = arith.mulf %10, %10 : vector<16x32xf32>
    %cst_7 = arith.constant dense<0.000000e+00> : vector<16xf32>
    %12 = vector.multi_reduction <add>, %11, %cst_7 [1] : vector<16x32xf32> to vector<16xf32>
    %13 = vector.shape_cast %12 : vector<16xf32> to vector<16x1xf32>
    %cst_8 = arith.constant 3.200000e+01 : f32
    %14 = vector.broadcast %cst_8 : f32 to vector<16x1xf32>
    %15 = arith.divf %13, %14 : vector<16x1xf32>
    %cst_9 = arith.constant 9.99999996E-13 : f32
    %16 = vector.broadcast %cst_9 : f32 to vector<16x1xf32>
    %17 = arith.addf %15, %16 : vector<16x1xf32>
    %18 = math.rsqrt %17 : vector<16x1xf32>
    %19 = vector.broadcast %18 : vector<16x1xf32> to vector<16x32xf32>
    %20 = arith.mulf %10, %19 : vector<16x32xf32>
    %21 = vector.broadcast %3 : vector<1x32xf32> to vector<16x32xf32>
    %22 = arith.mulf %20, %21 : vector<16x32xf32>
    %23 = vector.broadcast %4 : vector<1x32xf32> to vector<16x32xf32>
    %24 = arith.addf %22, %23 : vector<16x32xf32>
    %25 = arith.truncf %24 : vector<16x32xf32> to vector<16x32xbf16>
    %c0_10 = arith.constant 0 : index
    %c0_11 = arith.constant 0 : index
    %26 = vector.load %arg5[%c0_10, %c0_11] : memref<32x96xbf16, #tpu.memory_space<vmem>>, vector<32x96xbf16>
    %cst_12 = arith.constant dense<0.000000e+00> : vector<16x96xf32>
    %27 = tpu.matmul %25, %26, %cst_12 {dimension_numbers = #tpu.dot_dimension_numbers<[1], [0], [0], [1], [0, 0, 1, 1], [], []>} : vector<16x32xbf16>, vector<32x96xbf16>, vector<16x96xf32> -> vector<16x96xf32>
    %c0_13 = arith.constant 0 : index
    %c0_14 = arith.constant 0 : index
    %28 = vector.load %arg6[%c0_13, %c0_14] : memref<1x96xf32, #tpu.memory_space<vmem>>, vector<1x96xf32>
    %29 = vector.broadcast %28 : vector<1x96xf32> to vector<16x96xf32>
    %30 = arith.addf %27, %29 : vector<16x96xf32>
    %31 = vector.extract_strided_slice %30 {offsets = [0, 0], sizes = [16, 32], strides = [1, 1]} : vector<16x96xf32> to vector<16x32xf32>
    %cst_15 = arith.constant 2.500000e-01 : f32
    %32 = vector.broadcast %cst_15 : f32 to vector<16x32xf32>
    %33 = arith.mulf %31, %32 : vector<16x32xf32>
    %34 = vector.extract_strided_slice %30 {offsets = [0, 32], sizes = [16, 32], strides = [1, 1]} : vector<16x96xf32> to vector<16x32xf32>
    %35 = vector.extract_strided_slice %30 {offsets = [0, 64], sizes = [16, 32], strides = [1, 1]} : vector<16x96xf32> to vector<16x32xf32>
    %36 = tpu.iota {dimensions = array<i32: 2>} : vector<1x1x8xi32>
    %37 = vector.extract_strided_slice %33 {offsets = [0, 0], sizes = [8, 32], strides = [1, 1]} : vector<16x32xf32> to vector<8x32xf32>
    %38 = vector.shape_cast %37 : vector<8x32xf32> to vector<8x2x16xf32>
    %39 = tpu.transpose %38, [1, 0, 2] : vector<8x2x16xf32> -> vector<2x8x16xf32>
    %40 = arith.truncf %39 : vector<2x8x16xf32> to vector<2x8x16xbf16>
    %41 = vector.extract_strided_slice %34 {offsets = [0, 0], sizes = [8, 32], strides = [1, 1]} : vector<16x32xf32> to vector<8x32xf32>
    %42 = vector.shape_cast %41 : vector<8x32xf32> to vector<8x2x16xf32>
    %43 = tpu.transpose %42, [1, 0, 2] : vector<8x2x16xf32> -> vector<2x8x16xf32>
    %44 = arith.truncf %43 : vector<2x8x16xf32> to vector<2x8x16xbf16>
    %c0_16 = arith.constant 0 : index
    %c0_17 = arith.constant 0 : index
    %c0_18 = arith.constant 0 : index
    %45 = vector.load %arg22[%c0_16, %c0_17, %c0_18] : memref<2x8x16xbf16, #tpu.memory_space<vmem>>, vector<2x8x16xbf16>
    tpu.vector_store %arg22[%c0_16, %c0_17, %c0_18], %44 {strides = array<i32>} : memref<2x8x16xbf16, #tpu.memory_space<vmem>>, vector<2x8x16xbf16>,
    %46 = vector.extract_strided_slice %35 {offsets = [0, 0], sizes = [8, 32], strides = [1, 1]} : vector<16x32xf32> to vector<8x32xf32>
    %47 = vector.shape_cast %46 : vector<8x32xf32> to vector<8x2x16xf32>
    %48 = tpu.transpose %47, [1, 0, 2] : vector<8x2x16xf32> -> vector<2x8x16xf32>
    %49 = arith.truncf %48 : vector<2x8x16xf32> to vector<2x8x16xbf16>
    %c0_19 = arith.constant 0 : index
    %c0_20 = arith.constant 0 : index
    %c0_21 = arith.constant 0 : index
    %50 = vector.load %arg23[%c0_19, %c0_20, %c0_21] : memref<2x8x16xbf16, #tpu.memory_space<vmem>>, vector<2x8x16xbf16>
    tpu.vector_store %arg23[%c0_19, %c0_20, %c0_21], %49 {strides = array<i32>} : memref<2x8x16xbf16, #tpu.memory_space<vmem>>, vector<2x8x16xbf16>,
    %cst_22 = arith.constant 0xFF800000 : f32
    %51 = vector.broadcast %cst_22 : f32 to vector<2x8x1xf32>
    %c0_23 = arith.constant 0 : index
    %c0_24 = arith.constant 0 : index
    %c0_25 = arith.constant 0 : index
    %52 = vector.load %arg24[%c0_23, %c0_24, %c0_25] : memref<2x8x1xf32, #tpu.memory_space<vmem>>, vector<2x8x1xf32>
    tpu.vector_store %arg24[%c0_23, %c0_24, %c0_25], %51 {strides = array<i32>} : memref<2x8x1xf32, #tpu.memory_space<vmem>>, vector<2x8x1xf32>,
    %cst_26 = arith.constant 0.000000e+00 : f32
    %53 = vector.broadcast %cst_26 : f32 to vector<2x8x1xf32>
    %c0_27 = arith.constant 0 : index
    %c0_28 = arith.constant 0 : index
    %c0_29 = arith.constant 0 : index
    %54 = vector.load %arg25[%c0_27, %c0_28, %c0_29] : memref<2x8x1xf32, #tpu.memory_space<vmem>>, vector<2x8x1xf32>
    tpu.vector_store %arg25[%c0_27, %c0_28, %c0_29], %53 {strides = array<i32>} : memref<2x8x1xf32, #tpu.memory_space<vmem>>, vector<2x8x1xf32>,
    %cst_30 = arith.constant 0.000000e+00 : f32
    %55 = vector.broadcast %cst_30 : f32 to vector<2x8x16xf32>
    %c0_31 = arith.constant 0 : index
    %c0_32 = arith.constant 0 : index
    %c0_33 = arith.constant 0 : index
    %56 = vector.load %arg26[%c0_31, %c0_32, %c0_33] : memref<2x8x16xf32, #tpu.memory_space<vmem>>, vector<2x8x16xf32>
    tpu.vector_store %arg26[%c0_31, %c0_32, %c0_33], %55 {strides = array<i32>} : memref<2x8x16xf32, #tpu.memory_space<vmem>>, vector<2x8x16xf32>,
    %c2_i32 = arith.constant 2 : i32
    %57 = arith.muli %arg0, %c2_i32 : i32
    %c0_i32 = arith.constant 0 : i32
    %58 = arith.addi %57, %c0_i32 : i32
    %59 = arith.index_cast %58 : i32 to index
    %60 = memref.load %arg1[%59] : memref<2xi32, #tpu.memory_space<smem>>
    %c7_i32 = arith.constant 7 : i32
    %61 = arith.addi %60, %c7_i32 : i32
    %c8_i32 = arith.constant 8 : i32
    %62 = arith.divsi %61, %c8_i32 : i32
    %c1_i32 = arith.constant 1 : i32
    %c1_i32_34 = arith.constant 1 : i32
    %63 = arith.maxsi %c1_i32, %62 : i32
    %64 = arith.minsi %c1_i32_34, %63 : i32
    %c0_i32_35 = arith.constant 0 : i32
    %65 = arith.subi %64, %c0_i32_35 : i32
    %c1_i32_36 = arith.constant 1 : i32
    %c1_i32_37 = arith.constant 1 : i32
    %66 = arith.subi %c1_i32_36, %c1_i32_37 : i32
    %67 = arith.addi %65, %66 : i32
    %c1_i32_38 = arith.constant 1 : i32
    %68 = arith.divsi %67, %c1_i32_38 : i32
    %c1_i32_39 = arith.constant 1 : i32
    %c0_i32_40 = arith.constant 0 : i32
    %c0_i32_41 = arith.constant 0 : i32
    %69 = arith.subi %68, %c0_i32_41 : i32
    %70 = arith.addi %c0_i32_41, %69 : i32
    %c1_i32_42 = arith.constant 1 : i32
    scf.for %arg27 = %c0_i32_41 to %70 step %c1_i32_42  : i32 {
      %216 = arith.muli %arg27, %c1_i32_39 : i32
      %217 = arith.addi %c0_i32_40, %216 : i32
      %c8_i32_137 = arith.constant 8 : i32
      %218 = arith.muli %217, %c8_i32_137 : i32
      %219 = tpu.assume_multiple %218, 8 : i32
      %c0_138 = arith.constant 0 : index
      %220 = arith.index_cast %219 : i32 to index
      %c0_139 = arith.constant 0 : index
      %221 = vector.load %arg22[%c0_138, %220, %c0_139] : memref<2x8x16xbf16, #tpu.memory_space<vmem>>, vector<2x8x16xbf16>
      %c0_140 = arith.constant 0 : index
      %222 = arith.index_cast %219 : i32 to index
      %c0_141 = arith.constant 0 : index
      %223 = vector.load %arg23[%c0_140, %222, %c0_141] : memref<2x8x16xbf16, #tpu.memory_space<vmem>>, vector<2x8x16xbf16>
      %224 = vector.broadcast %219 : i32 to vector<1x1x8xi32>
      %225 = arith.addi %36, %224 : vector<1x1x8xi32>
      %226 = vector.broadcast %60 : i32 to vector<1x1x8xi32>
      %227 = arith.cmpi slt, %225, %226 : vector<1x1x8xi32>
      %cst_142 = arith.constant 0.000000e+00 : f32
      %cst_143 = arith.constant -1.000000e+09 : f32
      %228 = vector.broadcast %cst_142 : f32 to vector<1x1x8xf32>
      %229 = vector.broadcast %cst_143 : f32 to vector<1x1x8xf32>
      %230 = arith.select %227, %228, %229 : vector<1x1x8xi1>, vector<1x1x8xf32>
      "tpu.trace_start"() <{level = 10 : i32, message = "nqd,nkd->nqk"}> : () -> ()
      %cst_144 = arith.constant dense<0.000000e+00> : vector<2x8x8xf32>
      %231 = tpu.matmul %40, %221, %cst_144 {dimension_numbers = #tpu.dot_dimension_numbers<[2], [2], [1], [1], [0, 0, 0, 1, 1, 1], [0], [0]>} : vector<2x8x16xbf16>, vector<2x8x16xbf16>, vector<2x8x8xf32> -> vector<2x8x8xf32>
      "tpu.trace_stop"() : () -> ()
      %232 = vector.broadcast %230 : vector<1x1x8xf32> to vector<2x8x8xf32>
      %233 = arith.addf %231, %232 : vector<2x8x8xf32>
      %c0_145 = arith.constant 0 : index
      %c0_146 = arith.constant 0 : index
      %c0_147 = arith.constant 0 : index
      %234 = vector.load %arg24[%c0_145, %c0_146, %c0_147] : memref<2x8x1xf32, #tpu.memory_space<vmem>>, vector<2x8x1xf32>
      %cst_148 = arith.constant dense<0xFF800000> : vector<2x8xf32>
      %235 = vector.multi_reduction <maximumf>, %233, %cst_148 [2] : vector<2x8x8xf32> to vector<2x8xf32>
      %236 = vector.shape_cast %235 : vector<2x8xf32> to vector<2x8x1xf32>
      %237 = arith.maximumf %234, %236 : vector<2x8x1xf32>
      %c0_149 = arith.constant 0 : index
      %c0_150 = arith.constant 0 : index
      %c0_151 = arith.constant 0 : index
      %238 = vector.load %arg24[%c0_149, %c0_150, %c0_151] : memref<2x8x1xf32, #tpu.memory_space<vmem>>, vector<2x8x1xf32>
      %239 = arith.subf %238, %237 : vector<2x8x1xf32>
      %240 = math.exp %239 : vector<2x8x1xf32>
      %241 = vector.broadcast %237 : vector<2x8x1xf32> to vector<2x8x8xf32>
      %242 = arith.subf %233, %241 : vector<2x8x8xf32>
      %243 = math.exp %242 : vector<2x8x8xf32>
      %c0_152 = arith.constant 0 : index
      %c0_153 = arith.constant 0 : index
      %c0_154 = arith.constant 0 : index
      %244 = vector.load %arg25[%c0_152, %c0_153, %c0_154] : memref<2x8x1xf32, #tpu.memory_space<vmem>>, vector<2x8x1xf32>
      %245 = arith.mulf %240, %244 : vector<2x8x1xf32>
      %cst_155 = arith.constant dense<0.000000e+00> : vector<2x8xf32>
      %246 = vector.multi_reduction <add>, %243, %cst_155 [2] : vector<2x8x8xf32> to vector<2x8xf32>
      %247 = vector.shape_cast %246 : vector<2x8xf32> to vector<2x8x1xf32>
      %248 = arith.addf %245, %247 : vector<2x8x1xf32>
      %c0_156 = arith.constant 0 : index
      %c0_157 = arith.constant 0 : index
      %c0_158 = arith.constant 0 : index
      %249 = vector.load %arg25[%c0_156, %c0_157, %c0_158] : memref<2x8x1xf32, #tpu.memory_space<vmem>>, vector<2x8x1xf32>
      tpu.vector_store %arg25[%c0_156, %c0_157, %c0_158], %248 {strides = array<i32>} : memref<2x8x1xf32, #tpu.memory_space<vmem>>, vector<2x8x1xf32>,
      %c0_159 = arith.constant 0 : index
      %c0_160 = arith.constant 0 : index
      %c0_161 = arith.constant 0 : index
      %250 = vector.load %arg26[%c0_159, %c0_160, %c0_161] : memref<2x8x16xf32, #tpu.memory_space<vmem>>, vector<2x8x16xf32>
      %251 = vector.broadcast %240 : vector<2x8x1xf32> to vector<2x8x16xf32>
      %252 = arith.mulf %251, %250 : vector<2x8x16xf32>
      %253 = arith.truncf %243 : vector<2x8x8xf32> to vector<2x8x8xbf16>
      "tpu.trace_start"() <{level = 10 : i32, message = "nqk,nkd->nqd"}> : () -> ()
      %cst_162 = arith.constant dense<0.000000e+00> : vector<2x8x16xf32>
      %254 = tpu.matmul %253, %223, %cst_162 {dimension_numbers = #tpu.dot_dimension_numbers<[2], [1], [1], [2], [0, 0, 0, 1, 1, 2], [0], [0]>} : vector<2x8x8xbf16>, vector<2x8x16xbf16>, vector<2x8x16xf32> -> vector<2x8x16xf32>
      "tpu.trace_stop"() : () -> ()
      %255 = arith.addf %252, %254 : vector<2x8x16xf32>
      %c0_163 = arith.constant 0 : index
      %c0_164 = arith.constant 0 : index
      %c0_165 = arith.constant 0 : index
      %256 = vector.load %arg26[%c0_163, %c0_164, %c0_165] : memref<2x8x16xf32, #tpu.memory_space<vmem>>, vector<2x8x16xf32>
      tpu.vector_store %arg26[%c0_163, %c0_164, %c0_165], %255 {strides = array<i32>} : memref<2x8x16xf32, #tpu.memory_space<vmem>>, vector<2x8x16xf32>,
      %c0_166 = arith.constant 0 : index
      %c0_167 = arith.constant 0 : index
      %c0_168 = arith.constant 0 : index
      %257 = vector.load %arg24[%c0_166, %c0_167, %c0_168] : memref<2x8x1xf32, #tpu.memory_space<vmem>>, vector<2x8x1xf32>
      tpu.vector_store %arg24[%c0_166, %c0_167, %c0_168], %237 {strides = array<i32>} : memref<2x8x1xf32, #tpu.memory_space<vmem>>, vector<2x8x1xf32>,
    }
    %c0_43 = arith.constant 0 : index
    %c0_44 = arith.constant 0 : index
    %c0_45 = arith.constant 0 : index
    %71 = vector.load %arg26[%c0_43, %c0_44, %c0_45] : memref<2x8x16xf32, #tpu.memory_space<vmem>>, vector<2x8x16xf32>
    %c0_46 = arith.constant 0 : index
    %c0_47 = arith.constant 0 : index
    %c0_48 = arith.constant 0 : index
    %72 = vector.load %arg25[%c0_46, %c0_47, %c0_48] : memref<2x8x1xf32, #tpu.memory_space<vmem>>, vector<2x8x1xf32>
    %73 = tpu.reciprocal %72 {approx = true} : vector<2x8x1xf32> -> vector<2x8x1xf32>
    %74 = vector.broadcast %73 : vector<2x8x1xf32> to vector<2x8x16xf32>
    %75 = arith.mulf %71, %74 : vector<2x8x16xf32>
    %76 = tpu.transpose %75, [1, 0, 2] : vector<2x8x16xf32> -> vector<8x2x16xf32>
    %77 = vector.shape_cast %76 : vector<8x2x16xf32> to vector<8x32xf32>
    %78 = vector.extract_strided_slice %33 {offsets = [8, 0], sizes = [8, 32], strides = [1, 1]} : vector<16x32xf32> to vector<8x32xf32>
    %79 = vector.shape_cast %78 : vector<8x32xf32> to vector<8x2x16xf32>
    %80 = tpu.transpose %79, [1, 0, 2] : vector<8x2x16xf32> -> vector<2x8x16xf32>
    %81 = arith.truncf %80 : vector<2x8x16xf32> to vector<2x8x16xbf16>
    %82 = vector.extract_strided_slice %34 {offsets = [8, 0], sizes = [8, 32], strides = [1, 1]} : vector<16x32xf32> to vector<8x32xf32>
    %83 = vector.shape_cast %82 : vector<8x32xf32> to vector<8x2x16xf32>
    %84 = tpu.transpose %83, [1, 0, 2] : vector<8x2x16xf32> -> vector<2x8x16xf32>
    %85 = arith.truncf %84 : vector<2x8x16xf32> to vector<2x8x16xbf16>
    %c0_49 = arith.constant 0 : index
    %c0_50 = arith.constant 0 : index
    %c0_51 = arith.constant 0 : index
    %86 = vector.load %arg22[%c0_49, %c0_50, %c0_51] : memref<2x8x16xbf16, #tpu.memory_space<vmem>>, vector<2x8x16xbf16>
    tpu.vector_store %arg22[%c0_49, %c0_50, %c0_51], %85 {strides = array<i32>} : memref<2x8x16xbf16, #tpu.memory_space<vmem>>, vector<2x8x16xbf16>,
    %87 = vector.extract_strided_slice %35 {offsets = [8, 0], sizes = [8, 32], strides = [1, 1]} : vector<16x32xf32> to vector<8x32xf32>
    %88 = vector.shape_cast %87 : vector<8x32xf32> to vector<8x2x16xf32>
    %89 = tpu.transpose %88, [1, 0, 2] : vector<8x2x16xf32> -> vector<2x8x16xf32>
    %90 = arith.truncf %89 : vector<2x8x16xf32> to vector<2x8x16xbf16>
    %c0_52 = arith.constant 0 : index
    %c0_53 = arith.constant 0 : index
    %c0_54 = arith.constant 0 : index
    %91 = vector.load %arg23[%c0_52, %c0_53, %c0_54] : memref<2x8x16xbf16, #tpu.memory_space<vmem>>, vector<2x8x16xbf16>
    tpu.vector_store %arg23[%c0_52, %c0_53, %c0_54], %90 {strides = array<i32>} : memref<2x8x16xbf16, #tpu.memory_space<vmem>>, vector<2x8x16xbf16>,
    %cst_55 = arith.constant 0xFF800000 : f32
    %92 = vector.broadcast %cst_55 : f32 to vector<2x8x1xf32>
    %c0_56 = arith.constant 0 : index
    %c0_57 = arith.constant 0 : index
    %c0_58 = arith.constant 0 : index
    %93 = vector.load %arg24[%c0_56, %c0_57, %c0_58] : memref<2x8x1xf32, #tpu.memory_space<vmem>>, vector<2x8x1xf32>
    tpu.vector_store %arg24[%c0_56, %c0_57, %c0_58], %92 {strides = array<i32>} : memref<2x8x1xf32, #tpu.memory_space<vmem>>, vector<2x8x1xf32>,
    %cst_59 = arith.constant 0.000000e+00 : f32
    %94 = vector.broadcast %cst_59 : f32 to vector<2x8x1xf32>
    %c0_60 = arith.constant 0 : index
    %c0_61 = arith.constant 0 : index
    %c0_62 = arith.constant 0 : index
    %95 = vector.load %arg25[%c0_60, %c0_61, %c0_62] : memref<2x8x1xf32, #tpu.memory_space<vmem>>, vector<2x8x1xf32>
    tpu.vector_store %arg25[%c0_60, %c0_61, %c0_62], %94 {strides = array<i32>} : memref<2x8x1xf32, #tpu.memory_space<vmem>>, vector<2x8x1xf32>,
    %cst_63 = arith.constant 0.000000e+00 : f32
    %96 = vector.broadcast %cst_63 : f32 to vector<2x8x16xf32>
    %c0_64 = arith.constant 0 : index
    %c0_65 = arith.constant 0 : index
    %c0_66 = arith.constant 0 : index
    %97 = vector.load %arg26[%c0_64, %c0_65, %c0_66] : memref<2x8x16xf32, #tpu.memory_space<vmem>>, vector<2x8x16xf32>
    tpu.vector_store %arg26[%c0_64, %c0_65, %c0_66], %96 {strides = array<i32>} : memref<2x8x16xf32, #tpu.memory_space<vmem>>, vector<2x8x16xf32>,
    %c2_i32_67 = arith.constant 2 : i32
    %98 = arith.muli %arg0, %c2_i32_67 : i32
    %c1_i32_68 = arith.constant 1 : i32
    %99 = arith.addi %98, %c1_i32_68 : i32
    %100 = arith.index_cast %99 : i32 to index
    %101 = memref.load %arg1[%100] : memref<2xi32, #tpu.memory_space<smem>>
    %c7_i32_69 = arith.constant 7 : i32
    %102 = arith.addi %101, %c7_i32_69 : i32
    %c8_i32_70 = arith.constant 8 : i32
    %103 = arith.divsi %102, %c8_i32_70 : i32
    %c1_i32_71 = arith.constant 1 : i32
    %c1_i32_72 = arith.constant 1 : i32
    %104 = arith.maxsi %c1_i32_71, %103 : i32
    %105 = arith.minsi %c1_i32_72, %104 : i32
    %c0_i32_73 = arith.constant 0 : i32
    %106 = arith.subi %105, %c0_i32_73 : i32
    %c1_i32_74 = arith.constant 1 : i32
    %c1_i32_75 = arith.constant 1 : i32
    %107 = arith.subi %c1_i32_74, %c1_i32_75 : i32
    %108 = arith.addi %106, %107 : i32
    %c1_i32_76 = arith.constant 1 : i32
    %109 = arith.divsi %108, %c1_i32_76 : i32
    %c1_i32_77 = arith.constant 1 : i32
    %c0_i32_78 = arith.constant 0 : i32
    %c0_i32_79 = arith.constant 0 : i32
    %110 = arith.subi %109, %c0_i32_79 : i32
    %111 = arith.addi %c0_i32_79, %110 : i32
    %c1_i32_80 = arith.constant 1 : i32
    scf.for %arg27 = %c0_i32_79 to %111 step %c1_i32_80  : i32 {
      %216 = arith.muli %arg27, %c1_i32_77 : i32
      %217 = arith.addi %c0_i32_78, %216 : i32
      %c8_i32_137 = arith.constant 8 : i32
      %218 = arith.muli %217, %c8_i32_137 : i32
      %219 = tpu.assume_multiple %218, 8 : i32
      %c0_138 = arith.constant 0 : index
      %220 = arith.index_cast %219 : i32 to index
      %c0_139 = arith.constant 0 : index
      %221 = vector.load %arg22[%c0_138, %220, %c0_139] : memref<2x8x16xbf16, #tpu.memory_space<vmem>>, vector<2x8x16xbf16>
      %c0_140 = arith.constant 0 : index
      %222 = arith.index_cast %219 : i32 to index
      %c0_141 = arith.constant 0 : index
      %223 = vector.load %arg23[%c0_140, %222, %c0_141] : memref<2x8x16xbf16, #tpu.memory_space<vmem>>, vector<2x8x16xbf16>
      %224 = vector.broadcast %219 : i32 to vector<1x1x8xi32>
      %225 = arith.addi %36, %224 : vector<1x1x8xi32>
      %226 = vector.broadcast %101 : i32 to vector<1x1x8xi32>
      %227 = arith.cmpi slt, %225, %226 : vector<1x1x8xi32>
      %cst_142 = arith.constant 0.000000e+00 : f32
      %cst_143 = arith.constant -1.000000e+09 : f32
      %228 = vector.broadcast %cst_142 : f32 to vector<1x1x8xf32>
      %229 = vector.broadcast %cst_143 : f32 to vector<1x1x8xf32>
      %230 = arith.select %227, %228, %229 : vector<1x1x8xi1>, vector<1x1x8xf32>
      "tpu.trace_start"() <{level = 10 : i32, message = "nqd,nkd->nqk"}> : () -> ()
      %cst_144 = arith.constant dense<0.000000e+00> : vector<2x8x8xf32>
      %231 = tpu.matmul %81, %221, %cst_144 {dimension_numbers = #tpu.dot_dimension_numbers<[2], [2], [1], [1], [0, 0, 0, 1, 1, 1], [0], [0]>} : vector<2x8x16xbf16>, vector<2x8x16xbf16>, vector<2x8x8xf32> -> vector<2x8x8xf32>
      "tpu.trace_stop"() : () -> ()
      %232 = vector.broadcast %230 : vector<1x1x8xf32> to vector<2x8x8xf32>
      %233 = arith.addf %231, %232 : vector<2x8x8xf32>
      %c0_145 = arith.constant 0 : index
      %c0_146 = arith.constant 0 : index
      %c0_147 = arith.constant 0 : index
      %234 = vector.load %arg24[%c0_145, %c0_146, %c0_147] : memref<2x8x1xf32, #tpu.memory_space<vmem>>, vector<2x8x1xf32>
      %cst_148 = arith.constant dense<0xFF800000> : vector<2x8xf32>
      %235 = vector.multi_reduction <maximumf>, %233, %cst_148 [2] : vector<2x8x8xf32> to vector<2x8xf32>
      %236 = vector.shape_cast %235 : vector<2x8xf32> to vector<2x8x1xf32>
      %237 = arith.maximumf %234, %236 : vector<2x8x1xf32>
      %c0_149 = arith.constant 0 : index
      %c0_150 = arith.constant 0 : index
      %c0_151 = arith.constant 0 : index
      %238 = vector.load %arg24[%c0_149, %c0_150, %c0_151] : memref<2x8x1xf32, #tpu.memory_space<vmem>>, vector<2x8x1xf32>
      %239 = arith.subf %238, %237 : vector<2x8x1xf32>
      %240 = math.exp %239 : vector<2x8x1xf32>
      %241 = vector.broadcast %237 : vector<2x8x1xf32> to vector<2x8x8xf32>
      %242 = arith.subf %233, %241 : vector<2x8x8xf32>
      %243 = math.exp %242 : vector<2x8x8xf32>
      %c0_152 = arith.constant 0 : index
      %c0_153 = arith.constant 0 : index
      %c0_154 = arith.constant 0 : index
      %244 = vector.load %arg25[%c0_152, %c0_153, %c0_154] : memref<2x8x1xf32, #tpu.memory_space<vmem>>, vector<2x8x1xf32>
      %245 = arith.mulf %240, %244 : vector<2x8x1xf32>
      %cst_155 = arith.constant dense<0.000000e+00> : vector<2x8xf32>
      %246 = vector.multi_reduction <add>, %243, %cst_155 [2] : vector<2x8x8xf32> to vector<2x8xf32>
      %247 = vector.shape_cast %246 : vector<2x8xf32> to vector<2x8x1xf32>
      %248 = arith.addf %245, %247 : vector<2x8x1xf32>
      %c0_156 = arith.constant 0 : index
      %c0_157 = arith.constant 0 : index
      %c0_158 = arith.constant 0 : index
      %249 = vector.load %arg25[%c0_156, %c0_157, %c0_158] : memref<2x8x1xf32, #tpu.memory_space<vmem>>, vector<2x8x1xf32>
      tpu.vector_store %arg25[%c0_156, %c0_157, %c0_158], %248 {strides = array<i32>} : memref<2x8x1xf32, #tpu.memory_space<vmem>>, vector<2x8x1xf32>,
      %c0_159 = arith.constant 0 : index
      %c0_160 = arith.constant 0 : index
      %c0_161 = arith.constant 0 : index
      %250 = vector.load %arg26[%c0_159, %c0_160, %c0_161] : memref<2x8x16xf32, #tpu.memory_space<vmem>>, vector<2x8x16xf32>
      %251 = vector.broadcast %240 : vector<2x8x1xf32> to vector<2x8x16xf32>
      %252 = arith.mulf %251, %250 : vector<2x8x16xf32>
      %253 = arith.truncf %243 : vector<2x8x8xf32> to vector<2x8x8xbf16>
      "tpu.trace_start"() <{level = 10 : i32, message = "nqk,nkd->nqd"}> : () -> ()
      %cst_162 = arith.constant dense<0.000000e+00> : vector<2x8x16xf32>
      %254 = tpu.matmul %253, %223, %cst_162 {dimension_numbers = #tpu.dot_dimension_numbers<[2], [1], [1], [2], [0, 0, 0, 1, 1, 2], [0], [0]>} : vector<2x8x8xbf16>, vector<2x8x16xbf16>, vector<2x8x16xf32> -> vector<2x8x16xf32>
      "tpu.trace_stop"() : () -> ()
      %255 = arith.addf %252, %254 : vector<2x8x16xf32>
      %c0_163 = arith.constant 0 : index
      %c0_164 = arith.constant 0 : index
      %c0_165 = arith.constant 0 : index
      %256 = vector.load %arg26[%c0_163, %c0_164, %c0_165] : memref<2x8x16xf32, #tpu.memory_space<vmem>>, vector<2x8x16xf32>
      tpu.vector_store %arg26[%c0_163, %c0_164, %c0_165], %255 {strides = array<i32>} : memref<2x8x16xf32, #tpu.memory_space<vmem>>, vector<2x8x16xf32>,
      %c0_166 = arith.constant 0 : index
      %c0_167 = arith.constant 0 : index
      %c0_168 = arith.constant 0 : index
      %257 = vector.load %arg24[%c0_166, %c0_167, %c0_168] : memref<2x8x1xf32, #tpu.memory_space<vmem>>, vector<2x8x1xf32>
      tpu.vector_store %arg24[%c0_166, %c0_167, %c0_168], %237 {strides = array<i32>} : memref<2x8x1xf32, #tpu.memory_space<vmem>>, vector<2x8x1xf32>,
    }
    %c0_81 = arith.constant 0 : index
    %c0_82 = arith.constant 0 : index
    %c0_83 = arith.constant 0 : index
    %112 = vector.load %arg26[%c0_81, %c0_82, %c0_83] : memref<2x8x16xf32, #tpu.memory_space<vmem>>, vector<2x8x16xf32>
    %c0_84 = arith.constant 0 : index
    %c0_85 = arith.constant 0 : index
    %c0_86 = arith.constant 0 : index
    %113 = vector.load %arg25[%c0_84, %c0_85, %c0_86] : memref<2x8x1xf32, #tpu.memory_space<vmem>>, vector<2x8x1xf32>
    %114 = tpu.reciprocal %113 {approx = true} : vector<2x8x1xf32> -> vector<2x8x1xf32>
    %115 = vector.broadcast %114 : vector<2x8x1xf32> to vector<2x8x16xf32>
    %116 = arith.mulf %112, %115 : vector<2x8x16xf32>
    %117 = tpu.transpose %116, [1, 0, 2] : vector<2x8x16xf32> -> vector<8x2x16xf32>
    %118 = vector.shape_cast %117 : vector<8x2x16xf32> to vector<8x32xf32>
    %119 = tpu.concatenate %77, %118 in 0 : vector<8x32xf32>, vector<8x32xf32> -> vector<16x32xf32>
    %120 = arith.truncf %119 : vector<16x32xf32> to vector<16x32xbf16>
    %c0_87 = arith.constant 0 : index
    %c0_88 = arith.constant 0 : index
    %121 = vector.load %arg7[%c0_87, %c0_88] : memref<32x32xbf16, #tpu.memory_space<vmem>>, vector<32x32xbf16>
    %cst_89 = arith.constant dense<0.000000e+00> : vector<16x32xf32>
    %122 = tpu.matmul %120, %121, %cst_89 {dimension_numbers = #tpu.dot_dimension_numbers<[1], [0], [0], [1], [0, 0, 1, 1], [], []>} : vector<16x32xbf16>, vector<32x32xbf16>, vector<16x32xf32> -> vector<16x32xf32>
    %c0_90 = arith.constant 0 : index
    %c0_91 = arith.constant 0 : index
    %123 = vector.load %arg8[%c0_90, %c0_91] : memref<1x32xf32, #tpu.memory_space<vmem>>, vector<1x32xf32>
    %124 = vector.broadcast %123 : vector<1x32xf32> to vector<16x32xf32>
    %125 = arith.addf %122, %124 : vector<16x32xf32>
    %126 = arith.addf %24, %125 : vector<16x32xf32>
    %c0_92 = arith.constant 0 : index
    %c0_93 = arith.constant 0 : index
    %127 = vector.load %arg9[%c0_92, %c0_93] : memref<1x32xf32, #tpu.memory_space<vmem>>, vector<1x32xf32>
    %c0_94 = arith.constant 0 : index
    %c0_95 = arith.constant 0 : index
    %128 = vector.load %arg10[%c0_94, %c0_95] : memref<1x32xf32, #tpu.memory_space<vmem>>, vector<1x32xf32>
    %cst_96 = arith.constant dense<0.000000e+00> : vector<16xf32>
    %129 = vector.multi_reduction <add>, %126, %cst_96 [1] : vector<16x32xf32> to vector<16xf32>
    %130 = vector.shape_cast %129 : vector<16xf32> to vector<16x1xf32>
    %cst_97 = arith.constant 3.200000e+01 : f32
    %131 = vector.broadcast %cst_97 : f32 to vector<16x1xf32>
    %132 = arith.divf %130, %131 : vector<16x1xf32>
    %133 = vector.broadcast %132 : vector<16x1xf32> to vector<16x32xf32>
    %134 = arith.subf %126, %133 : vector<16x32xf32>
    %135 = arith.mulf %134, %134 : vector<16x32xf32>
    %cst_98 = arith.constant dense<0.000000e+00> : vector<16xf32>
    %136 = vector.multi_reduction <add>, %135, %cst_98 [1] : vector<16x32xf32> to vector<16xf32>
    %137 = vector.shape_cast %136 : vector<16xf32> to vector<16x1xf32>
    %cst_99 = arith.constant 3.200000e+01 : f32
    %138 = vector.broadcast %cst_99 : f32 to vector<16x1xf32>
    %139 = arith.divf %137, %138 : vector<16x1xf32>
    %cst_100 = arith.constant 9.99999996E-13 : f32
    %140 = vector.broadcast %cst_100 : f32 to vector<16x1xf32>
    %141 = arith.addf %139, %140 : vector<16x1xf32>
    %142 = math.rsqrt %141 : vector<16x1xf32>
    %143 = vector.broadcast %142 : vector<16x1xf32> to vector<16x32xf32>
    %144 = arith.mulf %134, %143 : vector<16x32xf32>
    %145 = vector.broadcast %127 : vector<1x32xf32> to vector<16x32xf32>
    %146 = arith.mulf %144, %145 : vector<16x32xf32>
    %147 = vector.broadcast %128 : vector<1x32xf32> to vector<16x32xf32>
    %148 = arith.addf %146, %147 : vector<16x32xf32>
    %149 = arith.truncf %148 : vector<16x32xf32> to vector<16x32xbf16>
    %c0_101 = arith.constant 0 : index
    %c0_102 = arith.constant 0 : index
    %150 = vector.load %arg11[%c0_101, %c0_102] : memref<32x64xbf16, #tpu.memory_space<vmem>>, vector<32x64xbf16>
    %cst_103 = arith.constant dense<0.000000e+00> : vector<16x64xf32>
    %151 = tpu.matmul %149, %150, %cst_103 {dimension_numbers = #tpu.dot_dimension_numbers<[1], [0], [0], [1], [0, 0, 1, 1], [], []>} : vector<16x32xbf16>, vector<32x64xbf16>, vector<16x64xf32> -> vector<16x64xf32>
    %c0_104 = arith.constant 0 : index
    %c0_105 = arith.constant 0 : index
    %152 = vector.load %arg12[%c0_104, %c0_105] : memref<1x64xf32, #tpu.memory_space<vmem>>, vector<1x64xf32>
    %153 = vector.broadcast %152 : vector<1x64xf32> to vector<16x64xf32>
    %154 = arith.addf %151, %153 : vector<16x64xf32>
    %cst_106 = arith.constant 5.000000e-01 : f32
    %155 = vector.broadcast %cst_106 : f32 to vector<16x64xf32>
    %156 = arith.mulf %155, %154 : vector<16x64xf32>
    %157 = arith.mulf %154, %154 : vector<16x64xf32>
    %158 = arith.mulf %157, %154 : vector<16x64xf32>
    %cst_107 = arith.constant 4.471500e-02 : f32
    %159 = vector.broadcast %cst_107 : f32 to vector<16x64xf32>
    %160 = arith.mulf %159, %158 : vector<16x64xf32>
    %161 = arith.addf %154, %160 : vector<16x64xf32>
    %cst_108 = arith.constant 0.797884583 : f32
    %162 = vector.broadcast %cst_108 : f32 to vector<16x64xf32>
    %163 = arith.mulf %162, %161 : vector<16x64xf32>
    %164 = math.tanh %163 : vector<16x64xf32>
    %cst_109 = arith.constant 1.000000e+00 : f32
    %165 = vector.broadcast %cst_109 : f32 to vector<16x64xf32>
    %166 = arith.addf %165, %164 : vector<16x64xf32>
    %167 = arith.mulf %156, %166 : vector<16x64xf32>
    %168 = arith.truncf %167 : vector<16x64xf32> to vector<16x64xbf16>
    %c0_110 = arith.constant 0 : index
    %c0_111 = arith.constant 0 : index
    %169 = vector.load %arg13[%c0_110, %c0_111] : memref<64x32xbf16, #tpu.memory_space<vmem>>, vector<64x32xbf16>
    %cst_112 = arith.constant dense<0.000000e+00> : vector<16x32xf32>
    %170 = tpu.matmul %168, %169, %cst_112 {dimension_numbers = #tpu.dot_dimension_numbers<[1], [0], [0], [1], [0, 0, 1, 1], [], []>} : vector<16x64xbf16>, vector<64x32xbf16>, vector<16x32xf32> -> vector<16x32xf32>
    %c0_113 = arith.constant 0 : index
    %c0_114 = arith.constant 0 : index
    %171 = vector.load %arg14[%c0_113, %c0_114] : memref<1x32xf32, #tpu.memory_space<vmem>>, vector<1x32xf32>
    %172 = vector.broadcast %171 : vector<1x32xf32> to vector<16x32xf32>
    %173 = arith.addf %170, %172 : vector<16x32xf32>
    %174 = arith.addf %148, %173 : vector<16x32xf32>
    %c0_115 = arith.constant 0 : index
    %c0_116 = arith.constant 0 : index
    %175 = vector.load %arg15[%c0_115, %c0_116] : memref<1x32xf32, #tpu.memory_space<vmem>>, vector<1x32xf32>
    %c0_117 = arith.constant 0 : index
    %c0_118 = arith.constant 0 : index
    %176 = vector.load %arg16[%c0_117, %c0_118] : memref<1x32xf32, #tpu.memory_space<vmem>>, vector<1x32xf32>
    %cst_119 = arith.constant dense<0.000000e+00> : vector<16xf32>
    %177 = vector.multi_reduction <add>, %174, %cst_119 [1] : vector<16x32xf32> to vector<16xf32>
    %178 = vector.shape_cast %177 : vector<16xf32> to vector<16x1xf32>
    %cst_120 = arith.constant 3.200000e+01 : f32
    %179 = vector.broadcast %cst_120 : f32 to vector<16x1xf32>
    %180 = arith.divf %178, %179 : vector<16x1xf32>
    %181 = vector.broadcast %180 : vector<16x1xf32> to vector<16x32xf32>
    %182 = arith.subf %174, %181 : vector<16x32xf32>
    %183 = arith.mulf %182, %182 : vector<16x32xf32>
    %cst_121 = arith.constant dense<0.000000e+00> : vector<16xf32>
    %184 = vector.multi_reduction <add>, %183, %cst_121 [1] : vector<16x32xf32> to vector<16xf32>
    %185 = vector.shape_cast %184 : vector<16xf32> to vector<16x1xf32>
    %cst_122 = arith.constant 3.200000e+01 : f32
    %186 = vector.broadcast %cst_122 : f32 to vector<16x1xf32>
    %187 = arith.divf %185, %186 : vector<16x1xf32>
    %cst_123 = arith.constant 9.99999996E-13 : f32
    %188 = vector.broadcast %cst_123 : f32 to vector<16x1xf32>
    %189 = arith.addf %187, %188 : vector<16x1xf32>
    %190 = math.rsqrt %189 : vector<16x1xf32>
    %191 = vector.broadcast %190 : vector<16x1xf32> to vector<16x32xf32>
    %192 = arith.mulf %182, %191 : vector<16x32xf32>
    %193 = vector.broadcast %175 : vector<1x32xf32> to vector<16x32xf32>
    %194 = arith.mulf %192, %193 : vector<16x32xf32>
    %195 = vector.broadcast %176 : vector<1x32xf32> to vector<16x32xf32>
    %196 = arith.addf %194, %195 : vector<16x32xf32>
    %197 = vector.extract_strided_slice %196 {offsets = [0, 0], sizes = [1, 32], strides = [1, 1]} : vector<16x32xf32> to vector<1x32xf32>
    %198 = vector.extract_strided_slice %196 {offsets = [8, 0], sizes = [1, 32], strides = [1, 1]} : vector<16x32xf32> to vector<1x32xf32>
    %199 = tpu.concatenate %197, %198 in 0 : vector<1x32xf32>, vector<1x32xf32> -> vector<2x32xf32>
    %200 = arith.truncf %199 : vector<2x32xf32> to vector<2x32xbf16>
    %c0_124 = arith.constant 0 : index
    %c0_125 = arith.constant 0 : index
    %201 = vector.load %arg17[%c0_124, %c0_125] : memref<32x32xbf16, #tpu.memory_space<vmem>>, vector<32x32xbf16>
    %cst_126 = arith.constant dense<0.000000e+00> : vector<2x32xf32>
    %202 = tpu.matmul %200, %201, %cst_126 {dimension_numbers = #tpu.dot_dimension_numbers<[1], [0], [0], [1], [0, 0, 1, 1], [], []>} : vector<2x32xbf16>, vector<32x32xbf16>, vector<2x32xf32> -> vector<2x32xf32>
    %c0_127 = arith.constant 0 : index
    %c0_128 = arith.constant 0 : index
    %203 = vector.load %arg18[%c0_127, %c0_128] : memref<1x32xf32, #tpu.memory_space<vmem>>, vector<1x32xf32>
    %204 = vector.broadcast %203 : vector<1x32xf32> to vector<2x32xf32>
    %205 = arith.addf %202, %204 : vector<2x32xf32>
    %206 = math.tanh %205 : vector<2x32xf32>
    %207 = arith.truncf %206 : vector<2x32xf32> to vector<2x32xbf16>
    %c0_129 = arith.constant 0 : index
    %c0_130 = arith.constant 0 : index
    %208 = vector.load %arg19[%c0_129, %c0_130] : memref<32x128xbf16, #tpu.memory_space<vmem>>, vector<32x128xbf16>
    %cst_131 = arith.constant dense<0.000000e+00> : vector<2x128xf32>
    %209 = tpu.matmul %207, %208, %cst_131 {dimension_numbers = #tpu.dot_dimension_numbers<[1], [0], [0], [1], [0, 0, 1, 1], [], []>} : vector<2x32xbf16>, vector<32x128xbf16>, vector<2x128xf32> -> vector<2x128xf32>
    %c0_132 = arith.constant 0 : index
    %c0_133 = arith.constant 0 : index
    %210 = vector.load %arg20[%c0_132, %c0_133] : memref<1x128xf32, #tpu.memory_space<vmem>>, vector<1x128xf32>
    %211 = vector.broadcast %210 : vector<1x128xf32> to vector<2x128xf32>
    %212 = arith.addf %209, %211 : vector<2x128xf32>
    %c0_134 = arith.constant 0 : index
    %c0_135 = arith.constant 0 : index
    %c0_136 = arith.constant 0 : index
    %213 = vector.load %arg21[%c0_134, %c0_135, %c0_136] : memref<1x2x128xf32, #tpu.memory_space<vmem>>, vector<1x2x128xf32>
    %214 = vector.shape_cast %213 : vector<1x2x128xf32> to vector<2x128xf32>
    %215 = vector.shape_cast %212 : vector<2x128xf32> to vector<1x2x128xf32>
    tpu.vector_store %arg21[%c0_134, %c0_135, %c0_136], %215 {strides = array<i32>} : memref<1x2x128xf32, #tpu.memory_space<vmem>>, vector<1x2x128xf32>,
    return
  }
  func.func @transform_0(%arg0: i32, %arg1: memref<2xi32, #tpu.memory_space<smem>>) -> (i32, i32, i32) {
    %c0_i32 = arith.constant 0 : i32
    %c0_i32_0 = arith.constant 0 : i32
    %c0_i32_1 = arith.constant 0 : i32
    return %arg0, %c0_i32, %c0_i32_0 : i32, i32, i32
  }
  func.func @transform_1(%arg0: i32, %arg1: memref<2xi32, #tpu.memory_space<smem>>) -> (i32, i32) {
    %c0_i32 = arith.constant 0 : i32
    %c0_i32_0 = arith.constant 0 : i32
    %c0_i32_1 = arith.constant 0 : i32
    return %c0_i32, %c0_i32_0 : i32, i32
  }
  func.func @transform_2(%arg0: i32, %arg1: memref<2xi32, #tpu.memory_space<smem>>) -> (i32, i32) {
    %c0_i32 = arith.constant 0 : i32
    %c0_i32_0 = arith.constant 0 : i32
    %c0_i32_1 = arith.constant 0 : i32
    return %c0_i32, %c0_i32_0 : i32, i32
  }
  func.func @transform_3(%arg0: i32, %arg1: memref<2xi32, #tpu.memory_space<smem>>) -> (i32, i32) {
    %c0_i32 = arith.constant 0 : i32
    %c0_i32_0 = arith.constant 0 : i32
    %c0_i32_1 = arith.constant 0 : i32
    return %c0_i32, %c0_i32_0 : i32, i32
  }
  func.func @transform_4(%arg0: i32, %arg1: memref<2xi32, #tpu.memory_space<smem>>) -> (i32, i32) {
    %c0_i32 = arith.constant 0 : i32
    %c0_i32_0 = arith.constant 0 : i32
    %c0_i32_1 = arith.constant 0 : i32
    return %c0_i32, %c0_i32_0 : i32, i32
  }
  func.func @transform_5(%arg0: i32, %arg1: memref<2xi32, #tpu.memory_space<smem>>) -> (i32, i32) {
    %c0_i32 = arith.constant 0 : i32
    %c0_i32_0 = arith.constant 0 : i32
    %c0_i32_1 = arith.constant 0 : i32
    return %c0_i32, %c0_i32_0 : i32, i32
  }
  func.func @transform_6(%arg0: i32, %arg1: memref<2xi32, #tpu.memory_space<smem>>) -> (i32, i32) {
    %c0_i32 = arith.constant 0 : i32
    %c0_i32_0 = arith.constant 0 : i32
    %c0_i32_1 = arith.constant 0 : i32
    return %c0_i32, %c0_i32_0 : i32, i32
  }
  func.func @transform_7(%arg0: i32, %arg1: memref<2xi32, #tpu.memory_space<smem>>) -> (i32, i32) {
    %c0_i32 = arith.constant 0 : i32
    %c0_i32_0 = arith.constant 0 : i32
    %c0_i32_1 = arith.constant 0 : i32
    return %c0_i32, %c0_i32_0 : i32, i32
  }
  func.func @transform_8(%arg0: i32, %arg1: memref<2xi32, #tpu.memory_space<smem>>) -> (i32, i32) {
    %c0_i32 = arith.constant 0 : i32
    %c0_i32_0 = arith.constant 0 : i32
    %c0_i32_1 = arith.constant 0 : i32
    return %c0_i32, %c0_i32_0 : i32, i32
  }
  func.func @transform_9(%arg0: i32, %arg1: memref<2xi32, #tpu.memory_space<smem>>) -> (i32, i32) {
    %c0_i32 = arith.constant 0 : i32
    %c0_i32_0 = arith.constant 0 : i32
    %c0_i32_1 = arith.constant 0 : i32
    return %c0_i32, %c0_i32_0 : i32, i32
  }
  func.func @transform_10(%arg0: i32, %arg1: memref<2xi32, #tpu.memory_space<smem>>) -> (i32, i32) {
    %c0_i32 = arith.constant 0 : i32
    %c0_i32_0 = arith.constant 0 : i32
    %c0_i32_1 = arith.constant 0 : i32
    return %c0_i32, %c0_i32_0 : i32, i32
  }
  func.func @transform_11(%arg0: i32, %arg1: memref<2xi32, #tpu.memory_space<smem>>) -> (i32, i32) {
    %c0_i32 = arith.constant 0 : i32
    %c0_i32_0 = arith.constant 0 : i32
    %c0_i32_1 = arith.constant 0 : i32
    return %c0_i32, %c0_i32_0 : i32, i32
  }
  func.func @transform_12(%arg0: i32, %arg1: memref<2xi32, #tpu.memory_space<smem>>) -> (i32, i32) {
    %c0_i32 = arith.constant 0 : i32
    %c0_i32_0 = arith.constant 0 : i32
    %c0_i32_1 = arith.constant 0 : i32
    return %c0_i32, %c0_i32_0 : i32, i32
  }
  func.func @transform_13(%arg0: i32, %arg1: memref<2xi32, #tpu.memory_space<smem>>) -> (i32, i32) {
    %c0_i32 = arith.constant 0 : i32
    %c0_i32_0 = arith.constant 0 : i32
    %c0_i32_1 = arith.constant 0 : i32
    return %c0_i32, %c0_i32_0 : i32, i32
  }
  func.func @transform_14(%arg0: i32, %arg1: memref<2xi32, #tpu.memory_space<smem>>) -> (i32, i32) {
    %c0_i32 = arith.constant 0 : i32
    %c0_i32_0 = arith.constant 0 : i32
    %c0_i32_1 = arith.constant 0 : i32
    return %c0_i32, %c0_i32_0 : i32, i32
  }
  func.func @transform_15(%arg0: i32, %arg1: memref<2xi32, #tpu.memory_space<smem>>) -> (i32, i32) {
    %c0_i32 = arith.constant 0 : i32
    %c0_i32_0 = arith.constant 0 : i32
    %c0_i32_1 = arith.constant 0 : i32
    return %c0_i32, %c0_i32_0 : i32, i32
  }
  func.func @transform_16(%arg0: i32, %arg1: memref<2xi32, #tpu.memory_space<smem>>) -> (i32, i32) {
    %c0_i32 = arith.constant 0 : i32
    %c0_i32_0 = arith.constant 0 : i32
    %c0_i32_1 = arith.constant 0 : i32
    return %c0_i32, %c0_i32_0 : i32, i32
  }
  func.func @transform_17(%arg0: i32, %arg1: memref<2xi32, #tpu.memory_space<smem>>) -> (i32, i32) {
    %c0_i32 = arith.constant 0 : i32
    %c0_i32_0 = arith.constant 0 : i32
    %c0_i32_1 = arith.constant 0 : i32
    return %c0_i32, %c0_i32_0 : i32, i32
  }
  func.func @transform_18(%arg0: i32, %arg1: memref<2xi32, #tpu.memory_space<smem>>) -> (i32, i32) {
    %c0_i32 = arith.constant 0 : i32
    %c0_i32_0 = arith.constant 0 : i32
    %c0_i32_1 = arith.constant 0 : i32
    return %c0_i32, %c0_i32_0 : i32, i32
  }
  func.func @transform_19(%arg0: i32, %arg1: memref<2xi32, #tpu.memory_space<smem>>) -> (i32, i32, i32) {
    %c0_i32 = arith.constant 0 : i32
    %c0_i32_0 = arith.constant 0 : i32
    %c0_i32_1 = arith.constant 0 : i32
    return %arg0, %c0_i32, %c0_i32_0 : i32, i32, i32
  }
}

module attributes {stable_mosaic.version = 11 : i64} {
  func.func @bert_classifier_kernel(%arg0: i32, %arg1: memref<2xi32, #tpu.memory_space<smem>>, %arg2: memref<2x8x32xbf16, #tpu.memory_space<vmem>>, %arg3: memref<1x32xf32, #tpu.memory_space<vmem>>, %arg4: memref<1x32xf32, #tpu.memory_space<vmem>>, %arg5: memref<32x96xbf16, #tpu.memory_space<vmem>>, %arg6: memref<1x96xf32, #tpu.memory_space<vmem>>, %arg7: memref<32x32xbf16, #tpu.memory_space<vmem>>, %arg8: memref<1x32xf32, #tpu.memory_space<vmem>>, %arg9: memref<1x32xf32, #tpu.memory_space<vmem>>, %arg10: memref<1x32xf32, #tpu.memory_space<vmem>>, %arg11: memref<32x64xbf16, #tpu.memory_space<vmem>>, %arg12: memref<1x64xf32, #tpu.memory_space<vmem>>, %arg13: memref<64x32xbf16, #tpu.memory_space<vmem>>, %arg14: memref<1x32xf32, #tpu.memory_space<vmem>>, %arg15: memref<1x32xf32, #tpu.memory_space<vmem>>, %arg16: memref<1x32xf32, #tpu.memory_space<vmem>>, %arg17: memref<32x32xbf16, #tpu.memory_space<vmem>>, %arg18: memref<1x32xf32, #tpu.memory_space<vmem>>, %arg19: memref<32x128xbf16, #tpu.memory_space<vmem>>, %arg20: memref<1x128xf32, #tpu.memory_space<vmem>>, %arg21: memref<1x2x128xf32, #tpu.memory_space<vmem>>, %arg22: memref<2x8x16xbf16, #tpu.memory_space<vmem>>, %arg23: memref<2x8x16xbf16, #tpu.memory_space<vmem>>, %arg24: memref<2x8x1xf32, #tpu.memory_space<vmem>>, %arg25: memref<2x8x1xf32, #tpu.memory_space<vmem>>, %arg26: memref<2x8x16xf32, #tpu.memory_space<vmem>>) attributes {dimension_semantics = [#tpu.dimension_semantics<parallel>], iteration_bounds = array<i64: 1>, scalar_prefetch = 1 : i64, scratch_operands = 5 : i64, tpu.core_type = #tpu.core_type<tc>, window_params = [{transform_indices = @transform_0, window_bounds = array<i64: 2, 8, 32>}, {pipeline_mode = #tpu.pipeline_mode<synchronous>, transform_indices = @transform_1, window_bounds = array<i64: 1, 32>}, {pipeline_mode = #tpu.pipeline_mode<synchronous>, transform_indices = @transform_2, window_bounds = array<i64: 1, 32>}, {pipeline_mode = #tpu.pipeline_mode<synchronous>, transform_indices = @transform_3, window_bounds = array<i64: 32, 96>}, {pipeline_mode = #tpu.pipeline_mode<synchronous>, transform_indices = @transform_4, window_bounds = array<i64: 1, 96>}, {pipeline_mode = #tpu.pipeline_mode<synchronous>, transform_indices = @transform_5, window_bounds = array<i64: 32, 32>}, {pipeline_mode = #tpu.pipeline_mode<synchronous>, transform_indices = @transform_6, window_bounds = array<i64: 1, 32>}, {pipeline_mode = #tpu.pipeline_mode<synchronous>, transform_indices = @transform_7, window_bounds = array<i64: 1, 32>}, {pipeline_mode = #tpu.pipeline_mode<synchronous>, transform_indices = @transform_8, window_bounds = array<i64: 1, 32>}, {pipeline_mode = #tpu.pipeline_mode<synchronous>, transform_indices = @transform_9, window_bounds = array<i64: 32, 64>}, {pipeline_mode = #tpu.pipeline_mode<synchronous>, transform_indices = @transform_10, window_bounds = array<i64: 1, 64>}, {pipeline_mode = #tpu.pipeline_mode<synchronous>, transform_indices = @transform_11, window_bounds = array<i64: 64, 32>}, {pipeline_mode = #tpu.pipeline_mode<synchronous>, transform_indices = @transform_12, window_bounds = array<i64: 1, 32>}, {pipeline_mode = #tpu.pipeline_mode<synchronous>, transform_indices = @transform_13, window_bounds = array<i64: 1, 32>}, {pipeline_mode = #tpu.pipeline_mode<synchronous>, transform_indices = @transform_14, window_bounds = array<i64: 1, 32>}, {pipeline_mode = #tpu.pipeline_mode<synchronous>, transform_indices = @transform_15, window_bounds = array<i64: 32, 32>}, {pipeline_mode = #tpu.pipeline_mode<synchronous>, transform_indices = @transform_16, window_bounds = array<i64: 1, 32>}, {pipeline_mode = #tpu.pipeline_mode<synchronous>, transform_indices = @transform_17, window_bounds = array<i64: 32, 128>}, {pipeline_mode = #tpu.pipeline_mode<synchronous>, transform_indices = @transform_18, window_bounds = array<i64: 1, 128>}, {transform_indices = @transform_19, window_bounds = array<i64: 1, 2, 128>}]} {
    %c0 = arith.constant 0 : index
    %c0_0 = arith.constant 0 : index
    %c0_1 = arith.constant 0 : index
    %0 = vector.load %arg2[%c0, %c0_0, %c0_1] : memref<2x8x32xbf16, #tpu.memory_space<vmem>>, vector<2x8x32xbf16>
    %1 = arith.extf %0 : vector<2x8x32xbf16> to vector<2x8x32xf32>
    %2 = vector.shape_cast %1 : vector<2x8x32xf32> to vector<16x32xf32>
    %c0_2 = arith.constant 0 : index
    %c0_3 = arith.constant 0 : index
    %3 = vector.load %arg3[%c0_2, %c0_3] : memref<1x32xf32, #tpu.memory_space<vmem>>, vector<1x32xf32>
    %c0_4 = arith.constant 0 : index
    %c0_5 = arith.constant 0 : index
    %4 = vector.load %arg4[%c0_4, %c0_5] : memref<1x32xf32, #tpu.memory_space<vmem>>, vector<1x32xf32>
    %cst = arith.constant dense<0.000000e+00> : vector<16xf32>
    %5 = vector.multi_reduction <add>, %2, %cst [1] : vector<16x32xf32> to vector<16xf32>
    %6 = vector.shape_cast %5 : vector<16xf32> to vector<16x1xf32>
    %cst_6 = arith.constant 3.200000e+01 : f32
    %7 = vector.broadcast %cst_6 : f32 to vector<16x1xf32>
    %8 = arith.divf %6, %7 : vector<16x1xf32>
    %9 = vector.broadcast %8 : vector<16x1xf32> to vector<16x32xf32>
    %10 = arith.subf %2, %9 : vector<16x32xf32>
    %11 = arith.mulf %10, %10 : vector<16x32xf32>
    %cst_7 = arith.constant dense<0.000000e+00> : vector<16xf32>
    %12 = vector.multi_reduction <add>, %11, %cst_7 [1] : vector<16x32xf32> to vector<16xf32>
    %13 = vector.shape_cast %12 : vector<16xf32> to vector<16x1xf32>
    %cst_8 = arith.constant 3.200000e+01 : f32
    %14 = vector.broadcast %cst_8 : f32 to vector<16x1xf32>
    %15 = arith.divf %13, %14 : vector<16x1xf32>
    %cst_9 = arith.constant 9.99999996E-13 : f32
    %16 = vector.broadcast %cst_9 : f32 to vector<16x1xf32>
    %17 = arith.addf %15, %16 : vector<16x1xf32>
    %18 = math.rsqrt %17 : vector<16x1xf32>
    %19 = vector.broadcast %18 : vector<16x1xf32> to vector<16x32xf32>
    %20 = arith.mulf %10, %19 : vector<16x32xf32>
    %21 = vector.broadcast %3 : vector<1x32xf32> to vector<16x32xf32>
    %22 = arith.mulf %20, %21 : vector<16x32xf32>
    %23 = vector.broadcast %4 : vector<1x32xf32> to vector<16x32xf32>
    %24 = arith.addf %22, %23 : vector<16x32xf32>
    %25 = arith.truncf %24 : vector<16x32xf32> to vector<16x32xbf16>
    %c0_10 = arith.constant 0 : index
    %c0_11 = arith.constant 0 : index
    %26 = vector.load %arg5[%c0_10, %c0_11] : memref<32x96xbf16, #tpu.memory_space<vmem>>, vector<32x96xbf16>
    %cst_12 = arith.constant dense<0.000000e+00> : vector<16x96xf32>
    %27 = tpu.matmul %25, %26, %cst_12 {dimension_numbers = #tpu.dot_dimension_numbers<[1], [0], [0], [1], [0, 0, 1, 1], [], []>} : vector<16x32xbf16>, vector<32x96xbf16>, vector<16x96xf32> -> vector<16x96xf32>
    %c0_13 = arith.constant 0 : index
    %c0_14 = arith.constant 0 : index
    %28 = vector.load %arg6[%c0_13, %c0_14] : memref<1x96xf32, #tpu.memory_space<vmem>>, vector<1x96xf32>
    %29 = vector.broadcast %28 : vector<1x96xf32> to vector<16x96xf32>
    %30 = arith.addf %27, %29 : vector<16x96xf32>
    %31 = vector.extract_strided_slice %30 {offsets = [0, 0], sizes = [16, 32], strides = [1, 1]} : vector<16x96xf32> to vector<16x32xf32>
    %cst_15 = arith.constant 2.500000e-01 : f32
    %32 = vector.broadcast %cst_15 : f32 to vector<16x32xf32>
    %33 = arith.mulf %31, %32 : vector<16x32xf32>
    %34 = vector.extract_strided_slice %30 {offsets = [0, 32], sizes = [16, 32], strides = [1, 1]} : vector<16x96xf32> to vector<16x32xf32>
    %35 = vector.extract_strided_slice %30 {offsets = [0, 64], sizes = [16, 32], strides = [1, 1]} : vector<16x96xf32> to vector<16x32xf32>
    %36 = tpu.iota {dimensions = array<i32: 2>} : vector<1x1x8xi32>
    %37 = vector.extract_strided_slice %33 {offsets = [0, 0], sizes = [8, 32], strides = [1, 1]} : vector<16x32xf32> to vector<8x32xf32>
    %38 = vector.shape_cast %37 : vector<8x32xf32> to vector<8x2x16xf32>
    %39 = tpu.transpose %38, [1, 0, 2] : vector<8x2x16xf32> -> vector<2x8x16xf32>
    %40 = arith.truncf %39 : vector<2x8x16xf32> to vector<2x8x16xbf16>
    %41 = vector.extract_strided_slice %34 {offsets = [0, 0], sizes = [8, 32], strides = [1, 1]} : vector<16x32xf32> to vector<8x32xf32>
    %42 = vector.shape_cast %41 : vector<8x32xf32> to vector<8x2x16xf32>
    %43 = tpu.transpose %42, [1, 0, 2] : vector<8x2x16xf32> -> vector<2x8x16xf32>
    %44 = arith.truncf %43 : vector<2x8x16xf32> to vector<2x8x16xbf16>
    %c0_16 = arith.constant 0 : index
    %c0_17 = arith.constant 0 : index
    %c0_18 = arith.constant 0 : index
    %45 = vector.load %arg22[%c0_16, %c0_17, %c0_18] : memref<2x8x16xbf16, #tpu.memory_space<vmem>>, vector<2x8x16xbf16>
    tpu.vector_store %arg22[%c0_16, %c0_17, %c0_18], %44 {strides = array<i32>} : memref<2x8x16xbf16, #tpu.memory_space<vmem>>, vector<2x8x16xbf16>,
    %46 = vector.extract_strided_slice %35 {offsets = [0, 0], sizes = [8, 32], strides = [1, 1]} : vector<16x32xf32> to vector<8x32xf32>
    %47 = vector.shape_cast %46 : vector<8x32xf32> to vector<8x2x16xf32>
    %48 = tpu.transpose %47, [1, 0, 2] : vector<8x2x16xf32> -> vector<2x8x16xf32>
    %49 = arith.truncf %48 : vector<2x8x16xf32> to vector<2x8x16xbf16>
    %c0_19 = arith.constant 0 : index
    %c0_20 = arith.constant 0 : index
    %c0_21 = arith.constant 0 : index
    %50 = vector.load %arg23[%c0_19, %c0_20, %c0_21] : memref<2x8x16xbf16, #tpu.memory_space<vmem>>, vector<2x8x16xbf16>
    tpu.vector_store %arg23[%c0_19, %c0_20, %c0_21], %49 {strides = array<i32>} : memref<2x8x16xbf16, #tpu.memory_space<vmem>>, vector<2x8x16xbf16>,
    %cst_22 = arith.constant 0xFF800000 : f32
    %51 = vector.broadcast %cst_22 : f32 to vector<2x8x1xf32>
    %c0_23 = arith.constant 0 : index
    %c0_24 = arith.constant 0 : index
    %c0_25 = arith.constant 0 : index
    %52 = vector.load %arg24[%c0_23, %c0_24, %c0_25] : memref<2x8x1xf32, #tpu.memory_space<vmem>>, vector<2x8x1xf32>
    tpu.vector_store %arg24[%c0_23, %c0_24, %c0_25], %51 {strides = array<i32>} : memref<2x8x1xf32, #tpu.memory_space<vmem>>, vector<2x8x1xf32>,
    %cst_26 = arith.constant 0.000000e+00 : f32
    %53 = vector.broadcast %cst_26 : f32 to vector<2x8x1xf32>
    %c0_27 = arith.constant 0 : index
    %c0_28 = arith.constant 0 : index
    %c0_29 = arith.constant 0 : index
    %54 = vector.load %arg25[%c0_27, %c0_28, %c0_29] : memref<2x8x1xf32, #tpu.memory_space<vmem>>, vector<2x8x1xf32>
    tpu.vector_store %arg25[%c0_27, %c0_28, %c0_29], %53 {strides = array<i32>} : memref<2x8x1xf32, #tpu.memory_space<vmem>>, vector<2x8x1xf32>,
    %cst_30 = arith.constant 0.000000e+00 : f32
    %55 = vector.broadcast %cst_30 : f32 to vector<2x8x16xf32>
    %c0_31 = arith.constant 0 : index
    %c0_32 = arith.constant 0 : index
    %c0_33 = arith.constant 0 : index
    %56 = vector.load %arg26[%c0_31, %c0_32, %c0_33] : memref<2x8x16xf32, #tpu.memory_space<vmem>>, vector<2x8x16xf32>
    tpu.vector_store %arg26[%c0_31, %c0_32, %c0_33], %55 {strides = array<i32>} : memref<2x8x16xf32, #tpu.memory_space<vmem>>, vector<2x8x16xf32>,
    %c2_i32 = arith.constant 2 : i32
    %57 = arith.muli %arg0, %c2_i32 : i32
    %c0_i32 = arith.constant 0 : i32
    %58 = arith.addi %57, %c0_i32 : i32
    %59 = arith.index_cast %58 : i32 to index
    %60 = memref.load %arg1[%59] : memref<2xi32, #tpu.memory_space<smem>>
    %c7_i32 = arith.constant 7 : i32
    %61 = arith.addi %60, %c7_i32 : i32
    %c8_i32 = arith.constant 8 : i32
    %62 = arith.divsi %61, %c8_i32 : i32
    %c1_i32 = arith.constant 1 : i32
    %c1_i32_34 = arith.constant 1 : i32
    %63 = arith.maxsi %c1_i32, %62 : i32
    %64 = arith.minsi %c1_i32_34, %63 : i32
    %c0_i32_35 = arith.constant 0 : i32
    %65 = arith.subi %64, %c0_i32_35 : i32
    %c1_i32_36 = arith.constant 1 : i32
    %c1_i32_37 = arith.constant 1 : i32
    %66 = arith.subi %c1_i32_36, %c1_i32_37 : i32
    %67 = arith.addi %65, %66 : i32
    %c1_i32_38 = arith.constant 1 : i32
    %68 = arith.divsi %67, %c1_i32_38 : i32
    %c1_i32_39 = arith.constant 1 : i32
    %c0_i32_40 = arith.constant 0 : i32
    %c0_i32_41 = arith.constant 0 : i32
    %69 = arith.subi %68, %c0_i32_41 : i32
    %70 = arith.addi %c0_i32_41, %69 : i32
    %c1_i32_42 = arith.constant 1 : i32
    scf.for %arg27 = %c0_i32_41 to %70 step %c1_i32_42  : i32 {
      %216 = arith.muli %arg27, %c1_i32_39 : i32
      %217 = arith.addi %c0_i32_40, %216 : i32
      %c8_i32_137 = arith.constant 8 : i32
      %218 = arith.muli %217, %c8_i32_137 : i32
      %219 = tpu.assume_multiple %218, 8 : i32
      %c0_138 = arith.constant 0 : index
      %220 = arith.index_cast %219 : i32 to index
      %c0_139 = arith.constant 0 : index
      %221 = vector.load %arg22[%c0_138, %220, %c0_139] : memref<2x8x16xbf16, #tpu.memory_space<vmem>>, vector<2x8x16xbf16>
      %c0_140 = arith.constant 0 : index
      %222 = arith.index_cast %219 : i32 to index
      %c0_141 = arith.constant 0 : index
      %223 = vector.load %arg23[%c0_140, %222, %c0_141] : memref<2x8x16xbf16, #tpu.memory_space<vmem>>, vector<2x8x16xbf16>
      %224 = vector.broadcast %219 : i32 to vector<1x1x8xi32>
      %225 = arith.addi %36, %224 : vector<1x1x8xi32>
      %226 = vector.broadcast %60 : i32 to vector<1x1x8xi32>
      %227 = arith.cmpi slt, %225, %226 : vector<1x1x8xi32>
      %cst_142 = arith.constant 0.000000e+00 : f32
      %cst_143 = arith.constant -1.000000e+09 : f32
      %228 = vector.broadcast %cst_142 : f32 to vector<1x1x8xf32>
      %229 = vector.broadcast %cst_143 : f32 to vector<1x1x8xf32>
      %230 = arith.select %227, %228, %229 : vector<1x1x8xi1>, vector<1x1x8xf32>
      "tpu.trace_start"() <{level = 10 : i32, message = "nqd,nkd->nqk"}> : () -> ()
      %cst_144 = arith.constant dense<0.000000e+00> : vector<2x8x8xf32>
      %231 = tpu.matmul %40, %221, %cst_144 {dimension_numbers = #tpu.dot_dimension_numbers<[2], [2], [1], [1], [0, 0, 0, 1, 1, 1], [0], [0]>} : vector<2x8x16xbf16>, vector<2x8x16xbf16>, vector<2x8x8xf32> -> vector<2x8x8xf32>
      "tpu.trace_stop"() : () -> ()
      %232 = vector.broadcast %230 : vector<1x1x8xf32> to vector<2x8x8xf32>
      %233 = arith.addf %231, %232 : vector<2x8x8xf32>
      %c0_145 = arith.constant 0 : index
      %c0_146 = arith.constant 0 : index
      %c0_147 = arith.constant 0 : index
      %234 = vector.load %arg24[%c0_145, %c0_146, %c0_147] : memref<2x8x1xf32, #tpu.memory_space<vmem>>, vector<2x8x1xf32>
      %cst_148 = arith.constant dense<0xFF800000> : vector<2x8xf32>
      %235 = vector.multi_reduction <maximumf>, %233, %cst_148 [2] : vector<2x8x8xf32> to vector<2x8xf32>
      %236 = vector.shape_cast %235 : vector<2x8xf32> to vector<2x8x1xf32>
      %237 = arith.maximumf %234, %236 : vector<2x8x1xf32>
      %c0_149 = arith.constant 0 : index
      %c0_150 = arith.constant 0 : index
      %c0_151 = arith.constant 0 : index
      %238 = vector.load %arg24[%c0_149, %c0_150, %c0_151] : memref<2x8x1xf32, #tpu.memory_space<vmem>>, vector<2x8x1xf32>
      %239 = arith.subf %238, %237 : vector<2x8x1xf32>
      %240 = math.exp %239 : vector<2x8x1xf32>
      %241 = vector.broadcast %237 : vector<2x8x1xf32> to vector<2x8x8xf32>
      %242 = arith.subf %233, %241 : vector<2x8x8xf32>
      %243 = math.exp %242 : vector<2x8x8xf32>
      %c0_152 = arith.constant 0 : index
      %c0_153 = arith.constant 0 : index
      %c0_154 = arith.constant 0 : index
      %244 = vector.load %arg25[%c0_152, %c0_153, %c0_154] : memref<2x8x1xf32, #tpu.memory_space<vmem>>, vector<2x8x1xf32>
      %245 = arith.mulf %240, %244 : vector<2x8x1xf32>
      %cst_155 = arith.constant dense<0.000000e+00> : vector<2x8xf32>
      %246 = vector.multi_reduction <add>, %243, %cst_155 [2] : vector<2x8x8xf32> to vector<2x8xf32>
      %247 = vector.shape_cast %246 : vector<2x8xf32> to vector<2x8x1xf32>
      %248 = arith.addf %245, %247 : vector<2x8x1xf32>
      %c0_156 = arith.constant 0 : index
      %c0_157 = arith.constant 0 : index
      %c0_158 = arith.constant 0 : index
      %249 = vector.load %arg25[%c0_156, %c0_157, %c0_158] : memref<2x8x1xf32, #tpu.memory_space<vmem>>, vector<2x8x1xf32>
      tpu.vector_store %arg25[%c0_156, %c0_157, %c0_158], %248 {strides = array<i32>} : memref<2x8x1xf32, #tpu.memory_space<vmem>>, vector<2x8x1xf32>,
      %c0_159 = arith.constant 0 : index
      %c0_160 = arith.constant 0 : index
      %c0_161 = arith.constant 0 : index
      %250 = vector.load %arg26[%c0_159, %c0_160, %c0_161] : memref<2x8x16xf32, #tpu.memory_space<vmem>>, vector<2x8x16xf32>
      %251 = vector.broadcast %240 : vector<2x8x1xf32> to vector<2x8x16xf32>
      %252 = arith.mulf %251, %250 : vector<2x8x16xf32>
      %253 = arith.truncf %243 : vector<2x8x8xf32> to vector<2x8x8xbf16>
      "tpu.trace_start"() <{level = 10 : i32, message = "nqk,nkd->nqd"}> : () -> ()
      %cst_162 = arith.constant dense<0.000000e+00> : vector<2x8x16xf32>
      %254 = tpu.matmul %253, %223, %cst_162 {dimension_numbers = #tpu.dot_dimension_numbers<[2], [1], [1], [2], [0, 0, 0, 1, 1, 2], [0], [0]>} : vector<2x8x8xbf16>, vector<2x8x16xbf16>, vector<2x8x16xf32> -> vector<2x8x16xf32>
      "tpu.trace_stop"() : () -> ()
      %255 = arith.addf %252, %254 : vector<2x8x16xf32>
      %c0_163 = arith.constant 0 : index
      %c0_164 = arith.constant 0 : index
      %c0_165 = arith.constant 0 : index
      %256 = vector.load %arg26[%c0_163, %c0_164, %c0_165] : memref<2x8x16xf32, #tpu.memory_space<vmem>>, vector<2x8x16xf32>
      tpu.vector_store %arg26[%c0_163, %c0_164, %c0_165], %255 {strides = array<i32>} : memref<2x8x16xf32, #tpu.memory_space<vmem>>, vector<2x8x16xf32>,
      %c0_166 = arith.constant 0 : index
      %c0_167 = arith.constant 0 : index
      %c0_168 = arith.constant 0 : index
      %257 = vector.load %arg24[%c0_166, %c0_167, %c0_168] : memref<2x8x1xf32, #tpu.memory_space<vmem>>, vector<2x8x1xf32>
      tpu.vector_store %arg24[%c0_166, %c0_167, %c0_168], %237 {strides = array<i32>} : memref<2x8x1xf32, #tpu.memory_space<vmem>>, vector<2x8x1xf32>,
    }
    %c0_43 = arith.constant 0 : index
    %c0_44 = arith.constant 0 : index
    %c0_45 = arith.constant 0 : index
    %71 = vector.load %arg26[%c0_43, %c0_44, %c0_45] : memref<2x8x16xf32, #tpu.memory_space<vmem>>, vector<2x8x16xf32>
    %c0_46 = arith.constant 0 : index
    %c0_47 = arith.constant 0 : index
    %c0_48 = arith.constant 0 : index
    %72 = vector.load %arg25[%c0_46, %c0_47, %c0_48] : memref<2x8x1xf32, #tpu.memory_space<vmem>>, vector<2x8x1xf32>
    %73 = tpu.reciprocal %72 {approx = true} : vector<2x8x1xf32> -> vector<2x8x1xf32>
    %74 = vector.broadcast %73 : vector<2x8x1xf32> to vector<2x8x16xf32>
    %75 = arith.mulf %71, %74 : vector<2x8x16xf32>
    %76 = tpu.transpose %75, [1, 0, 2] : vector<2x8x16xf32> -> vector<8x2x16xf32>
    %77 = vector.shape_cast %76 : vector<8x2x16xf32> to vector<8x32xf32>
    %78 = vector.extract_strided_slice %33 {offsets = [8, 0], sizes = [8, 32], strides = [1, 1]} : vector<16x32xf32> to vector<8x32xf32>
    %79 = vector.shape_cast %78 : vector<8x32xf32> to vector<8x2x16xf32>
    %80 = tpu.transpose %79, [1, 0, 2] : vector<8x2x16xf32> -> vector<2x8x16xf32>
    %81 = arith.truncf %80 : vector<2x8x16xf32> to vector<2x8x16xbf16>
    %82 = vector.extract_strided_slice %34 {offsets = [8, 0], sizes = [8, 32], strides = [1, 1]} : vector<16x32xf32> to vector<8x32xf32>
    %83 = vector.shape_cast %82 : vector<8x32xf32> to vector<8x2x16xf32>
    %84 = tpu.transpose %83, [1, 0, 2] : vector<8x2x16xf32> -> vector<2x8x16xf32>
    %85 = arith.truncf %84 : vector<2x8x16xf32> to vector<2x8x16xbf16>
    %c0_49 = arith.constant 0 : index
    %c0_50 = arith.constant 0 : index
    %c0_51 = arith.constant 0 : index
    %86 = vector.load %arg22[%c0_49, %c0_50, %c0_51] : memref<2x8x16xbf16, #tpu.memory_space<vmem>>, vector<2x8x16xbf16>
    tpu.vector_store %arg22[%c0_49, %c0_50, %c0_51], %85 {strides = array<i32>} : memref<2x8x16xbf16, #tpu.memory_space<vmem>>, vector<2x8x16xbf16>,
    %87 = vector.extract_strided_slice %35 {offsets = [8, 0], sizes = [8, 32], strides = [1, 1]} : vector<16x32xf32> to vector<8x32xf32>
    %88 = vector.shape_cast %87 : vector<8x32xf32> to vector<8x2x16xf32>
    %89 = tpu.transpose %88, [1, 0, 2] : vector<8x2x16xf32> -> vector<2x8x16xf32>
    %90 = arith.truncf %89 : vector<2x8x16xf32> to vector<2x8x16xbf16>
    %c0_52 = arith.constant 0 : index
    %c0_53 = arith.constant 0 : index
    %c0_54 = arith.constant 0 : index
    %91 = vector.load %arg23[%c0_52, %c0_53, %c0_54] : memref<2x8x16xbf16, #tpu.memory_space<vmem>>, vector<2x8x16xbf16>
    tpu.vector_store %arg23[%c0_52, %c0_53, %c0_54], %90 {strides = array<i32>} : memref<2x8x16xbf16, #tpu.memory_space<vmem>>, vector<2x8x16xbf16>,
    %cst_55 = arith.constant 0xFF800000 : f32
    %92 = vector.broadcast %cst_55 : f32 to vector<2x8x1xf32>
    %c0_56 = arith.constant 0 : index
    %c0_57 = arith.constant 0 : index
    %c0_58 = arith.constant 0 : index
    %93 = vector.load %arg24[%c0_56, %c0_57, %c0_58] : memref<2x8x1xf32, #tpu.memory_space<vmem>>, vector<2x8x1xf32>
    tpu.vector_store %arg24[%c0_56, %c0_57, %c0_58], %92 {strides = array<i32>} : memref<2x8x1xf32, #tpu.memory_space<vmem>>, vector<2x8x1xf32>,
    %cst_59 = arith.constant 0.000000e+00 : f32
    %94 = vector.broadcast %cst_59 : f32 to vector<2x8x1xf32>
    %c0_60 = arith.constant 0 : index
    %c0_61 = arith.constant 0 : index
    %c0_62 = arith.constant 0 : index
    %95 = vector.load %arg25[%c0_60, %c0_61, %c0_62] : memref<2x8x1xf32, #tpu.memory_space<vmem>>, vector<2x8x1xf32>
    tpu.vector_store %arg25[%c0_60, %c0_61, %c0_62], %94 {strides = array<i32>} : memref<2x8x1xf32, #tpu.memory_space<vmem>>, vector<2x8x1xf32>,
    %cst_63 = arith.constant 0.000000e+00 : f32
    %96 = vector.broadcast %cst_63 : f32 to vector<2x8x16xf32>
    %c0_64 = arith.constant 0 : index
    %c0_65 = arith.constant 0 : index
    %c0_66 = arith.constant 0 : index
    %97 = vector.load %arg26[%c0_64, %c0_65, %c0_66] : memref<2x8x16xf32, #tpu.memory_space<vmem>>, vector<2x8x16xf32>
    tpu.vector_store %arg26[%c0_64, %c0_65, %c0_66], %96 {strides = array<i32>} : memref<2x8x16xf32, #tpu.memory_space<vmem>>, vector<2x8x16xf32>,
    %c2_i32_67 = arith.constant 2 : i32
    %98 = arith.muli %arg0, %c2_i32_67 : i32
    %c1_i32_68 = arith.constant 1 : i32
    %99 = arith.addi %98, %c1_i32_68 : i32
    %100 = arith.index_cast %99 : i32 to index
    %101 = memref.load %arg1[%100] : memref<2xi32, #tpu.memory_space<smem>>
    %c7_i32_69 = arith.constant 7 : i32
    %102 = arith.addi %101, %c7_i32_69 : i32
    %c8_i32_70 = arith.constant 8 : i32
    %103 = arith.divsi %102, %c8_i32_70 : i32
    %c1_i32_71 = arith.constant 1 : i32
    %c1_i32_72 = arith.constant 1 : i32
    %104 = arith.maxsi %c1_i32_71, %103 : i32
    %105 = arith.minsi %c1_i32_72, %104 : i32
    %c0_i32_73 = arith.constant 0 : i32
    %106 = arith.subi %105, %c0_i32_73 : i32
    %c1_i32_74 = arith.constant 1 : i32
    %c1_i32_75 = arith.constant 1 : i32
    %107 = arith.subi %c1_i32_74, %c1_i32_75 : i32
    %108 = arith.addi %106, %107 : i32
    %c1_i32_76 = arith.constant 1 : i32
    %109 = arith.divsi %108, %c1_i32_76 : i32
    %c1_i32_77 = arith.constant 1 : i32
    %c0_i32_78 = arith.constant 0 : i32
    %c0_i32_79 = arith.constant 0 : i32
    %110 = arith.subi %109, %c0_i32_79 : i32
    %111 = arith.addi %c0_i32_79, %110 : i32
    %c1_i32_80 = arith.constant 1 : i32
    scf.for %arg27 = %c0_i32_79 to %111 step %c1_i32_80  : i32 {
      %216 = arith.muli %arg27, %c1_i32_77 : i32
      %217 = arith.addi %c0_i32_78, %216 : i32
      %c8_i32_137 = arith.constant 8 : i32
      %218 = arith.muli %217, %c8_i32_137 : i32
      %219 = tpu.assume_multiple %218, 8 : i32
      %c0_138 = arith.constant 0 : index
      %220 = arith.index_cast %219 : i32 to index
      %c0_139 = arith.constant 0 : index
      %221 = vector.load %arg22[%c0_138, %220, %c0_139] : memref<2x8x16xbf16, #tpu.memory_space<vmem>>, vector<2x8x16xbf16>
      %c0_140 = arith.constant 0 : index
      %222 = arith.index_cast %219 : i32 to index
      %c0_141 = arith.constant 0 : index
      %223 = vector.load %arg23[%c0_140, %222, %c0_141] : memref<2x8x16xbf16, #tpu.memory_space<vmem>>, vector<2x8x16xbf16>
      %224 = vector.broadcast %219 : i32 to vector<1x1x8xi32>
      %225 = arith.addi %36, %224 : vector<1x1x8xi32>
      %226 = vector.broadcast %101 : i32 to vector<1x1x8xi32>
      %227 = arith.cmpi slt, %225, %226 : vector<1x1x8xi32>
      %cst_142 = arith.constant 0.000000e+00 : f32
      %cst_143 = arith.constant -1.000000e+09 : f32
      %228 = vector.broadcast %cst_142 : f32 to vector<1x1x8xf32>
      %229 = vector.broadcast %cst_143 : f32 to vector<1x1x8xf32>
      %230 = arith.select %227, %228, %229 : vector<1x1x8xi1>, vector<1x1x8xf32>
      "tpu.trace_start"() <{level = 10 : i32, message = "nqd,nkd->nqk"}> : () -> ()
      %cst_144 = arith.constant dense<0.000000e+00> : vector<2x8x8xf32>
      %231 = tpu.matmul %81, %221, %cst_144 {dimension_numbers = #tpu.dot_dimension_numbers<[2], [2], [1], [1], [0, 0, 0, 1, 1, 1], [0], [0]>} : vector<2x8x16xbf16>, vector<2x8x16xbf16>, vector<2x8x8xf32> -> vector<2x8x8xf32>
      "tpu.trace_stop"() : () -> ()
      %232 = vector.broadcast %230 : vector<1x1x8xf32> to vector<2x8x8xf32>
      %233 = arith.addf %231, %232 : vector<2x8x8xf32>
      %c0_145 = arith.constant 0 : index
      %c0_146 = arith.constant 0 : index
      %c0_147 = arith.constant 0 : index
      %234 = vector.load %arg24[%c0_145, %c0_146, %c0_147] : memref<2x8x1xf32, #tpu.memory_space<vmem>>, vector<2x8x1xf32>
      %cst_148 = arith.constant dense<0xFF800000> : vector<2x8xf32>
      %235 = vector.multi_reduction <maximumf>, %233, %cst_148 [2] : vector<2x8x8xf32> to vector<2x8xf32>
      %236 = vector.shape_cast %235 : vector<2x8xf32> to vector<2x8x1xf32>
      %237 = arith.maximumf %234, %236 : vector<2x8x1xf32>
      %c0_149 = arith.constant 0 : index
      %c0_150 = arith.constant 0 : index
      %c0_151 = arith.constant 0 : index
      %238 = vector.load %arg24[%c0_149, %c0_150, %c0_151] : memref<2x8x1xf32, #tpu.memory_space<vmem>>, vector<2x8x1xf32>
      %239 = arith.subf %238, %237 : vector<2x8x1xf32>
      %240 = math.exp %239 : vector<2x8x1xf32>
      %241 = vector.broadcast %237 : vector<2x8x1xf32> to vector<2x8x8xf32>
      %242 = arith.subf %233, %241 : vector<2x8x8xf32>
      %243 = math.exp %242 : vector<2x8x8xf32>
      %c0_152 = arith.constant 0 : index
      %c0_153 = arith.constant 0 : index
      %c0_154 = arith.constant 0 : index
      %244 = vector.load %arg25[%c0_152, %c0_153, %c0_154] : memref<2x8x1xf32, #tpu.memory_space<vmem>>, vector<2x8x1xf32>
      %245 = arith.mulf %240, %244 : vector<2x8x1xf32>
      %cst_155 = arith.constant dense<0.000000e+00> : vector<2x8xf32>
      %246 = vector.multi_reduction <add>, %243, %cst_155 [2] : vector<2x8x8xf32> to vector<2x8xf32>
      %247 = vector.shape_cast %246 : vector<2x8xf32> to vector<2x8x1xf32>
      %248 = arith.addf %245, %247 : vector<2x8x1xf32>
      %c0_156 = arith.constant 0 : index
      %c0_157 = arith.constant 0 : index
      %c0_158 = arith.constant 0 : index
      %249 = vector.load %arg25[%c0_156, %c0_157, %c0_158] : memref<2x8x1xf32, #tpu.memory_space<vmem>>, vector<2x8x1xf32>
      tpu.vector_store %arg25[%c0_156, %c0_157, %c0_158], %248 {strides = array<i32>} : memref<2x8x1xf32, #tpu.memory_space<vmem>>, vector<2x8x1xf32>,
      %c0_159 = arith.constant 0 : index
      %c0_160 = arith.constant 0 : index
      %c0_161 = arith.constant 0 : index
      %250 = vector.load %arg26[%c0_159, %c0_160, %c0_161] : memref<2x8x16xf32, #tpu.memory_space<vmem>>, vector<2x8x16xf32>
      %251 = vector.broadcast %240 : vector<2x8x1xf32> to vector<2x8x16xf32>
      %252 = arith.mulf %251, %250 : vector<2x8x16xf32>
      %253 = arith.truncf %243 : vector<2x8x8xf32> to vector<2x8x8xbf16>
      "tpu.trace_start"() <{level = 10 : i32, message = "nqk,nkd->nqd"}> : () -> ()
      %cst_162 = arith.constant dense<0.000000e+00> : vector<2x8x16xf32>
      %254 = tpu.matmul %253, %223, %cst_162 {dimension_numbers = #tpu.dot_dimension_numbers<[2], [1], [1], [2], [0, 0, 0, 1, 1, 2], [0], [0]>} : vector<2x8x8xbf16>, vector<2x8x16xbf16>, vector<2x8x16xf32> -> vector<2x8x16xf32>
      "tpu.trace_stop"() : () -> ()
      %255 = arith.addf %252, %254 : vector<2x8x16xf32>
      %c0_163 = arith.constant 0 : index
      %c0_164 = arith.constant 0 : index
      %c0_165 = arith.constant 0 : index
      %256 = vector.load %arg26[%c0_163, %c0_164, %c0_165] : memref<2x8x16xf32, #tpu.memory_space<vmem>>, vector<2x8x16xf32>
      tpu.vector_store %arg26[%c0_163, %c0_164, %c0_165], %255 {strides = array<i32>} : memref<2x8x16xf32, #tpu.memory_space<vmem>>, vector<2x8x16xf32>,
      %c0_166 = arith.constant 0 : index
      %c0_167 = arith.constant 0 : index
      %c0_168 = arith.constant 0 : index
      %257 = vector.load %arg24[%c0_166, %c0_167, %c0_168] : memref<2x8x1xf32, #tpu.memory_space<vmem>>, vector<2x8x1xf32>
      tpu.vector_store %arg24[%c0_166, %c0_167, %c0_168], %237 {strides = array<i32>} : memref<2x8x1xf32, #tpu.memory_space<vmem>>, vector<2x8x1xf32>,
    }
    %c0_81 = arith.constant 0 : index
    %c0_82 = arith.constant 0 : index
    %c0_83 = arith.constant 0 : index
    %112 = vector.load %arg26[%c0_81, %c0_82, %c0_83] : memref<2x8x16xf32, #tpu.memory_space<vmem>>, vector<2x8x16xf32>
    %c0_84 = arith.constant 0 : index
    %c0_85 = arith.constant 0 : index
    %c0_86 = arith.constant 0 : index
    %113 = vector.load %arg25[%c0_84, %c0_85, %c0_86] : memref<2x8x1xf32, #tpu.memory_space<vmem>>, vector<2x8x1xf32>
    %114 = tpu.reciprocal %113 {approx = true} : vector<2x8x1xf32> -> vector<2x8x1xf32>
    %115 = vector.broadcast %114 : vector<2x8x1xf32> to vector<2x8x16xf32>
    %116 = arith.mulf %112, %115 : vector<2x8x16xf32>
    %117 = tpu.transpose %116, [1, 0, 2] : vector<2x8x16xf32> -> vector<8x2x16xf32>
    %118 = vector.shape_cast %117 : vector<8x2x16xf32> to vector<8x32xf32>
    %119 = tpu.concatenate %77, %118 in 0 : vector<8x32xf32>, vector<8x32xf32> -> vector<16x32xf32>
    %120 = arith.truncf %119 : vector<16x32xf32> to vector<16x32xbf16>
    %c0_87 = arith.constant 0 : index
    %c0_88 = arith.constant 0 : index
    %121 = vector.load %arg7[%c0_87, %c0_88] : memref<32x32xbf16, #tpu.memory_space<vmem>>, vector<32x32xbf16>
    %cst_89 = arith.constant dense<0.000000e+00> : vector<16x32xf32>
    %122 = tpu.matmul %120, %121, %cst_89 {dimension_numbers = #tpu.dot_dimension_numbers<[1], [0], [0], [1], [0, 0, 1, 1], [], []>} : vector<16x32xbf16>, vector<32x32xbf16>, vector<16x32xf32> -> vector<16x32xf32>
    %c0_90 = arith.constant 0 : index
    %c0_91 = arith.constant 0 : index
    %123 = vector.load %arg8[%c0_90, %c0_91] : memref<1x32xf32, #tpu.memory_space<vmem>>, vector<1x32xf32>
    %124 = vector.broadcast %123 : vector<1x32xf32> to vector<16x32xf32>
    %125 = arith.addf %122, %124 : vector<16x32xf32>
    %126 = arith.addf %24, %125 : vector<16x32xf32>
    %c0_92 = arith.constant 0 : index
    %c0_93 = arith.constant 0 : index
    %127 = vector.load %arg9[%c0_92, %c0_93] : memref<1x32xf32, #tpu.memory_space<vmem>>, vector<1x32xf32>
    %c0_94 = arith.constant 0 : index
    %c0_95 = arith.constant 0 : index
    %128 = vector.load %arg10[%c0_94, %c0_95] : memref<1x32xf32, #tpu.memory_space<vmem>>, vector<1x32xf32>
    %cst_96 = arith.constant dense<0.000000e+00> : vector<16xf32>
    %129 = vector.multi_reduction <add>, %126, %cst_96 [1] : vector<16x32xf32> to vector<16xf32>
    %130 = vector.shape_cast %129 : vector<16xf32> to vector<16x1xf32>
    %cst_97 = arith.constant 3.200000e+01 : f32
    %131 = vector.broadcast %cst_97 : f32 to vector<16x1xf32>
    %132 = arith.divf %130, %131 : vector<16x1xf32>
    %133 = vector.broadcast %132 : vector<16x1xf32> to vector<16x32xf32>
    %134 = arith.subf %126, %133 : vector<16x32xf32>
    %135 = arith.mulf %134, %134 : vector<16x32xf32>
    %cst_98 = arith.constant dense<0.000000e+00> : vector<16xf32>
    %136 = vector.multi_reduction <add>, %135, %cst_98 [1] : vector<16x32xf32> to vector<16xf32>
    %137 = vector.shape_cast %136 : vector<16xf32> to vector<16x1xf32>
    %cst_99 = arith.constant 3.200000e+01 : f32
    %138 = vector.broadcast %cst_99 : f32 to vector<16x1xf32>
    %139 = arith.divf %137, %138 : vector<16x1xf32>
    %cst_100 = arith.constant 9.99999996E-13 : f32
    %140 = vector.broadcast %cst_100 : f32 to vector<16x1xf32>
    %141 = arith.addf %139, %140 : vector<16x1xf32>
    %142 = math.rsqrt %141 : vector<16x1xf32>
    %143 = vector.broadcast %142 : vector<16x1xf32> to vector<16x32xf32>
    %144 = arith.mulf %134, %143 : vector<16x32xf32>
    %145 = vector.broadcast %127 : vector<1x32xf32> to vector<16x32xf32>
    %146 = arith.mulf %144, %145 : vector<16x32xf32>
    %147 = vector.broadcast %128 : vector<1x32xf32> to vector<16x32xf32>
    %148 = arith.addf %146, %147 : vector<16x32xf32>
    %149 = arith.truncf %148 : vector<16x32xf32> to vector<16x32xbf16>
    %c0_101 = arith.constant 0 : index
    %c0_102 = arith.constant 0 : index
    %150 = vector.load %arg11[%c0_101, %c0_102] : memref<32x64xbf16, #tpu.memory_space<vmem>>, vector<32x64xbf16>
    %cst_103 = arith.constant dense<0.000000e+00> : vector<16x64xf32>
    %151 = tpu.matmul %149, %150, %cst_103 {dimension_numbers = #tpu.dot_dimension_numbers<[1], [0], [0], [1], [0, 0, 1, 1], [], []>} : vector<16x32xbf16>, vector<32x64xbf16>, vector<16x64xf32> -> vector<16x64xf32>
    %c0_104 = arith.constant 0 : index
    %c0_105 = arith.constant 0 : index
    %152 = vector.load %arg12[%c0_104, %c0_105] : memref<1x64xf32, #tpu.memory_space<vmem>>, vector<1x64xf32>
    %153 = vector.broadcast %152 : vector<1x64xf32> to vector<16x64xf32>
    %154 = arith.addf %151, %153 : vector<16x64xf32>
    %cst_106 = arith.constant 5.000000e-01 : f32
    %155 = vector.broadcast %cst_106 : f32 to vector<16x64xf32>
    %156 = arith.mulf %155, %154 : vector<16x64xf32>
    %157 = arith.mulf %154, %154 : vector<16x64xf32>
    %158 = arith.mulf %157, %154 : vector<16x64xf32>
    %cst_107 = arith.constant 4.471500e-02 : f32
    %159 = vector.broadcast %cst_107 : f32 to vector<16x64xf32>
    %160 = arith.mulf %159, %158 : vector<16x64xf32>
    %161 = arith.addf %154, %160 : vector<16x64xf32>
    %cst_108 = arith.constant 0.797884583 : f32
    %162 = vector.broadcast %cst_108 : f32 to vector<16x64xf32>
    %163 = arith.mulf %162, %161 : vector<16x64xf32>
    %164 = math.tanh %163 : vector<16x64xf32>
    %cst_109 = arith.constant 1.000000e+00 : f32
    %165 = vector.broadcast %cst_109 : f32 to vector<16x64xf32>
    %166 = arith.addf %165, %164 : vector<16x64xf32>
    %167 = arith.mulf %156, %166 : vector<16x64xf32>
    %168 = arith.truncf %167 : vector<16x64xf32> to vector<16x64xbf16>
    %c0_110 = arith.constant 0 : index
    %c0_111 = arith.constant 0 : index
    %169 = vector.load %arg13[%c0_110, %c0_111] : memref<64x32xbf16, #tpu.memory_space<vmem>>, vector<64x32xbf16>
    %cst_112 = arith.constant dense<0.000000e+00> : vector<16x32xf32>
    %170 = tpu.matmul %168, %169, %cst_112 {dimension_numbers = #tpu.dot_dimension_numbers<[1], [0], [0], [1], [0, 0, 1, 1], [], []>} : vector<16x64xbf16>, vector<64x32xbf16>, vector<16x32xf32> -> vector<16x32xf32>
    %c0_113 = arith.constant 0 : index
    %c0_114 = arith.constant 0 : index
    %171 = vector.load %arg14[%c0_113, %c0_114] : memref<1x32xf32, #tpu.memory_space<vmem>>, vector<1x32xf32>
    %172 = vector.broadcast %171 : vector<1x32xf32> to vector<16x32xf32>
    %173 = arith.addf %170, %172 : vector<16x32xf32>
    %174 = arith.addf %148, %173 : vector<16x32xf32>
    %c0_115 = arith.constant 0 : index
    %c0_116 = arith.constant 0 : index
    %175 = vector.load %arg15[%c0_115, %c0_116] : memref<1x32xf32, #tpu.memory_space<vmem>>, vector<1x32xf32>
    %c0_117 = arith.constant 0 : index
    %c0_118 = arith.constant 0 : index
    %176 = vector.load %arg16[%c0_117, %c0_118] : memref<1x32xf32, #tpu.memory_space<vmem>>, vector<1x32xf32>
    %cst_119 = arith.constant dense<0.000000e+00> : vector<16xf32>
    %177 = vector.multi_reduction <add>, %174, %cst_119 [1] : vector<16x32xf32> to vector<16xf32>
    %178 = vector.shape_cast %177 : vector<16xf32> to vector<16x1xf32>
    %cst_120 = arith.constant 3.200000e+01 : f32
    %179 = vector.broadcast %cst_120 : f32 to vector<16x1xf32>
    %180 = arith.divf %178, %179 : vector<16x1xf32>
    %181 = vector.broadcast %180 : vector<16x1xf32> to vector<16x32xf32>
    %182 = arith.subf %174, %181 : vector<16x32xf32>
    %183 = arith.mulf %182, %182 : vector<16x32xf32>
    %cst_121 = arith.constant dense<0.000000e+00> : vector<16xf32>
    %184 = vector.multi_reduction <add>, %183, %cst_121 [1] : vector<16x32xf32> to vector<16xf32>
    %185 = vector.shape_cast %184 : vector<16xf32> to vector<16x1xf32>
    %cst_122 = arith.constant 3.200000e+01 : f32
    %186 = vector.broadcast %cst_122 : f32 to vector<16x1xf32>
    %187 = arith.divf %185, %186 : vector<16x1xf32>
    %cst_123 = arith.constant 9.99999996E-13 : f32
    %188 = vector.broadcast %cst_123 : f32 to vector<16x1xf32>
    %189 = arith.addf %187, %188 : vector<16x1xf32>
    %190 = math.rsqrt %189 : vector<16x1xf32>
    %191 = vector.broadcast %190 : vector<16x1xf32> to vector<16x32xf32>
    %192 = arith.mulf %182, %191 : vector<16x32xf32>
    %193 = vector.broadcast %175 : vector<1x32xf32> to vector<16x32xf32>
    %194 = arith.mulf %192, %193 : vector<16x32xf32>
    %195 = vector.broadcast %176 : vector<1x32xf32> to vector<16x32xf32>
    %196 = arith.addf %194, %195 : vector<16x32xf32>
    %197 = vector.extract_strided_slice %196 {offsets = [0, 0], sizes = [1, 32], strides = [1, 1]} : vector<16x32xf32> to vector<1x32xf32>
    %198 = vector.extract_strided_slice %196 {offsets = [8, 0], sizes = [1, 32], strides = [1, 1]} : vector<16x32xf32> to vector<1x32xf32>
    %199 = tpu.concatenate %197, %198 in 0 : vector<1x32xf32>, vector<1x32xf32> -> vector<2x32xf32>
    %200 = arith.truncf %199 : vector<2x32xf32> to vector<2x32xbf16>
    %c0_124 = arith.constant 0 : index
    %c0_125 = arith.constant 0 : index
    %201 = vector.load %arg17[%c0_124, %c0_125] : memref<32x32xbf16, #tpu.memory_space<vmem>>, vector<32x32xbf16>
    %cst_126 = arith.constant dense<0.000000e+00> : vector<2x32xf32>
    %202 = tpu.matmul %200, %201, %cst_126 {dimension_numbers = #tpu.dot_dimension_numbers<[1], [0], [0], [1], [0, 0, 1, 1], [], []>} : vector<2x32xbf16>, vector<32x32xbf16>, vector<2x32xf32> -> vector<2x32xf32>
    %c0_127 = arith.constant 0 : index
    %c0_128 = arith.constant 0 : index
    %203 = vector.load %arg18[%c0_127, %c0_128] : memref<1x32xf32, #tpu.memory_space<vmem>>, vector<1x32xf32>
    %204 = vector.broadcast %203 : vector<1x32xf32> to vector<2x32xf32>
    %205 = arith.addf %202, %204 : vector<2x32xf32>
    %206 = math.tanh %205 : vector<2x32xf32>
    %207 = arith.truncf %206 : vector<2x32xf32> to vector<2x32xbf16>
    %c0_129 = arith.constant 0 : index
    %c0_130 = arith.constant 0 : index
    %208 = vector.load %arg19[%c0_129, %c0_130] : memref<32x128xbf16, #tpu.memory_space<vmem>>, vector<32x128xbf16>
    %cst_131 = arith.constant dense<0.000000e+00> : vector<2x128xf32>
    %209 = tpu.matmul %207, %208, %cst_131 {dimension_numbers = #tpu.dot_dimension_numbers<[1], [0], [0], [1], [0, 0, 1, 1], [], []>} : vector<2x32xbf16>, vector<32x128xbf16>, vector<2x128xf32> -> vector<2x128xf32>
    %c0_132 = arith.constant 0 : index
    %c0_133 = arith.constant 0 : index
    %210 = vector.load %arg20[%c0_132, %c0_133] : memref<1x128xf32, #tpu.memory_space<vmem>>, vector<1x128xf32>
    %211 = vector.broadcast %210 : vector<1x128xf32> to vector<2x128xf32>
    %212 = arith.addf %209, %211 : vector<2x128xf32>
    %c0_134 = arith.constant 0 : index
    %c0_135 = arith.constant 0 : index
    %c0_136 = arith.constant 0 : index
    %213 = vector.load %arg21[%c0_134, %c0_135, %c0_136] : memref<1x2x128xf32, #tpu.memory_space<vmem>>, vector<1x2x128xf32>
    %214 = vector.shape_cast %213 : vector<1x2x128xf32> to vector<2x128xf32>
    %215 = vector.shape_cast %212 : vector<2x128xf32> to vector<1x2x128xf32>
    tpu.vector_store %arg21[%c0_134, %c0_135, %c0_136], %215 {strides = array<i32>} : memref<1x2x128xf32, #tpu.memory_space<vmem>>, vector<1x2x128xf32>,
    return
  }
  func.func @transform_0(%arg0: i32, %arg1: memref<2xi32, #tpu.memory_space<smem>>) -> (i32, i32, i32) {
    %c0_i32 = arith.constant 0 : i32
    %c0_i32_0 = arith.constant 0 : i32
    %c0_i32_1 = arith.constant 0 : i32
    return %arg0, %c0_i32, %c0_i32_0 : i32, i32, i32
  }
  func.func @transform_1(%arg0: i32, %arg1: memref<2xi32, #tpu.memory_space<smem>>) -> (i32, i32) {
    %c0_i32 = arith.constant 0 : i32
    %c0_i32_0 = arith.constant 0 : i32
    %c0_i32_1 = arith.constant 0 : i32
    return %c0_i32, %c0_i32_0 : i32, i32
  }
  func.func @transform_2(%arg0: i32, %arg1: memref<2xi32, #tpu.memory_space<smem>>) -> (i32, i32) {
    %c0_i32 = arith.constant 0 : i32
    %c0_i32_0 = arith.constant 0 : i32
    %c0_i32_1 = arith.constant 0 : i32
    return %c0_i32, %c0_i32_0 : i32, i32
  }
  func.func @transform_3(%arg0: i32, %arg1: memref<2xi32, #tpu.memory_space<smem>>) -> (i32, i32) {
    %c0_i32 = arith.constant 0 : i32
    %c0_i32_0 = arith.constant 0 : i32
    %c0_i32_1 = arith.constant 0 : i32
    return %c0_i32, %c0_i32_0 : i32, i32
  }
  func.func @transform_4(%arg0: i32, %arg1: memref<2xi32, #tpu.memory_space<smem>>) -> (i32, i32) {
    %c0_i32 = arith.constant 0 : i32
    %c0_i32_0 = arith.constant 0 : i32
    %c0_i32_1 = arith.constant 0 : i32
    return %c0_i32, %c0_i32_0 : i32, i32
  }
  func.func @transform_5(%arg0: i32, %arg1: memref<2xi32, #tpu.memory_space<smem>>) -> (i32, i32) {
    %c0_i32 = arith.constant 0 : i32
    %c0_i32_0 = arith.constant 0 : i32
    %c0_i32_1 = arith.constant 0 : i32
    return %c0_i32, %c0_i32_0 : i32, i32
  }
  func.func @transform_6(%arg0: i32, %arg1: memref<2xi32, #tpu.memory_space<smem>>) -> (i32, i32) {
    %c0_i32 = arith.constant 0 : i32
    %c0_i32_0 = arith.constant 0 : i32
    %c0_i32_1 = arith.constant 0 : i32
    return %c0_i32, %c0_i32_0 : i32, i32
  }
  func.func @transform_7(%arg0: i32, %arg1: memref<2xi32, #tpu.memory_space<smem>>) -> (i32, i32) {
    %c0_i32 = arith.constant 0 : i32
    %c0_i32_0 = arith.constant 0 : i32
    %c0_i32_1 = arith.constant 0 : i32
    return %c0_i32, %c0_i32_0 : i32, i32
  }
  func.func @transform_8(%arg0: i32, %arg1: memref<2xi32, #tpu.memory_space<smem>>) -> (i32, i32) {
    %c0_i32 = arith.constant 0 : i32
    %c0_i32_0 = arith.constant 0 : i32
    %c0_i32_1 = arith.constant 0 : i32
    return %c0_i32, %c0_i32_0 : i32, i32
  }
  func.func @transform_9(%arg0: i32, %arg1: memref<2xi32, #tpu.memory_space<smem>>) -> (i32, i32) {
    %c0_i32 = arith.constant 0 : i32
    %c0_i32_0 = arith.constant 0 : i32
    %c0_i32_1 = arith.constant 0 : i32
    return %c0_i32, %c0_i32_0 : i32, i32
  }
  func.func @transform_10(%arg0: i32, %arg1: memref<2xi32, #tpu.memory_space<smem>>) -> (i32, i32) {
    %c0_i32 = arith.constant 0 : i32
    %c0_i32_0 = arith.constant 0 : i32
    %c0_i32_1 = arith.constant 0 : i32
    return %c0_i32, %c0_i32_0 : i32, i32
  }
  func.func @transform_11(%arg0: i32, %arg1: memref<2xi32, #tpu.memory_space<smem>>) -> (i32, i32) {
    %c0_i32 = arith.constant 0 : i32
    %c0_i32_0 = arith.constant 0 : i32
    %c0_i32_1 = arith.constant 0 : i32
    return %c0_i32, %c0_i32_0 : i32, i32
  }
  func.func @transform_12(%arg0: i32, %arg1: memref<2xi32, #tpu.memory_space<smem>>) -> (i32, i32) {
    %c0_i32 = arith.constant 0 : i32
    %c0_i32_0 = arith.constant 0 : i32
    %c0_i32_1 = arith.constant 0 : i32
    return %c0_i32, %c0_i32_0 : i32, i32
  }
  func.func @transform_13(%arg0: i32, %arg1: memref<2xi32, #tpu.memory_space<smem>>) -> (i32, i32) {
    %c0_i32 = arith.constant 0 : i32
    %c0_i32_0 = arith.constant 0 : i32
    %c0_i32_1 = arith.constant 0 : i32
    return %c0_i32, %c0_i32_0 : i32, i32
  }
  func.func @transform_14(%arg0: i32, %arg1: memref<2xi32, #tpu.memory_space<smem>>) -> (i32, i32) {
    %c0_i32 = arith.constant 0 : i32
    %c0_i32_0 = arith.constant 0 : i32
    %c0_i32_1 = arith.constant 0 : i32
    return %c0_i32, %c0_i32_0 : i32, i32
  }
  func.func @transform_15(%arg0: i32, %arg1: memref<2xi32, #tpu.memory_space<smem>>) -> (i32, i32) {
    %c0_i32 = arith.constant 0 : i32
    %c0_i32_0 = arith.constant 0 : i32
    %c0_i32_1 = arith.constant 0 : i32
    return %c0_i32, %c0_i32_0 : i32, i32
  }
  func.func @transform_16(%arg0: i32, %arg1: memref<2xi32, #tpu.memory_space<smem>>) -> (i32, i32) {
    %c0_i32 = arith.constant 0 : i32
    %c0_i32_0 = arith.constant 0 : i32
    %c0_i32_1 = arith.constant 0 : i32
    return %c0_i32, %c0_i32_0 : i32, i32
  }
  func.func @transform_17(%arg0: i32, %arg1: memref<2xi32, #tpu.memory_space<smem>>) -> (i32, i32) {
    %c0_i32 = arith.constant 0 : i32
    %c0_i32_0 = arith.constant 0 : i32
    %c0_i32_1 = arith.constant 0 : i32
    return %c0_i32, %c0_i32_0 : i32, i32
  }
  func.func @transform_18(%arg0: i32, %arg1: memref<2xi32, #tpu.memory_space<smem>>) -> (i32, i32) {
    %c0_i32 = arith.constant 0 : i32
    %c0_i32_0 = arith.constant 0 : i32
    %c0_i32_1 = arith.constant 0 : i32
    return %c0_i32, %c0_i32_0 : i32, i32
  }
  func.func @transform_19(%arg0: i32, %arg1: memref<2xi32, #tpu.memory_space<smem>>) -> (i32, i32, i32) {
    %c0_i32 = arith.constant 0 : i32
    %c0_i32_0 = arith.constant 0 : i32
    %c0_i32_1 = arith.constant 0 : i32
    return %arg0, %c0_i32, %c0_i32_0 : i32, i32, i32
  }
}

</mosaic_0001>

<bundles_post_ra>
// kernel: tpu_custom_call.1
= control target key start
LH: loop header
LB: loop body
LE: loop exit
PB: predicated region body
PF: predicated region fallthrough
CT: control target
= control target key end

     0   :  { %s2574_s24 = smov [#allocation8]   ;;  %s3265_s0 = inlined_call_operand.hbm [shape: s32[2], index: 0, kind: input, shape index: {}]   ;;  %s3266_s1 = inlined_call_operand.hbm [shape: bf16[2,8,32], index: 1, kind: input, shape index: {}]   ;;  %s3267_s2 = inlined_call_operand.hbm [shape: f32[1,32], index: 2, kind: input, shape index: {}]   ;;  %s3268_s3 = inlined_call_operand.hbm [shape: f32[1,32], index: 3, kind: input, shape index: {}]   ;;  %s3269_s4 = inlined_call_operand.vmem [shape: bf16[32,96], index: 4, kind: input, shape index: {}]   ;;  %s3270_s5 = inlined_call_operand.hbm [shape: f32[1,96], index: 5, kind: input, shape index: {}]   ;;  %s3271_s6 = inlined_call_operand.vmem [shape: bf16[32,32], index: 6, kind: input, shape index: {}]   ;;  %s3272_s7 = inlined_call_operand.hbm [shape: f32[1,32], index: 7, kind: input, shape index: {}]   ;;  %s3273_s8 = inlined_call_operand.hbm [shape: f32[1,32], index: 8, kind: input, shape index: {}]   ;;  %s3274_s9 = inlined_call_operand.hbm [shape: f32[1,32], index: 9, kind: input, shape index: {}]   ;;  %s3275_s10 = inlined_call_operand.vmem [shape: bf16[32,64], index: 10, kind: input, shape index: {}]   ;;  %s3276_s11 = inlined_call_operand.hbm [shape: f32[1,64], index: 11, kind: input, shape index: {}]   ;;  %s3277_s12 = inlined_call_operand.vmem [shape: bf16[64,32], index: 12, kind: input, shape index: {}]   ;;  %s3278_s13 = inlined_call_operand.hbm [shape: f32[1,32], index: 13, kind: input, shape index: {}]   ;;  %s3279_s14 = inlined_call_operand.hbm [shape: f32[1,32], index: 14, kind: input, shape index: {}]   ;;  %s3280_s15 = inlined_call_operand.hbm [shape: f32[1,32], index: 15, kind: input, shape index: {}]   ;;  %s3281_s16 = inlined_call_operand.hbm [shape: bf16[32,32], index: 16, kind: input, shape index: {}]   ;;  %s3282_s17 = inlined_call_operand.hbm [shape: f32[1,32], index: 17, kind: input, shape index: {}]   ;;  %s3283_s18 = inlined_call_operand.vmem [shape: bf16[32,128], index: 18, kind: input, shape index: {}]   ;;  %s3284_s19 = inlined_call_operand.vmem [shape: f32[1,128], index: 19, kind: input, shape index: {}]   ;;  %s3285_s20 = inlined_call_operand.hbm [shape: f32[1,2,128], index: 20, kind: output, shape index: {}]  }
   0x1   :  { %3288 = sst [smem:[#allocation40_spill]] %s3265_s0 }
   0x2   :  { %3289 = sst [smem:[#allocation41_spill]] %s3266_s1 }
   0x3   :  { %3290 = sst [smem:[#allocation42_spill]] %s3267_s2 }
   0x4   :  { %3291 = sst [smem:[#allocation43_spill]] %s3268_s3 }
   0x5   :  { %3292 = sst [smem:[#allocation44_spill]] %s3269_s4 }
   0x6   :  { %3293 = sst [smem:[#allocation45_spill]] %s3277_s12 }
   0x7   :  { %s3294_s23 = sld [smem:[#allocation40_spill]] }
   0xd   :  { %s26_s12 = sshll.u32 %s3294_s23, 4  ;;  %s27_s12 = int_to_ptr.hbm [resolvable:$true] %s26_s12 }
   0xe   :  { %29 = dma.hbm_to_smem %s27_s12, 16, %s2574_s24, [#allocation7] }
   0xf   :  { %2548 = dma.done.wait [#allocation7], 16 }
  0x10   :  { %2549 = vsyncadd [#allocation7], 4294967280 }
  0x11   :  { %32 = sfence }
  0x12   :  { %33 = vsyncpa [#allocation10], 0 }
  0x13   :  { %34 = vsyncpa [#allocation13], 0 }
  0x14   :  { %35 = vsyncpa [#allocation16], 0 }
  0x15   :  { %36 = vsyncpa [#allocation19], 0 }
  0x16   :  { %37 = vsyncpa [#allocation22], 0 }
  0x17   :  { %38 = vsyncpa [#allocation25], 0 }
  0x18   :  { %39 = vsyncpa [#allocation28], 0  ;;  %s3295_s3 = sld [smem:[#allocation42_spill]] }
  0x1e   :  { %s59_s26 = sshll.u32 %s3295_s3, 4  ;;  %s60_s26 = int_to_ptr.hbm [resolvable:$true] %s59_s26 }
  0x1f   :  { %40 = vsyncpa [#allocation11], 0  ;;  %s2575_s27 = smov [#allocation12]   ;;  %s83_s29 = sshll.u32 %s3270_s5, 4  ;;  %s84_s29 = int_to_ptr.hbm [resolvable:$true] %s83_s29 }
  0x20   :  { %s61_s28 = sshll.u32 %s2575_s27, 4  ;;  %s2576_s30 = smov [#allocation15]   ;;  %s62_s28 = int_to_ptr.vmem [resolvable:$true] %s61_s28 }
  0x21   :  { %64 = dma.hbm_to_vmem [thread:$0]  %s60_s26, 16, %s62_s28, [#allocation13]  }
  0x22   :  { %s85_s0 = sshll.u32 %s2576_s30, 4  ;;  %s107_s22 = sshll.u32 %s3273_s8, 4  ;;  %s86_s0 = int_to_ptr.vmem [resolvable:$true] %s85_s0  ;;  %s108_s22 = int_to_ptr.hbm [resolvable:$true] %s107_s22 }
  0x23   :  { %88 = dma.hbm_to_vmem [thread:$0]  %s84_s29, 16, %s86_s0, [#allocation16]  }
  0x24   :  { %s131_s2 = sshll.u32 %s3276_s11, 4  ;;  %s2577_s25 = smov [#allocation18]   ;;  %s132_s2 = int_to_ptr.hbm [resolvable:$true] %s131_s2 }
  0x25   :  { %s109_s3 = sshll.u32 %s2577_s25, 4  ;;  %s2578_s5 = smov [#allocation21]   ;;  %s110_s3 = int_to_ptr.vmem [resolvable:$true] %s109_s3 }
  0x26   :  { %112 = dma.hbm_to_vmem [thread:$0]  %s108_s22, 16, %s110_s3, [#allocation19]  }
  0x27   :  { %s133_s26 = sshll.u32 %s2578_s5, 4  ;;  %s155_s12 = sshll.u32 %s3279_s14, 4  ;;  %s134_s26 = int_to_ptr.vmem [resolvable:$true] %s133_s26  ;;  %s156_s12 = int_to_ptr.hbm [resolvable:$true] %s155_s12 }
  0x28   :  { %136 = dma.hbm_to_vmem [thread:$0]  %s132_s2, 16, %s134_s26, [#allocation22]  }
  0x29   :  { %s2579_s8 = smov [#allocation24]   ;;  %s176_s11 = sshll.u32 %s3281_s16, 4  ;;  %s177_s11 = int_to_ptr.hbm [resolvable:$true] %s176_s11 }
  0x2a   :  { %s157_s4 = sshll.u32 %s2579_s8, 4  ;;  %s2580_s0 = smov [#allocation27]   ;;  %s158_s4 = int_to_ptr.vmem [resolvable:$true] %s157_s4 }
  0x2b   :  { %160 = dma.hbm_to_vmem [thread:$0]  %s156_s12, 16, %s158_s4, [#allocation25]  }
  0x2c   :  { %s178_s21 = sshll.u32 %s2580_s0, 4  ;;  %s3296_s23 = sld [smem:[#allocation41_spill]]  ;;  %s179_s21 = int_to_ptr.vmem [resolvable:$true] %s178_s21 }
  0x2d   :  { %s2581_s14 = smov 64   ;;  %s2582_s25 = smov 4  }
  0x2e   :  { %184 = dma.hbm_to_vmem [thread:$0]  %s177_s11, 256, %s179_s21, [#allocation28], %s2581_s14, %s2581_s14, %s2582_s25  }
  0x2f   :  { %s3297_s5 = sld [smem:[#allocation43_spill]]  ;;  %s2583_s16 = smov [#allocation9]  }
  0x30   :  { %s47_s27 = sshll.u32 %s2583_s16, 4  ;;  %s2584_s28 = smov [#allocation14]   ;;  %s48_s27 = int_to_ptr.vmem [resolvable:$true] %s47_s27 }
  0x31   :  { %s72_s12 = sshll.u32 %s2584_s28, 4  ;;  %s96_s29 = sshll.u32 %s3272_s7, 4  ;;  %s73_s12 = int_to_ptr.vmem [resolvable:$true] %s72_s12  ;;  %s97_s29 = int_to_ptr.hbm [resolvable:$true] %s96_s29 }
  0x32   :  { %s45_s24 = sshll.u32 %s3296_s23, 4  ;;  %s118_s0 = sshll.u32 %s3274_s9, 4  ;;  %s46_s24 = int_to_ptr.hbm [resolvable:$true] %s45_s24  ;;  %s119_s0 = int_to_ptr.hbm [resolvable:$true] %s118_s0 }
  0x33   :  { %53 = dma.hbm_to_vmem [thread:$0]  %s46_s24, 128, %s48_s27, [#allocation10], %s2581_s14, %s2581_s14, %s2582_s25  }
  0x34   :  { %s2585_s21 = smov [#allocation17]   ;;  %s2586_s22 = smov [#allocation20]  }
  0x35   :  { %s70_s26 = sshll.u32 %s3297_s5, 4  ;;  %s98_s1 = sshll.u32 %s2585_s21, 4  ;;  %s71_s26 = int_to_ptr.hbm [resolvable:$true] %s70_s26  ;;  %s99_s1 = int_to_ptr.vmem [resolvable:$true] %s98_s1 }
  0x36   :  { %75 = dma.hbm_to_vmem [thread:$0]  %s71_s26, 16, %s73_s12, [#allocation13]  }
  0x37   :  { %101 = dma.hbm_to_vmem [thread:$0]  %s97_s29, 16, %s99_s1, [#allocation16]  }
  0x38   :  { %s120_s23 = sshll.u32 %s2586_s22, 4  ;;  %s144_s2 = sshll.u32 %s3278_s13, 4  ;;  %s121_s23 = int_to_ptr.vmem [resolvable:$true] %s120_s23  ;;  %s145_s2 = int_to_ptr.hbm [resolvable:$true] %s144_s2 }
  0x39   :  { %123 = dma.hbm_to_vmem [thread:$0]  %s119_s0, 16, %s121_s23, [#allocation19]  }
  0x3a   :  { %s166_s5 = sshll.u32 %s3280_s15, 4  ;;  %s2587_s26 = smov [#allocation23]   ;;  %s167_s5 = int_to_ptr.hbm [resolvable:$true] %s166_s5 }
  0x3b   :  { %s146_s9 = sshll.u32 %s2587_s26, 4  ;;  %s2588_s16 = smov [#allocation26]   ;;  %s147_s9 = int_to_ptr.vmem [resolvable:$true] %s146_s9 }
  0x3c   :  { %149 = dma.hbm_to_vmem [thread:$0]  %s145_s2, 16, %s147_s9, [#allocation22]  }
  0x3d   :  { %s168_s27 = sshll.u32 %s2588_s16, 4  ;;  %s190_s8 = sshll.u32 %s3282_s17, 4  ;;  %s169_s27 = int_to_ptr.vmem [resolvable:$true] %s168_s27  ;;  %s191_s8 = int_to_ptr.hbm [resolvable:$true] %s190_s8 }
  0x3e   :  { %171 = dma.hbm_to_vmem [thread:$0]  %s167_s5, 16, %s169_s27, [#allocation25]  }
  0x3f   :  { %s2589_s13 = smov [#allocation29]  }
  0x40   :  { %s192_s4 = sshll.u32 %s2589_s13, 4  ;;  %s193_s4 = int_to_ptr.vmem [resolvable:$true] %s192_s4 }
  0x41   :  { %195 = dma.hbm_to_vmem [thread:$0]  %s191_s8, 16, %s193_s4, [#allocation28]  }
  0x42   :  { %2550 = dma.done.wait [#allocation10], 128  }
  0x43   :  { %2551 = vsyncadd [#allocation10], 4294967168 }
  0x44   :  { %2552 = dma.done.wait [#allocation13], 32  }
  0x45   :  { %2553 = vsyncadd [#allocation13], 4294967264 }
  0x46   :  { %2554 = dma.done.wait [#allocation16], 32  }
  0x47   :  { %2555 = vsyncadd [#allocation16], 4294967264 }
  0x48   :  { %2556 = dma.done.wait [#allocation19], 32  }
  0x49   :  { %2557 = vsyncadd [#allocation19], 4294967264 }
  0x4a   :  { %2558 = dma.done.wait [#allocation22], 32  }
  0x4b   :  { %2559 = vsyncadd [#allocation22], 4294967264 }
  0x4c   :  { %2560 = dma.done.wait [#allocation25], 32  }
  0x4d   :  { %2561 = vsyncadd [#allocation25], 4294967264 }
  0x4e   :  { %2562 = dma.done.wait [#allocation28], 272  }
  0x4f   :  { %2563 = vsyncadd [#allocation28], 4294967024  ;;  %vm664_vm0 = vcmask 7168   ;;  %v2590_v0 = vmov -inf   ;;  %s2757_s15 = sld [smem:[#allocation8]]  ;;  %vm669_vm1 = vcmask 130048  }
  0x50   :  { %665 = vst.msk [vmem:[#allocation4] sm:$0xff] %vm664_vm0, %v2590_v0  ;;  %v2591_v1 = vmov 0.0   ;;  %v2058_v2 = vld [vmem:[#allocation9] sm:$0xff]   ;;  %vm259_vm2 = vcmask 261120   ;;  %v2592_v7 = vmov 32.0   ;;  %s3298_s30 = sld [smem:[#allocation44_spill]] }
  0x51   :  { %666 = vst.msk [vmem:[#allocation4 + $0x8] sm:$0xff] %vm664_vm0, %v2590_v0  ;;  %v2059_v3 = vunpack.c.l.bf16 %v2058_v2  ;;  %v2060_v5 = vunpack.c.h.bf16 %v2058_v2  ;;  %2120 = vrcp.f32 %v2592_v7  ;;  %v2117_v45 = vld [vmem:[#allocation12] ss:$0 sm:$0xff]  ;;  %v2118_v50 = vld [vmem:[#allocation14] ss:$0 sm:$0xff]  ;;  %s2593_s21 = smov 112  }
  0x52   :  { %667 = vst.msk [vmem:[#allocation5] sm:$0xff] %vm664_vm0, %v2591_v1  ;;  %v2119_v55 = vld [vmem:[#allocation15] ss:$0 sm:$0xff]  ;;  %s2594_s1 = smov 96   ;;  %v2595_v2 = vmov 1983009808  }
  0x53   :  { %668 = vst.msk [vmem:[#allocation5 + $0x8] sm:$0xff] %vm664_vm0, %v2591_v1  ;;  %v260_v4 = vsel %vm259_vm2, %v2059_v3, 0.0  ;;  %v263_v6 = vsel %vm259_vm2, %v2060_v5, 0.0  ;;  %vm368_vm10 = vcmask 1047556   ;;  %vm561_vm11 = vcmask 125952   ;;  %s2915_s22 = smov 0  }
  0x54   :  { %670 = vst.msk [vmem:[#allocation6] sm:$0xff] %vm669_vm1, %v2591_v1  ;;  %261 = vadd.xlane.f32.xlu0 %v260_v4 }
  0x55   :  { %671 = vst.msk [vmem:[#allocation6 + $0x8] sm:$0xff] %vm669_vm1, %v2591_v1 }
  0x56   :  { %v2044_v24 = vld [vmem:[%s3298_s30 + $0x8] sm:$0xff]  ;;  %v2043_v26 = vld [vmem:[%s3298_s30] sm:$0xff] }
  0x57   :  { %v2121_v8 = vpop.eup %2120  ;;  %351 = vmatpush.bf16.msra.mxu0 %v2044_v24 }
  0x58   :  { %v267_v9 = vmul.f32 32.0, %v2121_v8  ;;  %vm271_vm3 = vweird.f32 %v2121_v8 }
  0x5a   :  { %v268_v10 = vsub.f32 1.0, %v267_v9 }
  0x5b   :  { %352 = vmatpush.bf16.msra.mxu0 %v2043_v26 }
  0x5c   :  { %264 = vadd.xlane.f32.xlu0 %v263_v6  ;;  %v269_v11 = vmul.f32 %v2121_v8, %v268_v10  ;;  %v2596_v6 = vmov 1934713408  }
  0x5d   :  { %v393_v7 = vunpack.c.l.s4 %v2596_v6 }
  0x5e   :  { %v270_v12 = vadd.f32 %v2121_v8, %v269_v11 }
  0x5f   :  { %v2806_v11 = vunpack.c.0.s8 %v393_v7 }
  0x60   :  { %v2771_v13 = vsel %vm271_vm3, %v2121_v8, %v270_v12 }
  0xc7   :  { %v262_v14 = vpop.xlane.xlu0 %261 }
  0xc8   :  { %v273_v15 = vmul.f32 %v2771_v13, %v262_v14 }
  0xca   :  { %v275_v16 = vsub.f32 %v2059_v3, %v273_v15  ;;  %v371_v3 = vunpack.c.l.s4 %v2595_v2 }
  0xcc   :  { %v277_v17 = vmul.f32 %v275_v16, %v275_v16  ;;  %v2801_v4 = vunpack.c.0.s8 %v371_v3 }
  0xce   :  { %v279_v18 = vsel %vm259_vm2, %v277_v17, 0.0 }
  0xcf   :  { %280 = vadd.xlane.f32.xlu1 %v279_v18  ;;  %v265_v19 = vpop.xlane.xlu0 %264 }
  0xd0   :  { %v274_v20 = vmul.f32 %v2771_v13, %v265_v19 }
  0xd2   :  { %v276_v21 = vsub.f32 %v2060_v5, %v274_v20 }
  0xd4   :  { %v278_v22 = vmul.f32 %v276_v21, %v276_v21 }
  0xd6   :  { %v282_v23 = vsel %vm259_vm2, %v278_v22, 0.0 }
  0xd7   :  { %283 = vadd.xlane.f32.xlu1 %v282_v23 }
 0x142   :  { %v281_v25 = vpop.xlane.xlu1 %280 }
 0x143   :  { %v285_v27 = vmul.f32 %v281_v25, %v2771_v13 }
 0x145   :  { %v287_v28 = vadd.f32 1e-12, %v285_v27 }
 0x147   :  { %2122 = vrsqrt.f32 %v287_v28  ;;  %vm295_vm5 = vweird.f32 %v287_v28 }
 0x14a   :  { %v284_v29 = vpop.xlane.xlu1 %283 }
 0x14b   :  { %v286_v30 = vmul.f32 %v284_v29, %v2771_v13 }
 0x14d   :  { %v2123_v31 = vpop.eup %2122  ;;  %v288_v32 = vadd.f32 1e-12, %v286_v30 }
 0x14e   :  { %v290_v33 = vmul.f32 %v2123_v31, %v287_v28  ;;  %vm296_vm4 = vweird.f32 %v2123_v31 }
 0x14f   :  { %2124 = vrsqrt.f32 %v288_v32  ;;  %vm297_vm6 = vmor %vm295_vm5, %vm296_vm4  ;;  %vm305_vm8 = vweird.f32 %v288_v32 }
 0x150   :  { %v291_v34 = vmul.f32 %v2123_v31, %v290_v33 }
 0x152   :  { %v292_v35 = vmul.f32 0.5, %v291_v34 }
 0x154   :  { %v293_v36 = vsub.f32 1.5, %v292_v35 }
 0x155   :  { %v2125_v37 = vpop.eup %2124 }
 0x156   :  { %v294_v38 = vmul.f32 %v2123_v31, %v293_v36  ;;  %v300_v39 = vmul.f32 %v2125_v37, %v288_v32  ;;  %vm306_vm7 = vweird.f32 %v2125_v37 }
 0x157   :  { %vm307_vm9 = vmor %vm305_vm8, %vm306_vm7 }
 0x158   :  { %v301_v40 = vmul.f32 %v2125_v37, %v300_v39  ;;  %v298_v41 = vsel %vm297_vm6, %v2123_v31, %v294_v38 }
 0x159   :  { %v309_v44 = vmul.f32 %v298_v41, %v275_v16 }
 0x15a   :  { %v302_v42 = vmul.f32 0.5, %v301_v40 }
 0x15b   :  { %v314_v49 = vmul.f32 %v2117_v45, %v309_v44 }
 0x15c   :  { %v303_v43 = vsub.f32 1.5, %v302_v42 }
 0x15d   :  { %v2785_v52 = vadd.f32 %v2118_v50, %v314_v49 }
 0x15e   :  { %v304_v46 = vmul.f32 %v2125_v37, %v303_v43 }
 0x160   :  { %v308_v47 = vsel %vm307_vm9, %v2125_v37, %v304_v46 }
 0x161   :  { %v310_v48 = vmul.f32 %v308_v47, %v276_v21 }
 0x163   :  { %v315_v51 = vmul.f32 %v2117_v45, %v310_v48 }
 0x165   :  { %v2787_v53 = vadd.f32 %v2118_v50, %v315_v51 }
 0x167   :  { %v321_v54 = vpack.c.bf16 %v2787_v53, %v2785_v52 }
 0x169   :  { %1960 = vmatmul.msk.bf16.vlgmr.msra.gmra.mxu0 %vm259_vm2, %v321_v54 }
 0x1e6   :  { %v354_v56 = vpop.f32.mrf.mxu0 }
 0x1e7   :  { %v355_v57 = vadd.f32 %v2119_v55, %v354_v56 }
 0x1e9   :  { %461 = vrot.lane.b32.xlu2 %v355_v57, %s2593_s21  ;;  %v359_v58 = vmul.f32 0.25, %v355_v57 }
 0x1eb   :  { %364 = vrot.lane.b32.xlu1 %v359_v58, %s2593_s21  ;;  %v367_v5 = vrot.slane %v359_v58, 4  ;;  %v373_v9 = vperm.slane %v359_v58, %v2801_v4 }
 0x1ed   :  { %v369_v8 = vsel %vm368_vm10, 0.0, %v367_v5  ;;  %v390_v16 = vrot.slane %v373_v9, 4 }
 0x1ee   :  { %v356_v59 = vpop.f32.mrf.mxu0  ;;  %v377_v10 = vperm.slane %v369_v8, %v2801_v4 }
 0x1ef   :  { %v2794_v60 = vadd.f32 %v2119_v55, %v356_v59 }
 0x1f0   :  { %v402_v22 = vrot.slane %v377_v10, 4 }
 0x1f1   :  { %v2797_v61 = vmul.f32 0.25, %v2794_v60 }
 0x243   :  { %v462_v62 = vpop.permute.xlu2 %461 }
 0x244   :  { %v2107_v63 = vpack.i.bf16 %v462_v62, %v355_v57 }
 0x246   :  { %2113 = vrot.lane.b32.xlu0 %v2107_v63, %s2581_s14  ;;  %2108 = vrot.lane.b32.xlu2 %v2107_v63, %s2594_s1 }
 0x25d   :  { %v365_v12 = vpop.permute.xlu1 %364 }
 0x25e   :  { %v378_v14 = vrot.slane %v365_v12, 4  ;;  %v383_v15 = vperm.slane %v365_v12, %v2801_v4 }
 0x260   :  { %v379_v17 = vsel %vm368_vm10, 0.0, %v378_v14  ;;  %v388_v18 = vrot.slane %v383_v15, 4  ;;  %v391_v19 = vsel %vm368_vm10, %v383_v15, %v390_v16 }
 0x261   :  { %v387_v20 = vperm.slane %v379_v17, %v2801_v4  ;;  %v399_v21 = vperm.slane %v391_v19, %v2806_v11 }
 0x262   :  { %v389_v23 = vsel %vm368_vm10, %v388_v18, %v373_v9 }
 0x263   :  { %v395_v24 = vperm.slane %v389_v23, %v2806_v11  ;;  %v400_v25 = vrot.slane %v387_v20, 4  ;;  %v403_v26 = vsel %vm368_vm10, %v387_v20, %v402_v22  ;;  %v414_v27 = vrot.slane %v399_v21, 4 }
 0x264   :  { %v411_v28 = vperm.slane %v403_v26, %v2806_v11 }
 0x265   :  { %v401_v29 = vsel %vm368_vm10, %v400_v25, %v377_v10  ;;  %v412_v30 = vrot.slane %v395_v24, 4  ;;  %v415_v31 = vsel %vm368_vm10, 0.0, %v414_v27  ;;  %v420_v38 = vsel %vm368_vm10, %v414_v27, %v395_v24 }
 0x266   :  { %v407_v32 = vperm.slane %v401_v29, %v2806_v11  ;;  %v418_v33 = vrot.slane %v411_v28, 4  ;;  %v425_v34 = vrot.slane %v415_v31, 4  ;;  %v424_v43 = vperm.slane %v420_v38, %v2801_v4 }
 0x267   :  { %v413_v35 = vsel %vm368_vm10, 0.0, %v412_v30 }
 0x268   :  { %v416_v36 = vrot.slane %v407_v32, 4  ;;  %v419_v37 = vsel %vm368_vm10, 0.0, %v418_v33  ;;  %v426_v39 = vsel %vm368_vm10, %v425_v34, %v413_v35  ;;  %v431_v44 = vsel %vm368_vm10, %v418_v33, %v407_v32 }
 0x269   :  { %v430_v40 = vperm.slane %v426_v39, %v2801_v4  ;;  %v436_v41 = vrot.slane %v419_v37, 4  ;;  %v435_v49 = vperm.slane %v431_v44, %v2801_v4 }
 0x26a   :  { %v417_v42 = vsel %vm368_vm10, 0.0, %v416_v36 }
 0x26b   :  { %v437_v45 = vsel %vm368_vm10, %v436_v41, %v417_v42  ;;  %v442_v46 = vrot.slane %v430_v40, 4 }
 0x26c   :  { %v441_v47 = vperm.slane %v437_v45, %v2801_v4 }
 0x26d   :  { %v443_v48 = vsel %vm368_vm10, %v442_v46, %v424_v43 }
 0x26e   :  { %v447_v50 = vperm.slane %v443_v48, %v2806_v11  ;;  %v448_v51 = vrot.slane %v441_v47, 4 }
 0x270   :  { %v449_v54 = vsel %vm368_vm10, %v448_v51, %v435_v49  ;;  %v456_v55 = vrot.slane %v447_v50, 4 }
 0x271   :  { %v453_v56 = vperm.slane %v449_v54, %v2806_v11 }
 0x273   :  { %v454_v57 = vrot.slane %v453_v56, 4  ;;  %v2836_v58 = vsel %vm368_vm10, %v453_v56, %v456_v55 }
 0x274   :  { %v459_v59 = vpack.c.bf16 %v2836_v58, %v2836_v58 }
 0x275   :  { %v2841_v62 = vsel %vm368_vm10, %v454_v57, %v447_v50  ;;  %v361_v50 = vlaneseq }
 0x276   :  { %v458_v63 = vpack.c.bf16 %v2841_v62, %v2841_v62 }
 0x277   :  { %v2875_v57 = vand.u32 127, %v361_v50 }
 0x2a0   :  { %v2109_v2 = vpop.permute.xlu2 %2108 }
 0x2a1   :  { %v2111_v3 = vunpack.i.h.bf16 %v2109_v2  ;;  %v2110_v5 = vunpack.i.l.bf16 %v2109_v2 }
 0x2a3   :  { %v479_v6 = vrot.slane %v2111_v3, 4  ;;  %v484_v7 = vperm.slane %v2111_v3, %v2801_v4  ;;  %v469_v8 = vrot.slane %v2110_v5, 4  ;;  %v474_v9 = vperm.slane %v2110_v5, %v2801_v4 }
 0x2a5   :  { %v480_v10 = vsel %vm368_vm10, 0.0, %v479_v6  ;;  %v489_v12 = vrot.slane %v484_v7, 4  ;;  %v470_v14 = vsel %vm368_vm10, 0.0, %v469_v8  ;;  %v491_v15 = vrot.slane %v474_v9, 4 }
 0x2a6   :  { %v488_v16 = vperm.slane %v480_v10, %v2801_v4  ;;  %v478_v17 = vperm.slane %v470_v14, %v2801_v4 }
 0x2a7   :  { %v490_v18 = vsel %vm368_vm10, %v489_v12, %v474_v9  ;;  %v492_v19 = vsel %vm368_vm10, %v484_v7, %v491_v15 }
 0x2a8   :  { %v501_v20 = vrot.slane %v488_v16, 4  ;;  %v496_v21 = vperm.slane %v490_v18, %v2806_v11  ;;  %v500_v22 = vperm.slane %v492_v19, %v2806_v11  ;;  %v503_v23 = vrot.slane %v478_v17, 4 }
 0x2aa   :  { %v502_v24 = vsel %vm368_vm10, %v501_v20, %v478_v17  ;;  %v504_v25 = vsel %vm368_vm10, %v488_v16, %v503_v23  ;;  %v513_v26 = vrot.slane %v496_v21, 4  ;;  %v515_v27 = vrot.slane %v500_v22, 4 }
 0x2ab   :  { %v508_v28 = vperm.slane %v502_v24, %v2806_v11  ;;  %v512_v29 = vperm.slane %v504_v25, %v2806_v11 }
 0x2ac   :  { %v516_v30 = vsel %vm368_vm10, 0.0, %v515_v27  ;;  %v514_v34 = vsel %vm368_vm10, 0.0, %v513_v26  ;;  %v521_v36 = vsel %vm368_vm10, %v515_v27, %v496_v21 }
 0x2ad   :  { %v517_v31 = vrot.slane %v508_v28, 4  ;;  %v519_v32 = vrot.slane %v512_v29, 4  ;;  %v526_v33 = vrot.slane %v516_v30, 4  ;;  %v525_v41 = vperm.slane %v521_v36, %v2801_v4 }
 0x2af   :  { %v520_v35 = vsel %vm368_vm10, 0.0, %v519_v32  ;;  %v527_v37 = vsel %vm368_vm10, %v526_v33, %v514_v34  ;;  %v518_v40 = vsel %vm368_vm10, 0.0, %v517_v31  ;;  %v532_v42 = vsel %vm368_vm10, %v519_v32, %v508_v28 }
 0x2b0   :  { %v531_v38 = vperm.slane %v527_v37, %v2801_v4  ;;  %v537_v39 = vrot.slane %v520_v35, 4  ;;  %v536_v47 = vperm.slane %v532_v42, %v2801_v4 }
 0x2b2   :  { %v538_v43 = vsel %vm368_vm10, %v537_v39, %v518_v40  ;;  %v543_v44 = vrot.slane %v531_v38, 4 }
 0x2b3   :  { %v542_v45 = vperm.slane %v538_v43, %v2801_v4 }
 0x2b4   :  { %v544_v46 = vsel %vm368_vm10, %v543_v44, %v525_v41 }
 0x2b5   :  { %v548_v48 = vperm.slane %v544_v46, %v2806_v11  ;;  %v549_v49 = vrot.slane %v542_v45, 4 }
 0x2b7   :  { %v550_v51 = vsel %vm368_vm10, %v549_v49, %v536_v47  ;;  %v557_v54 = vrot.slane %v548_v48, 4 }
 0x2b8   :  { %v554_v55 = vperm.slane %v550_v51, %v2806_v11  ;;  %v2114_v56 = vpop.permute.xlu0 %2113 }
 0x2b9   :  { %v2116_v2 = vunpack.i.h.bf16 %v2114_v56  ;;  %v2115_v3 = vunpack.i.l.bf16 %v2114_v56 }
 0x2ba   :  { %v555_v5 = vrot.slane %v554_v55, 4  ;;  %v558_v6 = vsel %vm368_vm10, %v554_v55, %v557_v54 }
 0x2bb   :  { %v560_v7 = vpack.c.bf16 %v558_v6, %v558_v6  ;;  %v580_v8 = vrot.slane %v2116_v2, 4  ;;  %v585_v9 = vperm.slane %v2116_v2, %v2801_v4  ;;  %v570_v10 = vrot.slane %v2115_v3, 4 }
 0x2bc   :  { %v556_v12 = vsel %vm368_vm10, %v555_v5, %v548_v48  ;;  %v575_v14 = vperm.slane %v2115_v3, %v2801_v4 }
 0x2bd   :  { %v559_v15 = vpack.c.bf16 %v556_v12, %v556_v12  ;;  %563 = vst.msk [vmem:[#allocation2 + $0x4] sm:$0xf] %vm561_vm11, %v560_v7  ;;  %v581_v16 = vsel %vm368_vm10, 0.0, %v580_v8  ;;  %v590_v17 = vrot.slane %v585_v9, 4  ;;  %v571_v18 = vsel %vm368_vm10, 0.0, %v570_v10 }
 0x2be   :  { %v589_v19 = vperm.slane %v581_v16, %v2801_v4  ;;  %v579_v20 = vperm.slane %v571_v18, %v2801_v4  ;;  %v592_v21 = vrot.slane %v575_v14, 4 }
 0x2bf   :  { %562 = vst.msk [vmem:[#allocation2] sm:$0xf] %vm561_vm11, %v559_v15  ;;  %v591_v22 = vsel %vm368_vm10, %v590_v17, %v575_v14 }
 0x2c0   :  { %v602_v23 = vrot.slane %v589_v19, 4  ;;  %v593_v24 = vsel %vm368_vm10, %v585_v9, %v592_v21  ;;  %v597_v25 = vperm.slane %v591_v22, %v2806_v11  ;;  %v604_v26 = vrot.slane %v579_v20, 4 }
 0x2c1   :  { %v601_v27 = vperm.slane %v593_v24, %v2806_v11 }
 0x2c2   :  { %v603_v28 = vsel %vm368_vm10, %v602_v23, %v579_v20  ;;  %v605_v29 = vsel %vm368_vm10, %v589_v19, %v604_v26  ;;  %v614_v32 = vrot.slane %v597_v25, 4 }
 0x2c3   :  { %v609_v30 = vperm.slane %v603_v28, %v2806_v11  ;;  %v613_v31 = vperm.slane %v605_v29, %v2806_v11  ;;  %v616_v33 = vrot.slane %v601_v27, 4 }
 0x2c4   :  { %v615_v38 = vsel %vm368_vm10, 0.0, %v614_v32 }
 0x2c5   :  { %v617_v34 = vsel %vm368_vm10, 0.0, %v616_v33  ;;  %v618_v35 = vrot.slane %v609_v30, 4  ;;  %v620_v36 = vrot.slane %v613_v31, 4  ;;  %v622_v40 = vsel %vm368_vm10, %v616_v33, %v597_v25 }
 0x2c6   :  { %v627_v37 = vrot.slane %v617_v34, 4  ;;  %v626_v47 = vperm.slane %v622_v40, %v2801_v4 }
 0x2c7   :  { %v621_v39 = vsel %vm368_vm10, 0.0, %v620_v36  ;;  %v619_v43 = vsel %vm368_vm10, 0.0, %v618_v35  ;;  %v633_v45 = vsel %vm368_vm10, %v620_v36, %v609_v30 }
 0x2c8   :  { %v628_v41 = vsel %vm368_vm10, %v627_v37, %v615_v38  ;;  %v638_v42 = vrot.slane %v621_v39, 4  ;;  %v637_v50 = vperm.slane %v633_v45, %v2801_v4 }
 0x2c9   :  { %v632_v44 = vperm.slane %v628_v41, %v2801_v4 }
 0x2ca   :  { %v639_v46 = vsel %vm368_vm10, %v638_v42, %v619_v43 }
 0x2cb   :  { %v643_v48 = vperm.slane %v639_v46, %v2801_v4  ;;  %v644_v49 = vrot.slane %v632_v44, 4 }
 0x2cd   :  { %v645_v51 = vsel %vm368_vm10, %v644_v49, %v626_v47  ;;  %v650_v54 = vrot.slane %v643_v48, 4 }
 0x2ce   :  { %v649_v55 = vperm.slane %v645_v51, %v2806_v11 }
 0x2cf   :  { %v651_v56 = vsel %vm368_vm10, %v650_v54, %v637_v50 }
 0x2d0   :  { %v655_v2 = vperm.slane %v651_v56, %v2806_v11  ;;  %v658_v3 = vrot.slane %v649_v55, 4 }
 0x2d2   :  { %v656_v5 = vrot.slane %v655_v2, 4  ;;  %v659_v6 = vsel %vm368_vm10, %v655_v2, %v658_v3 }
 0x2d3   :  { %v661_v7 = vpack.c.bf16 %v659_v6, %v659_v6 }
 0x2d4   :  { %v657_v8 = vsel %vm368_vm10, %v656_v5, %v649_v55 }
 0x2d5   :  { %v660_v9 = vpack.c.bf16 %v657_v8, %v657_v8  ;;  %663 = vst.msk [vmem:[#allocation3 + $0x4] sm:$0xf] %vm561_vm11, %v661_v7 }
 0x2d7   :  { %662 = vst.msk [vmem:[#allocation3] sm:$0xf] %vm561_vm11, %v660_v9 }
 0x2d8 LB: > { %s1968_s23 = sshll.u32 %s2568_s22, 3  ;;  %v704_v18 = vstv %s2757_s15  ;;  %v2597_v19 = vmov -1e+09   ;;  %vm747_vm13 = vcmask 64512   ;;  %v2598_v29 = vmov 0   ;;  %v745_v30 = vld [vmem:[#allocation4] sm:$0xff]  ;;  %s2568_s22 = sphi %s2915_s22, %s688_s22  }
 0x2d9   : > { %s2921_s24 = sshra.s32 %s1968_s23, 3  ;;  %v702_v16 = vstv %s1968_s23  ;;  %2126 = vset.pattern.permute.xlu1 %v2598_v29  ;;  %2127 = vset.pattern.permute.xlu2 %v2598_v29  ;;  %v746_v35 = vld [vmem:[#allocation4 + $0x8] sm:$0xff]  ;;  %vm811_vm14 = vcmask 1043456   ;;  %v778_v6 = vld [vmem:[#allocation5] sm:$0xff]  ;;  %s688_s22 = sadd.s32 1, %s2568_s22  }
 0x2da   : > { %s1969_s25 = sshll.u32 %s2921_s24, 2  ;;  %v703_v17 = vadd.s32 %v702_v16, %v2875_v57  ;;  %2128 = vset.pattern.permute.xlu0 %v2598_v29  ;;  %p687_p0 = scmp.ge.s32.totalorder %s688_s22, 1 }
 0x2db   : > { %s695_s2 = scalar_lea.vmem [#allocation2], %s1969_s25  ;;  %s699_s7 = scalar_lea.vmem [#allocation3], %s1969_s25 }
 0x2dc   : > { %v696_v10 = vld [vmem:[%s695_s2] sm:$0xf]  ;;  %v697_v12 = vld [vmem:[%s695_s2 + $0x4] sm:$0xf]  ;;  %vm705_vm12 = vcmp.lt.s32.totalorder %v703_v17, %v704_v18  ;;  %v792_v17 = vld [vmem:[#allocation6] sm:$0xff]  ;;  %s3013_s3 = sld [smem:[#allocation8 + $0x1]] (%p687_p0) }
 0x2dd   : > { %v711_v14 = vsel %vm669_vm1, %v696_v10, 0  ;;  %v730_v15 = vsel %vm669_vm1, %v697_v12, 0  ;;  %v706_v20 = vsel %vm705_vm12, 0.0, %v2597_v19  ;;  %v779_v10 = vld [vmem:[#allocation5 + $0x8] sm:$0xff]  ;;  %s3129_s5 = smov (%p687_p0), 0  }
 0x2de   : > { %720 = vmatpush.bf16.xpose.msra.mxu0 %v711_v14  ;;  %739 = vmatpush.bf16.xpose.msra.mxu1 %v730_v15  ;;  %v700_v42 = vld [vmem:[%s699_s7] sm:$0xf]  ;;  %v701_v44 = vld [vmem:[%s699_s7 + $0x4] sm:$0xf] }
 0x2df   : > { %v813_v43 = vsel %vm811_vm14, %v700_v42, 0  ;;  %v832_v45 = vsel %vm811_vm14, %v701_v44, 0 }
 0x2e0   : > { %822 = vmatpush.bf16.msra.mxu2 %v813_v43  ;;  %841 = vmatpush.bf16.msra.mxu3 %v832_v45 }
 0x2e5   : > { %1971 = vmatmul.msk.bf16.vlgmr.msra.gmra.mxu0 %vm669_vm1, %v458_v63  ;;  %1972 = vmatmul.msk.bf16.vlgmr.msra.gmra.mxu1 %vm669_vm1, %v459_v59 }
 0x362   : > { %v722_v21 = vpop.f32.mrf.mxu0  ;;  %v741_v22 = vpop.f32.mrf.mxu1 }
 0x363   : > { %v723_v23 = vadd.f32 %v722_v21, %v706_v20  ;;  %v742_v25 = vadd.f32 %v741_v22, %v706_v20  ;;  %v793_v21 = vld [vmem:[#allocation6 + $0x8] sm:$0xff] }
 0x365   : > { %v748_v24 = vsel %vm747_vm13, %v723_v23, -inf  ;;  %v751_v28 = vsel %vm747_vm13, %v742_v25, -inf }
 0x366   : > { %749 = vmax.xlane.f32.xlu0 %v748_v24 }
 0x36a   : > { %v724_v26 = vpop.f32.mrf.mxu0  ;;  %v743_v27 = vpop.f32.mrf.mxu1 }
 0x36e   : > { %752 = vmax.xlane.f32.xlu0 %v751_v28 }
 0x3d9   : > { %v750_v31 = vpop.xlane.xlu0 %749 }
 0x3da   : > { %v754_v32 = vmax.f32 %v745_v30, %v750_v31 }
 0x3dc   : > { %v756_v33 = vsub.f32 %v745_v30, %v754_v32  ;;  %851 = vst.msk [vmem:[#allocation4] sm:$0xff] %vm664_vm0, %v754_v32  ;;  %764 = vperm.xlu1 %2126, %v754_v32   ;;  %v2599_v30 = vmov (%p687_p0), 0  }
 0x3dd   :  { %1265 = vst.msk [vmem:[#allocation4] sm:$0xff] (%p687_p0), %vm664_vm0, %v2590_v0  ;;  %2137 = vset.pattern.permute.xlu0 (%p687_p0), %v2599_v30 }
 0x3de   : > { %v758_v34 = vmul.f32 1.442695, %v756_v33 }
 0x3e0   : > { %2129 = vpow2.f32 %v758_v34 }
 0x3e1   : > { %v753_v36 = vpop.xlane.xlu0 %752 }
 0x3e2   : > { %v755_v37 = vmax.f32 %v746_v35, %v753_v36 }
 0x3e4   : > { %v757_v38 = vsub.f32 %v746_v35, %v755_v37  ;;  %852 = vst.msk [vmem:[#allocation4 + $0x8] sm:$0xff] %vm664_vm0, %v755_v37  ;;  %769 = vperm.xlu1 %2126, %v755_v37  }
 0x3e5   :  { %1266 = vst.msk [vmem:[#allocation4 + $0x8] sm:$0xff] (%p687_p0), %vm664_vm0, %v2590_v0 }
 0x3e6   : > { %v2130_v39 = vpop.eup %2129  ;;  %v760_v40 = vmul.f32 1.442695, %v757_v38 }
 0x3e7   : > { %796 = vperm.xlu2 %2127, %v2130_v39   ;;  %v780_v7 = vmul.f32 %v2130_v39, %v778_v6 }
 0x3e8   : > { %2131 = vpow2.f32 %v760_v40 }
 0x3ec   :  { %2138 = vset.pattern.permute.xlu1 (%p687_p0), %v2599_v30 }
 0x3ee   : > { %v2132_v41 = vpop.eup %2131 }
 0x3ef   : > { %801 = vperm.xlu2 %2127, %v2132_v41   ;;  %v781_v12 = vmul.f32 %v2132_v41, %v779_v10 }
 0x441   : > { %v797_v16 = vpop.permute.xlu2 %796 }
 0x442   : > { %v804_v18 = vmul.f32 %v797_v16, %v792_v17 }
 0x449   : > { %v802_v22 = vpop.permute.xlu2 %801 }
 0x44e   : > { %v765_v46 = vpop.permute.xlu1 %764 }
 0x44f   : > { %v772_v47 = vsub.f32 %v723_v23, %v765_v46  ;;  %v805_v23 = vmul.f32 %v802_v22, %v793_v21 }
 0x451   : > { %v774_v48 = vmul.f32 1.442695, %v772_v47 }
 0x453   : > { %2133 = vpow2.f32 %v774_v48 }
 0x456   : > { %v770_v49 = vpop.permute.xlu1 %769 }
 0x457   : > { %v773_v50 = vsub.f32 %v742_v25, %v770_v49 }
 0x459   : > { %v2134_v51 = vpop.eup %2133  ;;  %v776_v54 = vmul.f32 1.442695, %v773_v50 }
 0x45a   : > { %v782_v55 = vsel %vm747_vm13, %v2134_v51, 0.0  ;;  %v806_v56 = vpack.c.bf16 %v2134_v51, %v2134_v51 }
 0x45b   : > { %2135 = vpow2.f32 %v776_v54  ;;  %783 = vadd.xlane.f32.xlu0 %v782_v55 }
 0x45c   : > { %1973 = vmatmul.msk.bf16.vlgmr.msra.gmra.mxu2 %vm747_vm13, %v806_v56 }
 0x461   : > { %v2136_v2 = vpop.eup %2135 }
 0x462   : > { %v785_v3 = vsel %vm747_vm13, %v2136_v2, 0.0  ;;  %v807_v5 = vpack.c.bf16 %v2136_v2, %v2136_v2 }
 0x463   : > { %786 = vadd.xlane.f32.xlu1 %v785_v3 }
 0x464   : > { %1974 = vmatmul.msk.bf16.vlgmr.msra.gmra.mxu3 %vm747_vm13, %v807_v5 }
 0x4ce   : > { %v784_v8 = vpop.xlane.xlu0 %783 }
 0x4cf   : > { %v788_v9 = vadd.f32 %v784_v8, %v780_v7 }
 0x4d1   : > { %790 = vst.msk [vmem:[#allocation5] sm:$0xff] %vm664_vm0, %v788_v9 }
 0x4d6   : > { %v787_v14 = vpop.xlane.xlu1 %786 }
 0x4d7   : > { %v789_v15 = vadd.f32 %v787_v14, %v781_v12 }
 0x4d8   :  { %v855_v29 = vld [vmem:[#allocation5] sm:$0xff] (%p687_p0) }
 0x4d9   : > { %791 = vst.msk [vmem:[#allocation5 + $0x8] sm:$0xff] %vm664_vm0, %v789_v15 }
 0x4da   :  { %1267 = vst.msk [vmem:[#allocation5] sm:$0xff] (%p687_p0), %vm664_vm0, %v2591_v1 }
 0x4df   : > { %v824_v19 = vpop.f32.mrf.mxu2 }
 0x4e0   : > { %v847_v20 = vadd.f32 %v824_v19, %v804_v18  ;;  %v856_v28 = vld [vmem:[#allocation5 + $0x8] sm:$0xff] (%p687_p0) }
 0x4e1   :  { %2149 = vrcp.f32 (%p687_p0), %v856_v28  ;;  %1268 = vst.msk [vmem:[#allocation5 + $0x8] sm:$0xff] (%p687_p0), %vm664_vm0, %v2591_v1 }
 0x4e2   : > { %849 = vst.msk [vmem:[#allocation6] sm:$0xff] %vm669_vm1, %v847_v20  ;;  %2151 = vrcp.f32 (%p687_p0), %v855_v29 }
 0x4e7   : > { %v826_v24 = vpop.f32.mrf.mxu2  ;;  %v843_v25 = vpop.f32.mrf.mxu3 }
 0x4e8   : > { %v848_v26 = vadd.f32 %v843_v25, %v805_v23  ;;  %v2150_v58 = vpop.eup (%p687_p0), %2149 }
 0x4e9   :  { %v2152_v59 = vpop.eup (%p687_p0), %2151  ;;  %866 = vperm.xlu1 (%p687_p0), %2138, %v2150_v58   ;;  %v853_v63 = vld [vmem:[#allocation6] sm:$0xff] (%p687_p0) }
 0x4ea   : > { %850 = vst.msk [vmem:[#allocation6 + $0x8] sm:$0xff] %vm669_vm1, %v848_v26  ;;  %861 = vperm.xlu0 (%p687_p0), %2137, %v2152_v59  }
 0x4eb   :  { %690 = sbr.rel (!%p687_p0) target bundleno = 728 (0x2d8), region = 166  ;;  %1269 = vst.msk [vmem:[#allocation6] sm:$0xff] (%p687_p0), %vm669_vm1, %v2591_v1 }
 0x4ef   : > { %v845_v27 = vpop.f32.mrf.mxu3 }
 0x4f1   :  { %v854_v62 = vld [vmem:[#allocation6 + $0x8] sm:$0xff] }
 0x4f2   :  { %1063 = vrot.lane.b32.xlu0 %v2794_v60, %s2593_s21  ;;  %1270 = vst.msk [vmem:[#allocation6 + $0x8] sm:$0xff] %vm669_vm1, %v2591_v1 }
 0x55b   :  { %v867_v31 = vpop.permute.xlu1 %866 }
 0x55c   :  { %v870_v32 = vmul.f32 %v867_v31, %v854_v62  ;;  %v862_v33 = vpop.permute.xlu0 %861  ;;  %v970_v62 = vrot.slane %v2797_v61, 4 }
 0x55d   :  { %v869_v34 = vmul.f32 %v862_v33, %v853_v63 }
 0x55e   :  { %v881_v0 = vrot.slane %v870_v32, 4  ;;  %v886_v35 = vperm.slane %v870_v32, %v2801_v4  ;;  %v971_v33 = vsel %vm368_vm10, 0.0, %v970_v62 }
 0x55f   :  { %v871_v36 = vrot.slane %v869_v34, 4  ;;  %v876_v37 = vperm.slane %v869_v34, %v2801_v4 }
 0x560   :  { %v882_v38 = vsel %vm368_vm10, 0.0, %v881_v0  ;;  %v891_v39 = vrot.slane %v886_v35, 4 }
 0x561   :  { %v890_v40 = vperm.slane %v882_v38, %v2801_v4  ;;  %v872_v41 = vsel %vm368_vm10, 0.0, %v871_v36  ;;  %v893_v42 = vrot.slane %v876_v37, 4  ;;  %v979_v38 = vperm.slane %v971_v33, %v2801_v4 }
 0x562   :  { %v880_v1 = vperm.slane %v872_v41, %v2801_v4  ;;  %v892_v43 = vsel %vm368_vm10, %v891_v39, %v876_v37  ;;  %v975_v37 = vperm.slane %v2797_v61, %v2801_v4 }
 0x563   :  { %v903_v44 = vrot.slane %v890_v40, 4  ;;  %v894_v45 = vsel %vm368_vm10, %v886_v35, %v893_v42  ;;  %v898_v46 = vperm.slane %v892_v43, %v2806_v11 }
 0x564   :  { %v902_v47 = vperm.slane %v894_v45, %v2806_v11  ;;  %v905_v48 = vrot.slane %v880_v1, 4  ;;  %v1064_v49 = vpop.permute.xlu0 %1063 }
 0x565   :  { %v904_v50 = vsel %vm368_vm10, %v903_v44, %v880_v1  ;;  %v2144_v51 = vpack.i.bf16 %v1064_v49, %v2794_v60  ;;  %v915_v56 = vrot.slane %v898_v46, 4 }
 0x566   :  { %v906_v54 = vsel %vm368_vm10, %v890_v40, %v905_v48  ;;  %v910_v55 = vperm.slane %v904_v50, %v2806_v11  ;;  %v917_v2 = vrot.slane %v902_v47, 4  ;;  %v992_v50 = vrot.slane %v975_v37, 4 }
 0x567   :  { %v914_v3 = vperm.slane %v906_v54, %v2806_v11  ;;  %2145 = vrot.lane.b32.xlu2 %v2144_v51, %s2581_s14  ;;  %2140 = vrot.lane.b32.xlu1 %v2144_v51, %s2594_s1  ;;  %v916_v9 = vsel %vm368_vm10, 0.0, %v915_v56  ;;  %s2600_s14 = smov 16   ;;  %v1004_v51 = vrot.slane %v979_v38, 4 }
 0x568   :  { %v918_v5 = vsel %vm368_vm10, 0.0, %v917_v2  ;;  %v919_v6 = vrot.slane %v910_v55, 4  ;;  %v923_v60 = vsel %vm368_vm10, %v917_v2, %v898_v46 }
 0x569   :  { %v921_v7 = vrot.slane %v914_v3, 4  ;;  %v928_v8 = vrot.slane %v918_v5, 4  ;;  %v927_v17 = vperm.slane %v923_v60, %v2801_v4 }
 0x56a   :  { %v920_v16 = vsel %vm368_vm10, 0.0, %v919_v6 }
 0x56b   :  { %v929_v10 = vsel %vm368_vm10, %v928_v8, %v916_v9  ;;  %v922_v12 = vsel %vm368_vm10, 0.0, %v921_v7  ;;  %v934_v18 = vsel %vm368_vm10, %v921_v7, %v910_v55 }
 0x56c   :  { %v933_v14 = vperm.slane %v929_v10, %v2801_v4  ;;  %v939_v15 = vrot.slane %v922_v12, 4  ;;  %v938_v23 = vperm.slane %v934_v18, %v2801_v4 }
 0x56e   :  { %v940_v19 = vsel %vm368_vm10, %v939_v15, %v920_v16  ;;  %v945_v20 = vrot.slane %v933_v14, 4 }
 0x56f   :  { %v944_v21 = vperm.slane %v940_v19, %v2801_v4  ;;  %967 = vrot.lane.b32.xlu2 %v2797_v61, %s2593_s21 }
 0x570   :  { %v946_v22 = vsel %vm368_vm10, %v945_v20, %v927_v17 }
 0x571   :  { %v950_v24 = vperm.slane %v946_v22, %v2806_v11  ;;  %v951_v25 = vrot.slane %v944_v21, 4 }
 0x573   :  { %v952_v26 = vsel %vm368_vm10, %v951_v25, %v938_v23  ;;  %v959_v27 = vrot.slane %v950_v24, 4 }
 0x574   :  { %v956_v28 = vperm.slane %v952_v26, %v2806_v11 }
 0x576   :  { %v960_v29 = vsel %vm368_vm10, %v956_v28, %v959_v27  ;;  %v957_v58 = vrot.slane %v956_v28, 4 }
 0x577   :  { %962 = vrot.lane.b32.xlu0 %v960_v29, %s2600_s14 }
 0x578   :  { %v3011_v59 = vsel %vm368_vm10, %v957_v58, %v950_v24 }
 0x5c1   :  { %v2146_v63 = vpop.permute.xlu2 %2145 }
 0x5c2   :  { %v2148_v31 = vunpack.i.h.bf16 %v2146_v63  ;;  %v2147_v32 = vunpack.i.l.bf16 %v2146_v63 }
 0x5c4   :  { %v1181_v34 = vrot.slane %v2148_v31, 4  ;;  %v1186_v0 = vperm.slane %v2148_v31, %v2801_v4  ;;  %v1171_v35 = vrot.slane %v2147_v32, 4  ;;  %v1176_v36 = vperm.slane %v2147_v32, %v2801_v4 }
 0x5c6   :  { %v1182_v39 = vsel %vm368_vm10, 0.0, %v1181_v34  ;;  %v1191_v40 = vrot.slane %v1186_v0, 4  ;;  %v1172_v41 = vsel %vm368_vm10, 0.0, %v1171_v35  ;;  %v1193_v42 = vrot.slane %v1176_v36, 4 }
 0x5c7   :  { %v1190_v1 = vperm.slane %v1182_v39, %v2801_v4  ;;  %v1180_v43 = vperm.slane %v1172_v41, %v2801_v4 }
 0x5c8   :  { %v1192_v44 = vsel %vm368_vm10, %v1191_v40, %v1176_v36  ;;  %v1194_v45 = vsel %vm368_vm10, %v1186_v0, %v1193_v42 }
 0x5c9   :  { %v1203_v46 = vrot.slane %v1190_v1, 4  ;;  %v1198_v47 = vperm.slane %v1192_v44, %v2806_v11  ;;  %v1202_v61 = vperm.slane %v1194_v45, %v2806_v11  ;;  %v1205_v48 = vrot.slane %v1180_v43, 4  ;;  %v968_v49 = vpop.permute.xlu2 %967 }
 0x5ca   :  { %v980_v54 = vrot.slane %v968_v49, 4  ;;  %v985_v55 = vperm.slane %v968_v49, %v2801_v4 }
 0x5cb   :  { %v1204_v56 = vsel %vm368_vm10, %v1203_v46, %v1180_v43  ;;  %v1206_v2 = vsel %vm368_vm10, %v1190_v1, %v1205_v48  ;;  %v1215_v3 = vrot.slane %v1198_v47, 4  ;;  %v1217_v5 = vrot.slane %v1202_v61, 4 }
 0x5cc   :  { %v1210_v6 = vperm.slane %v1204_v56, %v2806_v11  ;;  %v1214_v7 = vperm.slane %v1206_v2, %v2806_v11  ;;  %v981_v8 = vsel %vm368_vm10, 0.0, %v980_v54  ;;  %v990_v9 = vrot.slane %v985_v55, 4 }
 0x5cd   :  { %v1218_v60 = vsel %vm368_vm10, 0.0, %v1217_v5  ;;  %v1223_v10 = vsel %vm368_vm10, %v1217_v5, %v1198_v47  ;;  %v989_v12 = vperm.slane %v981_v8, %v2801_v4  ;;  %v1216_v14 = vsel %vm368_vm10, 0.0, %v1215_v3 }
 0x5ce   :  { %v1219_v15 = vrot.slane %v1210_v6, 4  ;;  %v1221_v16 = vrot.slane %v1214_v7, 4  ;;  %v1228_v17 = vrot.slane %v1218_v60, 4  ;;  %v991_v18 = vsel %vm368_vm10, %v990_v9, %v975_v37 }
 0x5cf   :  { %v993_v19 = vsel %vm368_vm10, %v985_v55, %v992_v50  ;;  %v1002_v20 = vrot.slane %v989_v12, 4  ;;  %v1005_v21 = vsel %vm368_vm10, %v989_v12, %v1004_v51  ;;  %v1227_v23 = vperm.slane %v1223_v10, %v2801_v4 }
 0x5d0   :  { %v1222_v22 = vsel %vm368_vm10, 0.0, %v1221_v16  ;;  %v1229_v24 = vsel %vm368_vm10, %v1228_v17, %v1216_v14  ;;  %v1220_v25 = vsel %vm368_vm10, 0.0, %v1219_v15  ;;  %v997_v28 = vperm.slane %v991_v18, %v2806_v11 }
 0x5d1   :  { %v1233_v26 = vperm.slane %v1229_v24, %v2801_v4  ;;  %v1239_v27 = vrot.slane %v1222_v22, 4  ;;  %v1234_v29 = vsel %vm368_vm10, %v1221_v16, %v1210_v6  ;;  %v1001_v58 = vperm.slane %v993_v19, %v2806_v11 }
 0x5d2   :  { %v1003_v62 = vsel %vm368_vm10, %v1002_v20, %v979_v38  ;;  %v1013_v63 = vperm.slane %v1005_v21, %v2806_v11  ;;  %v1014_v34 = vrot.slane %v997_v28, 4  ;;  %v1238_v37 = vperm.slane %v1234_v29, %v2801_v4 }
 0x5d3   :  { %v1240_v31 = vsel %vm368_vm10, %v1239_v27, %v1220_v25  ;;  %v1245_v32 = vrot.slane %v1233_v26, 4  ;;  %v1009_v33 = vperm.slane %v1003_v62, %v2806_v11  ;;  %v1016_v35 = vrot.slane %v1001_v58, 4 }
 0x5d4   :  { %v1244_v0 = vperm.slane %v1240_v31, %v2801_v4  ;;  %v1020_v36 = vrot.slane %v1013_v63, 4  ;;  %v1015_v40 = vsel %vm368_vm10, 0.0, %v1014_v34 }
 0x5d5   :  { %v1246_v39 = vsel %vm368_vm10, %v1245_v32, %v1227_v23  ;;  %v1018_v41 = vrot.slane %v1009_v33, 4  ;;  %v1017_v1 = vsel %vm368_vm10, 0.0, %v1016_v35  ;;  %v1022_v44 = vsel %vm368_vm10, %v1016_v35, %v997_v28 }
 0x5d6   :  { %v1250_v38 = vperm.slane %v1246_v39, %v2806_v11  ;;  %v1251_v42 = vrot.slane %v1244_v0, 4  ;;  %v1021_v43 = vsel %vm368_vm10, 0.0, %v1020_v36  ;;  %v1027_v45 = vrot.slane %v1017_v1, 4 }
 0x5d7   :  { %v1019_v61 = vsel %vm368_vm10, 0.0, %v1018_v41  ;;  %v1033_v48 = vsel %vm368_vm10, %v1020_v36, %v1009_v33  ;;  %v1038_v51 = vrot.slane %v1021_v43, 4  ;;  %v1026_v55 = vperm.slane %v1022_v44, %v2801_v4 }
 0x5d8   :  { %v1252_v46 = vsel %vm368_vm10, %v1251_v42, %v1238_v37  ;;  %v1259_v47 = vrot.slane %v1250_v38, 4  ;;  %v1028_v50 = vsel %vm368_vm10, %v1027_v45, %v1015_v40  ;;  %v1037_v7 = vperm.slane %v1033_v48, %v2801_v4 }
 0x5d9   :  { %v1256_v49 = vperm.slane %v1252_v46, %v2806_v11  ;;  %v2141_v54 = vpop.permute.xlu1 %2140  ;;  %v1032_v56 = vperm.slane %v1028_v50, %v2801_v4  ;;  %v1039_v8 = vsel %vm368_vm10, %v1038_v51, %v1019_v61 }
 0x5da   :  { %v2143_v2 = vunpack.i.h.bf16 %v2141_v54  ;;  %v2142_v3 = vunpack.i.l.bf16 %v2141_v54  ;;  %v1043_v60 = vperm.slane %v1039_v8, %v2801_v4 }
 0x5db   :  { %v1257_v5 = vrot.slane %v1256_v49, 4  ;;  %v1260_v6 = vsel %vm368_vm10, %v1256_v49, %v1259_v47  ;;  %v1044_v10 = vrot.slane %v1032_v56, 4 }
 0x5dc   :  { %v1262_v9 = vpack.c.bf16 %v1260_v6, %v1260_v6  ;;  %v1081_v12 = vrot.slane %v2143_v2, 4  ;;  %v1086_v15 = vperm.slane %v2143_v2, %v2801_v4  ;;  %v1071_v16 = vrot.slane %v2142_v3, 4 }
 0x5dd   :  { %v1258_v14 = vsel %vm368_vm10, %v1257_v5, %v1250_v38  ;;  %v1076_v17 = vperm.slane %v2142_v3, %v2801_v4  ;;  %v1045_v19 = vsel %vm368_vm10, %v1044_v10, %v1026_v55  ;;  %v1050_v20 = vrot.slane %v1043_v60, 4 }
 0x5de   :  { %v1261_v18 = vpack.c.bf16 %v1258_v14, %v1258_v14  ;;  %1264 = vst.msk [vmem:[#allocation3 + $0x4] sm:$0xf] %vm561_vm11, %v1262_v9  ;;  %v1082_v21 = vsel %vm368_vm10, 0.0, %v1081_v12  ;;  %v1049_v22 = vperm.slane %v1045_v19, %v2806_v11  ;;  %v1091_v24 = vrot.slane %v1086_v15, 4 }
 0x5df   :  { %v1090_v23 = vperm.slane %v1082_v21, %v2801_v4  ;;  %v1072_v25 = vsel %vm368_vm10, 0.0, %v1071_v16  ;;  %v1051_v26 = vsel %vm368_vm10, %v1050_v20, %v1037_v7  ;;  %v1093_v28 = vrot.slane %v1076_v17, 4 }
 0x5e0   :  { %1263 = vst.msk [vmem:[#allocation3] sm:$0xf] %vm561_vm11, %v1261_v18  ;;  %v1080_v27 = vperm.slane %v1072_v25, %v2801_v4  ;;  %v1055_v29 = vperm.slane %v1051_v26, %v2806_v11  ;;  %v1058_v58 = vrot.slane %v1049_v22, 4  ;;  %v1092_v63 = vsel %vm368_vm10, %v1091_v24, %v1076_v17 }
 0x5e1   :  { %v1103_v62 = vrot.slane %v1090_v23, 4  ;;  %v1094_v31 = vsel %vm368_vm10, %v1086_v15, %v1093_v28  ;;  %v1098_v32 = vperm.slane %v1092_v63, %v2806_v11 }
 0x5e2   :  { %v1105_v33 = vrot.slane %v1080_v27, 4  ;;  %v1056_v34 = vrot.slane %v1055_v29, 4  ;;  %v3091_v0 = vsel %vm368_vm10, %v1055_v29, %v1058_v58  ;;  %v1102_v35 = vperm.slane %v1094_v31, %v2806_v11 }
 0x5e3   :  { %v1104_v36 = vsel %vm368_vm10, %v1103_v62, %v1080_v27  ;;  %v1061_v37 = vpack.c.bf16 %v3091_v0, %v3091_v0  ;;  %v1115_v42 = vrot.slane %v1098_v32, 4 }
 0x5e4   :  { %v1106_v39 = vsel %vm368_vm10, %v1090_v23, %v1105_v33  ;;  %v1110_v40 = vperm.slane %v1104_v36, %v2806_v11  ;;  %v3100_v41 = vsel %vm368_vm10, %v1056_v34, %v1049_v22  ;;  %v1117_v1 = vrot.slane %v1102_v35, 4 }
 0x5e5   :  { %v1114_v38 = vperm.slane %v1106_v39, %v2806_v11  ;;  %v1060_v43 = vpack.c.bf16 %v3100_v41, %v3100_v41  ;;  %v1116_v61 = vsel %vm368_vm10, 0.0, %v1115_v42 }
 0x5e6   :  { %v1118_v44 = vsel %vm368_vm10, 0.0, %v1117_v1  ;;  %v1119_v45 = vrot.slane %v1110_v40, 4  ;;  %v1123_v50 = vsel %vm368_vm10, %v1117_v1, %v1098_v32 }
 0x5e7   :  { %v1121_v46 = vrot.slane %v1114_v38, 4  ;;  %v1128_v47 = vrot.slane %v1118_v44, 4  ;;  %v1127_v6 = vperm.slane %v1123_v50, %v2801_v4 }
 0x5e8   :  { %v1120_v56 = vsel %vm368_vm10, 0.0, %v1119_v45 }
 0x5e9   :  { %v1122_v48 = vsel %vm368_vm10, 0.0, %v1121_v46  ;;  %v963_v49 = vpop.permute.xlu0 %962  ;;  %v1129_v51 = vsel %vm368_vm10, %v1128_v47, %v1116_v61  ;;  %v1134_v3 = vsel %vm368_vm10, %v1121_v46, %v1110_v40 }
 0x5ea   :  { %v1139_v54 = vrot.slane %v1122_v48, 4  ;;  %v3112_v55 = vsel %vm669_vm1, %v3011_v59, %v963_v49  ;;  %v1133_v2 = vperm.slane %v1129_v51, %v2801_v4  ;;  %v1138_v9 = vperm.slane %v1134_v3, %v2801_v4 }
 0x5ec   :  { %v1140_v5 = vsel %vm368_vm10, %v1139_v54, %v1120_v56  ;;  %v1145_v8 = vrot.slane %v1133_v2, 4 }
 0x5ed   :  { %v1144_v7 = vperm.slane %v1140_v5, %v2801_v4 }
 0x5ee   :  { %v1146_v60 = vsel %vm368_vm10, %v1145_v8, %v1127_v6 }
 0x5ef   :  { %v1151_v10 = vrot.slane %v1144_v7, 4  ;;  %v1150_v59 = vperm.slane %v1146_v60, %v2806_v11 }
 0x5f1   :  { %v1152_v12 = vsel %vm368_vm10, %v1151_v10, %v1138_v9  ;;  %v1159_v15 = vrot.slane %v1150_v59, 4 }
 0x5f2   :  { %v1156_v14 = vperm.slane %v1152_v12, %v2806_v11 }
 0x5f4   :  { %v1157_v16 = vrot.slane %v1156_v14, 4  ;;  %v1160_v17 = vsel %vm368_vm10, %v1156_v14, %v1159_v15 }
 0x5f5   :  { %v1162_v18 = vpack.c.bf16 %v1160_v17, %v1160_v17 }
 0x5f6   :  { %v1158_v19 = vsel %vm368_vm10, %v1157_v16, %v1150_v59 }
 0x5f7   :  { %v1161_v20 = vpack.c.bf16 %v1158_v19, %v1158_v19  ;;  %1164 = vst.msk [vmem:[#allocation2 + $0x4] sm:$0xf] %vm561_vm11, %v1162_v18 }
 0x5f9   :  { %1163 = vst.msk [vmem:[#allocation2] sm:$0xf] %vm561_vm11, %v1161_v20 }
 0x5fa LB: > { %s1983_s26 = sshll.u32 %s2572_s5, 3  ;;  %v1303_v27 = vstv %s3013_s3  ;;  %v2601_v28 = vmov -1e+09   ;;  %v2602_v36 = vmov 0   ;;  %v1344_v39 = vld [vmem:[#allocation4] sm:$0xff]  ;;  %v1345_v44 = vld [vmem:[#allocation4 + $0x8] sm:$0xff]  ;;  %s2572_s5 = sphi %s3129_s5, %s1287_s5  }
 0x5fb   : > { %s3135_s9 = sshra.s32 %s1983_s26, 3  ;;  %v1301_v25 = vstv %s1983_s26  ;;  %2153 = vset.pattern.permute.xlu1 %v2602_v36  ;;  %2154 = vset.pattern.permute.xlu2 %v2602_v36  ;;  %v1377_v15 = vld [vmem:[#allocation5] sm:$0xff]  ;;  %v1378_v19 = vld [vmem:[#allocation5 + $0x8] sm:$0xff]  ;;  %s1287_s5 = sadd.s32 1, %s2572_s5  }
 0x5fc   : > { %s1984_s16 = sshll.u32 %s3135_s9, 2  ;;  %v1302_v26 = vadd.s32 %v1301_v25, %v2875_v57  ;;  %2155 = vset.pattern.permute.xlu0 %v2602_v36  ;;  %p1286_p1 = scmp.ge.s32.totalorder %s1287_s5, 1 }
 0x5fd   : > { %s1294_s27 = scalar_lea.vmem [#allocation2], %s1984_s16  ;;  %s1298_s28 = scalar_lea.vmem [#allocation3], %s1984_s16  ;;  %2164 = vset.pattern.permute.xlu0 (%p1286_p1), %v2599_v30  ;;  %vm1754_vm7 = vcmask (%p1286_p1), 523264  }
 0x5fe   : > { %vm1304_vm15 = vcmp.lt.s32.totalorder %v1302_v26, %v1303_v27  ;;  %v1299_v50 = vld [vmem:[%s1298_s28] sm:$0xf]  ;;  %v1300_v54 = vld [vmem:[%s1298_s28 + $0x4] sm:$0xf]  ;;  %s3299_s11 = sld [smem:[#allocation45_spill]] (%p1286_p1)  ;;  %s2603_s26 = smov (%p1286_p1), [#allocation30]  }
 0x5ff   : > { %v1305_v29 = vsel %vm1304_vm15, 0.0, %v2601_v28  ;;  %v1412_v51 = vsel %vm811_vm14, %v1299_v50, 0  ;;  %v1431_v56 = vsel %vm811_vm14, %v1300_v54, 0  ;;  %v1392_v28 = vld [vmem:[#allocation6 + $0x8] sm:$0xff]  ;;  %vm1833_vm14 = vcmask (%p1286_p1), 1040384   ;;  %s1916_s9 = sshll.u32 (%p1286_p1), %s2603_s26, 4  ;;  %s1917_s9 = int_to_ptr.vmem [resolvable:$true] %s1916_s9 }
 0x600   : > { %v1295_v21 = vld [vmem:[%s1294_s27] sm:$0xf]  ;;  %v1296_v22 = vld [vmem:[%s1294_s27 + $0x4] sm:$0xf]  ;;  %1421 = vmatpush.bf16.msra.mxu2 %v1412_v51  ;;  %1440 = vmatpush.bf16.msra.mxu3 %v1431_v56 }
 0x601   : > { %v1310_v23 = vsel %vm669_vm1, %v1295_v21, 0  ;;  %v1329_v24 = vsel %vm669_vm1, %v1296_v22, 0 }
 0x602   : > { %1319 = vmatpush.bf16.xpose.msra.mxu0 %v1310_v23  ;;  %1338 = vmatpush.bf16.xpose.msra.mxu1 %v1329_v24  ;;  %v1391_v24 = vld [vmem:[#allocation6] sm:$0xff] }
 0x609   : > { %1986 = vmatmul.msk.bf16.vlgmr.msra.gmra.mxu0 %vm669_vm1, %v1060_v43  ;;  %1987 = vmatmul.msk.bf16.vlgmr.msra.gmra.mxu1 %vm669_vm1, %v1061_v37 }
 0x686   : > { %v1321_v58 = vpop.f32.mrf.mxu0  ;;  %v1340_v62 = vpop.f32.mrf.mxu1 }
 0x687   : > { %v1322_v63 = vadd.f32 %v1321_v58, %v1305_v29  ;;  %v1341_v32 = vadd.f32 %v1340_v62, %v1305_v29 }
 0x689   : > { %v1347_v31 = vsel %vm747_vm13, %v1322_v63, -inf  ;;  %v1350_v35 = vsel %vm747_vm13, %v1341_v32, -inf }
 0x68a   : > { %1348 = vmax.xlane.f32.xlu0 %v1347_v31 }
 0x68e   : > { %v1323_v33 = vpop.f32.mrf.mxu0  ;;  %v1342_v34 = vpop.f32.mrf.mxu1 }
 0x692   : > { %1351 = vmax.xlane.f32.xlu0 %v1350_v35 }
 0x6fd   : > { %v1349_v40 = vpop.xlane.xlu0 %1348 }
 0x6fe   : > { %v1353_v38 = vmax.f32 %v1344_v39, %v1349_v40 }
 0x700   : > { %v1355_v42 = vsub.f32 %v1344_v39, %v1353_v38  ;;  %1450 = vst.msk [vmem:[#allocation4] sm:$0xff] %vm664_vm0, %v1353_v38  ;;  %1363 = vperm.xlu1 %2153, %v1353_v38  }
 0x702   : > { %v1357_v1 = vmul.f32 1.442695, %v1355_v42  ;;  %v2046_v42 = vld [vmem:[%s3271_s6 + $0x8] sm:$0xff] (%p1286_p1) }
 0x703   :  { %1595 = vmatpush.bf16.msra.mxu0 (%p1286_p1), %v2046_v42 }
 0x704   : > { %2156 = vpow2.f32 %v1357_v1 }
 0x705   : > { %v1352_v45 = vpop.xlane.xlu0 %1351 }
 0x706   : > { %v1354_v46 = vmax.f32 %v1345_v44, %v1352_v45 }
 0x708   : > { %v1356_v47 = vsub.f32 %v1345_v44, %v1354_v46  ;;  %1451 = vst.msk [vmem:[#allocation4 + $0x8] sm:$0xff] %vm664_vm0, %v1354_v46  ;;  %1368 = vperm.xlu1 %2153, %v1354_v46  }
 0x70a   : > { %v2157_v61 = vpop.eup %2156  ;;  %v1359_v48 = vmul.f32 1.442695, %v1356_v47 }
 0x70b   : > { %1395 = vperm.xlu2 %2154, %v2157_v61   ;;  %v1379_v16 = vmul.f32 %v2157_v61, %v1377_v15 }
 0x70c   : > { %2158 = vpow2.f32 %v1359_v48 }
 0x712   : > { %v2159_v49 = vpop.eup %2158 }
 0x713   : > { %1400 = vperm.xlu2 %2154, %v2159_v49   ;;  %v1380_v20 = vmul.f32 %v2159_v49, %v1378_v19 }
 0x765   : > { %v1396_v23 = vpop.permute.xlu2 %1395 }
 0x766   : > { %v1403_v25 = vmul.f32 %v1396_v23, %v1391_v24 }
 0x76d   : > { %v1401_v29 = vpop.permute.xlu2 %1400 }
 0x76e   : > { %v1404_v58 = vmul.f32 %v1401_v29, %v1392_v28 }
 0x772   : > { %v1364_v2 = vpop.permute.xlu1 %1363 }
 0x773   : > { %v1371_v3 = vsub.f32 %v1322_v63, %v1364_v2 }
 0x775   : > { %v1373_v5 = vmul.f32 1.442695, %v1371_v3 }
 0x777   : > { %2160 = vpow2.f32 %v1373_v5 }
 0x77a   : > { %v1369_v6 = vpop.permute.xlu1 %1368 }
 0x77b   : > { %v1372_v7 = vsub.f32 %v1341_v32, %v1369_v6 }
 0x77d   : > { %v2161_v8 = vpop.eup %2160  ;;  %v1375_v9 = vmul.f32 1.442695, %v1372_v7 }
 0x77e   : > { %v1381_v60 = vsel %vm747_vm13, %v2161_v8, 0.0  ;;  %v1405_v10 = vpack.c.bf16 %v2161_v8, %v2161_v8 }
 0x77f   : > { %2162 = vpow2.f32 %v1375_v9  ;;  %1382 = vadd.xlane.f32.xlu0 %v1381_v60 }
 0x780   : > { %1988 = vmatmul.msk.bf16.vlgmr.msra.gmra.mxu2 %vm747_vm13, %v1405_v10 }
 0x785   : > { %v2163_v59 = vpop.eup %2162 }
 0x786   : > { %v1384_v12 = vsel %vm747_vm13, %v2163_v59, 0.0  ;;  %v1406_v14 = vpack.c.bf16 %v2163_v59, %v2163_v59 }
 0x787   : > { %1385 = vadd.xlane.f32.xlu1 %v1384_v12 }
 0x788   : > { %1989 = vmatmul.msk.bf16.vlgmr.msra.gmra.mxu3 %vm747_vm13, %v1406_v14 }
 0x7f2   : > { %v1383_v17 = vpop.xlane.xlu0 %1382 }
 0x7f3   : > { %v1387_v18 = vadd.f32 %v1383_v17, %v1379_v16 }
 0x7f5   : > { %1389 = vst.msk [vmem:[#allocation5] sm:$0xff] %vm664_vm0, %v1387_v18 }
 0x7fa   : > { %v1386_v21 = vpop.xlane.xlu1 %1385 }
 0x7fb   : > { %v1388_v22 = vadd.f32 %v1386_v21, %v1380_v20 }
 0x7fc   :  { %v1454_v33 = vld [vmem:[#allocation5] sm:$0xff] (%p1286_p1) }
 0x7fd   : > { %1390 = vst.msk [vmem:[#allocation5 + $0x8] sm:$0xff] %vm664_vm0, %v1388_v22  ;;  %2174 = vrcp.f32 (%p1286_p1), %v1454_v33 }
 0x803   : > { %v1423_v26 = vpop.f32.mrf.mxu2  ;;  %v2175_v35 = vpop.eup (%p1286_p1), %2174 }
 0x804   : > { %v1446_v27 = vadd.f32 %v1423_v26, %v1403_v25  ;;  %v1455_v34 = vld [vmem:[#allocation5 + $0x8] sm:$0xff] (%p1286_p1)  ;;  %1460 = vperm.xlu0 (%p1286_p1), %2164, %v2175_v35  }
 0x805   :  { %2176 = vrcp.f32 (%p1286_p1), %v1455_v34  ;;  %v2045_v34 = vld [vmem:[%s3271_s6] sm:$0xff] (%p1286_p1) }
 0x806   : > { %1448 = vst.msk [vmem:[#allocation6] sm:$0xff] %vm669_vm1, %v1446_v27  ;;  %1596 = vmatpush.bf16.msra.mxu0 (%p1286_p1), %v2045_v34 }
 0x80b   : > { %v1425_v62 = vpop.f32.mrf.mxu2  ;;  %v1442_v63 = vpop.f32.mrf.mxu3 }
 0x80c   : > { %v1447_v31 = vadd.f32 %v1442_v63, %v1404_v58  ;;  %v2177_v36 = vpop.eup (%p1286_p1), %2176 }
 0x80d   :  { %1465 = vperm.xlu0 (%p1286_p1), %2164, %v2177_v36   ;;  %v1452_v39 = vld [vmem:[#allocation6] sm:$0xff] (%p1286_p1) }
 0x80e   : > { %1449 = vst.msk [vmem:[#allocation6 + $0x8] sm:$0xff] %vm669_vm1, %v1447_v31 }
 0x80f   :  { %1289 = sbr.rel (!%p1286_p1) target bundleno = 1530 (0x5fa), region = 177 }
 0x813   : > { %v1444_v32 = vpop.f32.mrf.mxu3 }
 0x815   :  { %v1453_v44 = vld [vmem:[#allocation6 + $0x8] sm:$0xff] }
 0x876   :  { %v1461_v40 = vpop.permute.xlu0 %1460 }
 0x877   :  { %v1468_v38 = vmul.f32 %v1461_v40, %v1452_v39 }
 0x879   :  { %v1470_v1 = vrot.slane %v1468_v38, 4  ;;  %v1475_v30 = vperm.slane %v1468_v38, %v2801_v4 }
 0x87b   :  { %v1471_v57 = vsel %vm368_vm10, 0.0, %v1470_v1  ;;  %v1492_v43 = vrot.slane %v1475_v30, 4 }
 0x87c   :  { %v1479_v41 = vperm.slane %v1471_v57, %v2801_v4 }
 0x87e   :  { %v1504_v49 = vrot.slane %v1479_v41, 4 }
 0x87f   :  { %v1466_v0 = vpop.permute.xlu0 %1465 }
 0x880   :  { %v1469_v37 = vmul.f32 %v1466_v0, %v1453_v44 }
 0x882   :  { %v1480_v45 = vrot.slane %v1469_v37, 4  ;;  %v1485_v46 = vperm.slane %v1469_v37, %v2801_v4 }
 0x884   :  { %v1481_v47 = vsel %vm368_vm10, 0.0, %v1480_v45  ;;  %v1490_v61 = vrot.slane %v1485_v46, 4  ;;  %v1493_v48 = vsel %vm368_vm10, %v1485_v46, %v1492_v43 }
 0x885   :  { %v1489_v50 = vperm.slane %v1481_v47, %v2801_v4  ;;  %v1501_v51 = vperm.slane %v1493_v48, %v2806_v11 }
 0x886   :  { %v1491_v54 = vsel %vm368_vm10, %v1490_v61, %v1475_v30 }
 0x887   :  { %v1497_v56 = vperm.slane %v1491_v54, %v2806_v11  ;;  %v1502_v2 = vrot.slane %v1489_v50, 4  ;;  %v1505_v3 = vsel %vm368_vm10, %v1489_v50, %v1504_v49  ;;  %v1516_v5 = vrot.slane %v1501_v51, 4  ;;  %v2047_v49 = vld [vmem:[%s3275_s10] sm:$0xff] }
 0x888   :  { %v1513_v6 = vperm.slane %v1505_v3, %v2806_v11 }
 0x889   :  { %v1517_v7 = vsel %vm368_vm10, 0.0, %v1516_v5  ;;  %v1503_v8 = vsel %vm368_vm10, %v1502_v2, %v1479_v41  ;;  %v1514_v9 = vrot.slane %v1497_v56, 4  ;;  %v1522_v16 = vsel %vm368_vm10, %v1516_v5, %v1497_v56 }
 0x88a   :  { %v1520_v60 = vrot.slane %v1513_v6, 4  ;;  %v1527_v10 = vrot.slane %v1517_v7, 4  ;;  %v1509_v59 = vperm.slane %v1503_v8, %v2806_v11  ;;  %v1526_v21 = vperm.slane %v1522_v16, %v2801_v4 }
 0x88b   :  { %v1515_v12 = vsel %vm368_vm10, 0.0, %v1514_v9 }
 0x88c   :  { %v1518_v14 = vrot.slane %v1509_v59, 4  ;;  %v1521_v15 = vsel %vm368_vm10, 0.0, %v1520_v60  ;;  %v1528_v17 = vsel %vm368_vm10, %v1527_v10, %v1515_v12  ;;  %v1533_v22 = vsel %vm368_vm10, %v1520_v60, %v1509_v59 }
 0x88d   :  { %v1532_v18 = vperm.slane %v1528_v17, %v2801_v4  ;;  %v1538_v19 = vrot.slane %v1521_v15, 4  ;;  %v1537_v27 = vperm.slane %v1533_v22, %v2801_v4  ;;  %v2166_v17 = vld [vmem:[#allocation18] ss:$0 sm:$0xff]  ;;  %v2167_v22 = vld [vmem:[#allocation20] ss:$0 sm:$0xff] }
 0x88e   :  { %v1519_v20 = vsel %vm368_vm10, 0.0, %v1518_v14 }
 0x88f   :  { %v1539_v23 = vsel %vm368_vm10, %v1538_v19, %v1519_v20  ;;  %v1544_v24 = vrot.slane %v1532_v18, 4 }
 0x890   :  { %v1543_v25 = vperm.slane %v1539_v23, %v2801_v4 }
 0x891   :  { %v1545_v26 = vsel %vm368_vm10, %v1544_v24, %v1526_v21 }
 0x892   :  { %v1549_v28 = vperm.slane %v1545_v26, %v2806_v11  ;;  %v1550_v29 = vrot.slane %v1543_v25, 4 }
 0x894   :  { %v1551_v58 = vsel %vm368_vm10, %v1550_v29, %v1537_v27  ;;  %v1558_v62 = vrot.slane %v1549_v28, 4  ;;  %v2052_v27 = vld [vmem:[%s3299_s11 + $0x18] sm:$0xff]  ;;  %v2050_v29 = vld [vmem:[%s3299_s11 + $0x8] sm:$0xff] }
 0x895   :  { %v1555_v63 = vperm.slane %v1551_v58, %v2806_v11  ;;  %v2165_v11 = vld [vmem:[#allocation17] ss:$0 sm:$0xff]  ;;  %1762 = vmatpush.bf16.msra.mxu2 %v2052_v27  ;;  %v2049_v58 = vld [vmem:[%s3299_s11] sm:$0xff] }
 0x897   :  { %v1559_v31 = vsel %vm368_vm10, %v1555_v63, %v1558_v62  ;;  %v1556_v32 = vrot.slane %v1555_v63, 4  ;;  %v2168_v62 = vld [vmem:[#allocation21] ss:$0 sm:$0xff] }
 0x898   :  { %1561 = vrot.lane.b32.xlu1 %v1559_v31, %s2600_s14 }
 0x899   :  { %v1557_v33 = vsel %vm368_vm10, %v1556_v32, %v1549_v28  ;;  %v2051_v28 = vld [vmem:[%s3299_s11 + $0x10] sm:$0xff] }
 0x89a   :  { %1763 = vmatpush.bf16.msra.mxu2 %v2051_v28 }
 0x89e   :  { %1764 = vmatpush.bf16.msra.mxu2 %v2050_v29 }
 0x8a2   :  { %1765 = vmatpush.bf16.msra.mxu2 %v2049_v58 }
 0x90a   :  { %v1562_v4 = vpop.permute.xlu1 %1561 }
 0x90b   :  { %v1564_v35 = vsel %vm669_vm1, %v1557_v33, %v1562_v4 }
 0x90c   :  { %v1565_v36 = vpack.c.bf16 %v1564_v35, %v3112_v55 }
 0x90e   :  { %1998 = vmatmul.msk.bf16.vlgmr.msra.gmra.mxu0 %vm259_vm2, %v1565_v36 }
 0x98b   :  { %v1598_v39 = vpop.f32.mrf.mxu0 }
 0x98c   :  { %v1599_v40 = vadd.f32 %v2165_v11, %v1598_v39 }
 0x98e   :  { %v1603_v38 = vadd.f32 %v1599_v40, %v2785_v52 }
 0x990   :  { %v1607_v42 = vsel %vm259_vm2, %v1603_v38, 0.0 }
 0x991   :  { %1608 = vadd.xlane.f32.xlu1 %v1607_v42 }
 0x993   :  { %v1600_v1 = vpop.f32.mrf.mxu0 }
 0x994   :  { %v1601_v44 = vadd.f32 %v2165_v11, %v1600_v1 }
 0x996   :  { %v1604_v57 = vadd.f32 %v1601_v44, %v2787_v53  ;;  %v2048_v53 = vld [vmem:[%s3275_s10 + $0x8] sm:$0xff] }
 0x997   :  { %1691 = vmatpush.bf16.msra.mxu1 %v2048_v53 }
 0x998   :  { %v1610_v30 = vsel %vm259_vm2, %v1604_v57, 0.0 }
 0x999   :  { %1611 = vadd.xlane.f32.xlu2 %v1610_v30 }
 0x99b   :  { %1692 = vmatpush.bf16.msra.mxu1 %v2047_v49 }
 0xa04   :  { %v1609_v0 = vpop.xlane.xlu1 %1608 }
 0xa05   :  { %v1613_v55 = vmul.f32 %v1609_v0, %v2771_v13 }
 0xa07   :  { %v1615_v37 = vsub.f32 %v1603_v38, %v1613_v55 }
 0xa09   :  { %v1617_v41 = vmul.f32 %v1615_v37, %v1615_v37 }
 0xa0b   :  { %v1619_v43 = vsel %vm259_vm2, %v1617_v41, 0.0 }
 0xa0c   :  { %v1612_v45 = vpop.xlane.xlu2 %1611  ;;  %1620 = vadd.xlane.f32.xlu2 %v1619_v43 }
 0xa0d   :  { %v1614_v52 = vmul.f32 %v1612_v45, %v2771_v13 }
 0xa0f   :  { %v1616_v46 = vsub.f32 %v1604_v57, %v1614_v52 }
 0xa11   :  { %v1618_v47 = vmul.f32 %v1616_v46, %v1616_v46 }
 0xa13   :  { %v1622_v61 = vsel %vm259_vm2, %v1618_v47, 0.0 }
 0xa14   :  { %1623 = vadd.xlane.f32.xlu0 %v1622_v61 }
 0xa7f   :  { %v1621_v48 = vpop.xlane.xlu2 %1620 }
 0xa80   :  { %v1625_v50 = vmul.f32 %v1621_v48, %v2771_v13 }
 0xa82   :  { %v1627_v51 = vadd.f32 1e-12, %v1625_v50 }
 0xa84   :  { %2178 = vrsqrt.f32 %v1627_v51  ;;  %vm1635_vm1 = vweird.f32 %v1627_v51 }
 0xa87   :  { %v1624_v54 = vpop.xlane.xlu0 %1623 }
 0xa88   :  { %v1626_v56 = vmul.f32 %v1624_v54, %v2771_v13 }
 0xa8a   :  { %v2179_v2 = vpop.eup %2178  ;;  %v1628_v3 = vadd.f32 1e-12, %v1626_v56 }
 0xa8b   :  { %v1630_v5 = vmul.f32 %v2179_v2, %v1627_v51  ;;  %vm1636_vm0 = vweird.f32 %v2179_v2 }
 0xa8c   :  { %2180 = vrsqrt.f32 %v1628_v3  ;;  %vm1637_vm3 = vmor %vm1635_vm1, %vm1636_vm0  ;;  %vm1645_vm5 = vweird.f32 %v1628_v3 }
 0xa8d   :  { %v1631_v6 = vmul.f32 %v2179_v2, %v1630_v5 }
 0xa8f   :  { %v1632_v7 = vmul.f32 0.5, %v1631_v6 }
 0xa91   :  { %v1633_v8 = vsub.f32 1.5, %v1632_v7 }
 0xa92   :  { %v2181_v9 = vpop.eup %2180 }
 0xa93   :  { %v1634_v60 = vmul.f32 %v2179_v2, %v1633_v8  ;;  %v1640_v10 = vmul.f32 %v2181_v9, %v1628_v3  ;;  %vm1646_vm4 = vweird.f32 %v2181_v9 }
 0xa94   :  { %vm1647_vm6 = vmor %vm1645_vm5, %vm1646_vm4 }
 0xa95   :  { %v1641_v59 = vmul.f32 %v2181_v9, %v1640_v10  ;;  %v1638_v14 = vsel %vm1637_vm3, %v2179_v2, %v1634_v60  ;;  %v2054_v10 = vld [vmem:[#allocation27 + $0x8] sm:$0xff] }
 0xa96   :  { %v1649_v16 = vmul.f32 %v1638_v14, %v1615_v37  ;;  %1865 = vmatpush.bf16.msra.mxu3 %v2054_v10  ;;  %v2053_v14 = vld [vmem:[#allocation27] sm:$0xff] }
 0xa97   :  { %v1642_v12 = vmul.f32 0.5, %v1641_v59 }
 0xa98   :  { %v1654_v21 = vmul.f32 %v2166_v17, %v1649_v16 }
 0xa99   :  { %v1643_v15 = vsub.f32 1.5, %v1642_v12 }
 0xa9a   :  { %v1659_v24 = vadd.f32 %v2167_v22, %v1654_v21  ;;  %1866 = vmatpush.bf16.msra.mxu3 %v2053_v14 }
 0xa9b   :  { %v1644_v18 = vmul.f32 %v2181_v9, %v1643_v15 }
 0xa9d   :  { %v1648_v19 = vsel %vm1647_vm6, %v2181_v9, %v1644_v18 }
 0xa9e   :  { %v1650_v20 = vmul.f32 %v1648_v19, %v1616_v46  ;;  %v2169_v46 = vld [vmem:[#allocation23] ss:$0 sm:$0xff] }
 0xaa0   :  { %v1655_v23 = vmul.f32 %v2166_v17, %v1650_v20  ;;  %v2056_v17 = vld [vmem:[%s3283_s18 + $0x8] sm:$0xff] }
 0xaa1   :  { %1903 = vmatpush.bf16.msrb.mxu0 %v2056_v17 }
 0xaa2   :  { %v1660_v25 = vadd.f32 %v2167_v22, %v1655_v23 }
 0xaa4   :  { %v1661_v26 = vpack.c.bf16 %v1660_v25, %v1659_v24 }
 0xaa6   :  { %2007 = vmatmul.msk.bf16.vlgmr.msra.gmra.mxu1 %vm259_vm2, %v1661_v26 }
 0xb23   :  { %v1694_v63 = vpop.f32.mrf.mxu1 }
 0xb24   :  { %v1695_v31 = vadd.f32 %v2168_v62, %v1694_v63 }
 0xb26   :  { %v1701_v32 = vmul.f32 %v1695_v31, %v1695_v31  ;;  %v1699_v0 = vmul.f32 0.5, %v1695_v31 }
 0xb28   :  { %v1703_v33 = vmul.f32 %v1701_v32, %v1695_v31  ;;  %v2171_v32 = vld [vmem:[#allocation26] ss:$0 sm:$0xff] }
 0xb2a   :  { %v1705_v34 = vmul.f32 0.044715, %v1703_v33 }
 0xb2b   :  { %v1696_v4 = vpop.f32.mrf.mxu1 }
 0xb2c   :  { %v1707_v35 = vadd.f32 %v1705_v34, %v1695_v31  ;;  %v1697_v36 = vadd.f32 %v2168_v62, %v1696_v4  ;;  %v2170_v62 = vld [vmem:[#allocation24] ss:$0 sm:$0xff] }
 0xb2e   :  { %v1702_v11 = vmul.f32 %v1697_v36, %v1697_v36  ;;  %v1709_v39 = vmul.f32 0.7978846, %v1707_v35  ;;  %v1700_v55 = vmul.f32 0.5, %v1697_v36 }
 0xb30   :  { %v1704_v40 = vmul.f32 %v1702_v11, %v1697_v36  ;;  %2182 = vtanh.f32 %v1709_v39 }
 0xb32   :  { %v1706_v38 = vmul.f32 0.044715, %v1704_v40 }
 0xb34   :  { %v1708_v42 = vadd.f32 %v1706_v38, %v1697_v36 }
 0xb36   :  { %v1710_v1 = vmul.f32 0.7978846, %v1708_v42  ;;  %v2183_v44 = vpop.eup %2182  ;;  %v2055_v42 = vld [vmem:[%s3283_s18] sm:$0xff]  ;;  %s1918_s18 = sshll.u32 %s3285_s20, 4  ;;  %s1919_s18 = int_to_ptr.hbm [resolvable:$true] %s1918_s18 }
 0xb37   :  { %v1713_v57 = vadd.f32 1.0, %v2183_v44  ;;  %1904 = vmatpush.bf16.msrb.mxu0 %v2055_v42 }
 0xb38   :  { %2184 = vtanh.f32 %v1710_v1  ;;  %v2172_v1 = vld [vmem:[#allocation29] ss:$0 sm:$0xff] }
 0xb39   :  { %v1715_v41 = vmul.f32 %v1713_v57, %v1699_v0 }
 0xb3e   :  { %v2185_v30 = vpop.eup %2184 }
 0xb3f   :  { %v1714_v37 = vadd.f32 1.0, %v2185_v30 }
 0xb41   :  { %v1716_v43 = vmul.f32 %v1714_v37, %v1700_v55  ;;  %v2173_v37 = vld [vmem:[%s3284_s19] ss:$0 sm:$0xff] }
 0xb43   :  { %v1717_v45 = vpack.c.bf16 %v1716_v43, %v1715_v41 }
 0xb45   :  { %2024 = vmatmul.msk.bf16.vlgmr.msra.gmra.mxu2 %vm1754_vm7, %v1717_v45 }
 0xbc8   :  { %v1767_v52 = vpop.f32.mrf.mxu2 }
 0xbc9   :  { %v1768_v48 = vadd.f32 %v2169_v46, %v1767_v52 }
 0xbcb   :  { %v1772_v50 = vadd.f32 %v1768_v48, %v1659_v24 }
 0xbcd   :  { %v1776_v51 = vsel %vm259_vm2, %v1772_v50, 0.0 }
 0xbd0   :  { %v1769_v47 = vpop.f32.mrf.mxu2 }
 0xbd1   :  { %v1770_v61 = vadd.f32 %v2169_v46, %v1769_v47 }
 0xbd3   :  { %v1773_v53 = vadd.f32 %v1770_v61, %v1660_v25 }
 0xbd5   :  { %v1779_v49 = vsel %vm259_vm2, %v1773_v53, 0.0 }
 0xbd6   :  { %1780 = vadd.xlane.f32.xlu2 %v1779_v49 }
 0xbde   :  { %1777 = vadd.xlane.f32.xlu2 %v1776_v51 }
 0xc49   :  { %v1781_v54 = vpop.xlane.xlu2 %1780 }
 0xc4a   :  { %v1783_v56 = vmul.f32 %v1781_v54, %v2771_v13 }
 0xc4c   :  { %v1785_v2 = vsub.f32 %v1773_v53, %v1783_v56 }
 0xc4e   :  { %v1787_v3 = vmul.f32 %v1785_v2, %v1785_v2 }
 0xc50   :  { %v1791_v5 = vsel %vm259_vm2, %v1787_v3, 0.0 }
 0xc51   :  { %1792 = vadd.xlane.f32.xlu2 %v1791_v5  ;;  %v1778_v6 = vpop.xlane.xlu2 %1777 }
 0xc52   :  { %v1782_v7 = vmul.f32 %v1778_v6, %v2771_v13 }
 0xc54   :  { %v1784_v8 = vsub.f32 %v1772_v50, %v1782_v7 }
 0xc56   :  { %v1786_v9 = vmul.f32 %v1784_v8, %v1784_v8 }
 0xc58   :  { %v1788_v60 = vsel %vm259_vm2, %v1786_v9, 0.0 }
 0xc59   :  { %1789 = vadd.xlane.f32.xlu2 %v1788_v60 }
 0xcc4   :  { %v1793_v59 = vpop.xlane.xlu2 %1792 }
 0xcc5   :  { %v1795_v12 = vmul.f32 %v1793_v59, %v2771_v13 }
 0xcc7   :  { %v1797_v15 = vadd.f32 1e-12, %v1795_v12 }
 0xcc9   :  { %2186 = vrsqrt.f32 %v1797_v15  ;;  %vm1814_vm9 = vweird.f32 %v1797_v15 }
 0xccc   :  { %v1790_v16 = vpop.xlane.xlu2 %1789 }
 0xccd   :  { %v1794_v18 = vmul.f32 %v1790_v16, %v2771_v13 }
 0xccf   :  { %v2187_v19 = vpop.eup %2186  ;;  %v1796_v20 = vadd.f32 1e-12, %v1794_v18 }
 0xcd0   :  { %v1809_v21 = vmul.f32 %v2187_v19, %v1797_v15  ;;  %vm1815_vm8 = vweird.f32 %v2187_v19 }
 0xcd1   :  { %2188 = vrsqrt.f32 %v1796_v20  ;;  %vm1816_vm10 = vmor %vm1814_vm9, %vm1815_vm8  ;;  %vm1804_vm12 = vweird.f32 %v1796_v20 }
 0xcd2   :  { %v1810_v22 = vmul.f32 %v2187_v19, %v1809_v21 }
 0xcd4   :  { %v1811_v23 = vmul.f32 0.5, %v1810_v22 }
 0xcd6   :  { %v1812_v24 = vsub.f32 1.5, %v1811_v23 }
 0xcd7   :  { %v2189_v25 = vpop.eup %2188 }
 0xcd8   :  { %v1813_v26 = vmul.f32 %v2187_v19, %v1812_v24  ;;  %v1799_v27 = vmul.f32 %v2189_v25, %v1796_v20  ;;  %vm1805_vm11 = vweird.f32 %v2189_v25 }
 0xcd9   :  { %vm1806_vm13 = vmor %vm1804_vm12, %vm1805_vm11 }
 0xcda   :  { %v1817_v28 = vsel %vm1816_vm10, %v2187_v19, %v1813_v26  ;;  %v1800_v29 = vmul.f32 %v2189_v25, %v1799_v27 }
 0xcdb   :  { %v1819_v58 = vmul.f32 %v1817_v28, %v1785_v2 }
 0xcdc   :  { %v1801_v63 = vmul.f32 0.5, %v1800_v29 }
 0xcdd   :  { %v1824_v31 = vmul.f32 %v2170_v62, %v1819_v58 }
 0xcde   :  { %v1802_v13 = vsub.f32 1.5, %v1801_v63 }
 0xcdf   :  { %v1829_v35 = vadd.f32 %v2171_v32, %v1824_v31 }
 0xce0   :  { %v1803_v33 = vmul.f32 %v2189_v25, %v1802_v13 }
 0xce1   :  { %v1831_v39 = vrot.slane %v1829_v35, 7 }
 0xce2   :  { %v1807_v34 = vsel %vm1806_vm13, %v2189_v25, %v1803_v33 }
 0xce3   :  { %v1818_v4 = vmul.f32 %v1807_v34, %v1784_v8 }
 0xce5   :  { %v1823_v36 = vmul.f32 %v2170_v62, %v1818_v4 }
 0xce7   :  { %v1828_v11 = vadd.f32 %v2171_v32, %v1823_v36 }
 0xce9   :  { %v1834_v40 = vsel %vm1833_vm14, %v1828_v11, %v1831_v39 }
 0xcea   :  { %v1835_v38 = vpack.c.bf16 %v1834_v40, %v1834_v40 }
 0xcec   :  { %2033 = vmatmul.msk.bf16.vlgmr.msra.gmra.mxu3 %vm259_vm2, %v1835_v38 }
 0xd6f   :  { %v1868_v44 = vpop.f32.mrf.mxu3 }
 0xd70   :  { %v1869_v57 = vadd.f32 %v2172_v1, %v1868_v44 }
 0xd72   :  { %2190 = vtanh.f32 %v1869_v57 }
 0xd77   :  { %v1870_v30 = vpop.f32.mrf.mxu3 }
 0xd78   :  { %v2191_v0 = vpop.eup %2190 }
 0xd79   :  { %v1873_v55 = vpack.c.bf16 %v2191_v0, %v2191_v0 }
 0xd7b   :  { %2042 = vmatmul.msk.bf16.vlgmr.msrb.gmra.mxu0 %vm259_vm2, %v1873_v55 }
 0xdf8   :  { %v1906_v41 = vpop.f32.mrf.mxu0 }
 0xdf9   :  { %v1907_v43 = vadd.f32 %v2173_v37, %v1906_v41 }
 0xdfb   :  { %1910 = vst [vmem:[#allocation30] sm:$0x3] %v1907_v43 }
 0xdfc   :  { %1921 = dma.vmem_to_hbm [thread:$0]  %s1917_s9, 32, %s1919_s18, [#allocation11]  }
 0xe00   :  { %v1908_v45 = vpop.f32.mrf.mxu0 }
 0xe01   :  { %2564 = dma.done.wait [#allocation11], 32  }
 0xe02   :  { %2565 = vsyncadd [#allocation11], 4294967264 }
 0xe03   :  { %1926 = vsyncpa [#allocation10], 1 }
 0xe04   :  { %1927 = vsyncpa [#allocation13], 1 }
 0xe05   :  { %1928 = vsyncpa [#allocation16], 1 }
 0xe06   :  { %1929 = vsyncpa [#allocation19], 1 }
 0xe07   :  { %1930 = vsyncpa [#allocation22], 1 }
 0xe08   :  { %1931 = vsyncpa [#allocation25], 1 }
 0xe09   :  { %1932 = vsyncpa [#allocation28], 1 }
 0xe0a   :  { %1933 = vsyncpa [#allocation11], 1 }

// kernel: tpu_custom_call.1
= control target key start
LH: loop header
LB: loop body
LE: loop exit
PB: predicated region body
PF: predicated region fallthrough
CT: control target
= control target key end

     0   :  { %s2574_s24 = smov [#allocation8]   ;;  %s3265_s0 = inlined_call_operand.hbm [shape: s32[2], index: 0, kind: input, shape index: {}]   ;;  %s3266_s1 = inlined_call_operand.hbm [shape: bf16[2,8,32], index: 1, kind: input, shape index: {}]   ;;  %s3267_s2 = inlined_call_operand.hbm [shape: f32[1,32], index: 2, kind: input, shape index: {}]   ;;  %s3268_s3 = inlined_call_operand.hbm [shape: f32[1,32], index: 3, kind: input, shape index: {}]   ;;  %s3269_s4 = inlined_call_operand.vmem [shape: bf16[32,96], index: 4, kind: input, shape index: {}]   ;;  %s3270_s5 = inlined_call_operand.hbm [shape: f32[1,96], index: 5, kind: input, shape index: {}]   ;;  %s3271_s6 = inlined_call_operand.vmem [shape: bf16[32,32], index: 6, kind: input, shape index: {}]   ;;  %s3272_s7 = inlined_call_operand.hbm [shape: f32[1,32], index: 7, kind: input, shape index: {}]   ;;  %s3273_s8 = inlined_call_operand.hbm [shape: f32[1,32], index: 8, kind: input, shape index: {}]   ;;  %s3274_s9 = inlined_call_operand.hbm [shape: f32[1,32], index: 9, kind: input, shape index: {}]   ;;  %s3275_s10 = inlined_call_operand.vmem [shape: bf16[32,64], index: 10, kind: input, shape index: {}]   ;;  %s3276_s11 = inlined_call_operand.hbm [shape: f32[1,64], index: 11, kind: input, shape index: {}]   ;;  %s3277_s12 = inlined_call_operand.vmem [shape: bf16[64,32], index: 12, kind: input, shape index: {}]   ;;  %s3278_s13 = inlined_call_operand.hbm [shape: f32[1,32], index: 13, kind: input, shape index: {}]   ;;  %s3279_s14 = inlined_call_operand.hbm [shape: f32[1,32], index: 14, kind: input, shape index: {}]   ;;  %s3280_s15 = inlined_call_operand.hbm [shape: f32[1,32], index: 15, kind: input, shape index: {}]   ;;  %s3281_s16 = inlined_call_operand.hbm [shape: bf16[32,32], index: 16, kind: input, shape index: {}]   ;;  %s3282_s17 = inlined_call_operand.hbm [shape: f32[1,32], index: 17, kind: input, shape index: {}]   ;;  %s3283_s18 = inlined_call_operand.vmem [shape: bf16[32,128], index: 18, kind: input, shape index: {}]   ;;  %s3284_s19 = inlined_call_operand.vmem [shape: f32[1,128], index: 19, kind: input, shape index: {}]   ;;  %s3285_s20 = inlined_call_operand.hbm [shape: f32[1,2,128], index: 20, kind: output, shape index: {}]  }
   0x1   :  { %3288 = sst [smem:[#allocation40_spill]] %s3265_s0 }
   0x2   :  { %3289 = sst [smem:[#allocation41_spill]] %s3266_s1 }
   0x3   :  { %3290 = sst [smem:[#allocation42_spill]] %s3267_s2 }
   0x4   :  { %3291 = sst [smem:[#allocation43_spill]] %s3268_s3 }
   0x5   :  { %3292 = sst [smem:[#allocation44_spill]] %s3269_s4 }
   0x6   :  { %3293 = sst [smem:[#allocation45_spill]] %s3277_s12 }
   0x7   :  { %s3294_s23 = sld [smem:[#allocation40_spill]] }
   0xd   :  { %s26_s12 = sshll.u32 %s3294_s23, 4  ;;  %s27_s12 = int_to_ptr.hbm [resolvable:$true] %s26_s12 }
   0xe   :  { %29 = dma.hbm_to_smem %s27_s12, 16, %s2574_s24, [#allocation7] }
   0xf   :  { %2548 = dma.done.wait [#allocation7], 16 }
  0x10   :  { %2549 = vsyncadd [#allocation7], 4294967280 }
  0x11   :  { %32 = sfence }
  0x12   :  { %33 = vsyncpa [#allocation10], 0 }
  0x13   :  { %34 = vsyncpa [#allocation13], 0 }
  0x14   :  { %35 = vsyncpa [#allocation16], 0 }
  0x15   :  { %36 = vsyncpa [#allocation19], 0 }
  0x16   :  { %37 = vsyncpa [#allocation22], 0 }
  0x17   :  { %38 = vsyncpa [#allocation25], 0 }
  0x18   :  { %39 = vsyncpa [#allocation28], 0  ;;  %s3295_s3 = sld [smem:[#allocation42_spill]] }
  0x1e   :  { %s59_s26 = sshll.u32 %s3295_s3, 4  ;;  %s60_s26 = int_to_ptr.hbm [resolvable:$true] %s59_s26 }
  0x1f   :  { %40 = vsyncpa [#allocation11], 0  ;;  %s2575_s27 = smov [#allocation12]   ;;  %s83_s29 = sshll.u32 %s3270_s5, 4  ;;  %s84_s29 = int_to_ptr.hbm [resolvable:$true] %s83_s29 }
  0x20   :  { %s61_s28 = sshll.u32 %s2575_s27, 4  ;;  %s2576_s30 = smov [#allocation15]   ;;  %s62_s28 = int_to_ptr.vmem [resolvable:$true] %s61_s28 }
  0x21   :  { %64 = dma.hbm_to_vmem [thread:$0]  %s60_s26, 16, %s62_s28, [#allocation13]  }
  0x22   :  { %s85_s0 = sshll.u32 %s2576_s30, 4  ;;  %s107_s22 = sshll.u32 %s3273_s8, 4  ;;  %s86_s0 = int_to_ptr.vmem [resolvable:$true] %s85_s0  ;;  %s108_s22 = int_to_ptr.hbm [resolvable:$true] %s107_s22 }
  0x23   :  { %88 = dma.hbm_to_vmem [thread:$0]  %s84_s29, 16, %s86_s0, [#allocation16]  }
  0x24   :  { %s131_s2 = sshll.u32 %s3276_s11, 4  ;;  %s2577_s25 = smov [#allocation18]   ;;  %s132_s2 = int_to_ptr.hbm [resolvable:$true] %s131_s2 }
  0x25   :  { %s109_s3 = sshll.u32 %s2577_s25, 4  ;;  %s2578_s5 = smov [#allocation21]   ;;  %s110_s3 = int_to_ptr.vmem [resolvable:$true] %s109_s3 }
  0x26   :  { %112 = dma.hbm_to_vmem [thread:$0]  %s108_s22, 16, %s110_s3, [#allocation19]  }
  0x27   :  { %s133_s26 = sshll.u32 %s2578_s5, 4  ;;  %s155_s12 = sshll.u32 %s3279_s14, 4  ;;  %s134_s26 = int_to_ptr.vmem [resolvable:$true] %s133_s26  ;;  %s156_s12 = int_to_ptr.hbm [resolvable:$true] %s155_s12 }
  0x28   :  { %136 = dma.hbm_to_vmem [thread:$0]  %s132_s2, 16, %s134_s26, [#allocation22]  }
  0x29   :  { %s2579_s8 = smov [#allocation24]   ;;  %s176_s11 = sshll.u32 %s3281_s16, 4  ;;  %s177_s11 = int_to_ptr.hbm [resolvable:$true] %s176_s11 }
  0x2a   :  { %s157_s4 = sshll.u32 %s2579_s8, 4  ;;  %s2580_s0 = smov [#allocation27]   ;;  %s158_s4 = int_to_ptr.vmem [resolvable:$true] %s157_s4 }
  0x2b   :  { %160 = dma.hbm_to_vmem [thread:$0]  %s156_s12, 16, %s158_s4, [#allocation25]  }
  0x2c   :  { %s178_s21 = sshll.u32 %s2580_s0, 4  ;;  %s3296_s23 = sld [smem:[#allocation41_spill]]  ;;  %s179_s21 = int_to_ptr.vmem [resolvable:$true] %s178_s21 }
  0x2d   :  { %s2581_s14 = smov 64   ;;  %s2582_s25 = smov 4  }
  0x2e   :  { %184 = dma.hbm_to_vmem [thread:$0]  %s177_s11, 256, %s179_s21, [#allocation28], %s2581_s14, %s2581_s14, %s2582_s25  }
  0x2f   :  { %s3297_s5 = sld [smem:[#allocation43_spill]]  ;;  %s2583_s16 = smov [#allocation9]  }
  0x30   :  { %s47_s27 = sshll.u32 %s2583_s16, 4  ;;  %s2584_s28 = smov [#allocation14]   ;;  %s48_s27 = int_to_ptr.vmem [resolvable:$true] %s47_s27 }
  0x31   :  { %s72_s12 = sshll.u32 %s2584_s28, 4  ;;  %s96_s29 = sshll.u32 %s3272_s7, 4  ;;  %s73_s12 = int_to_ptr.vmem [resolvable:$true] %s72_s12  ;;  %s97_s29 = int_to_ptr.hbm [resolvable:$true] %s96_s29 }
  0x32   :  { %s45_s24 = sshll.u32 %s3296_s23, 4  ;;  %s118_s0 = sshll.u32 %s3274_s9, 4  ;;  %s46_s24 = int_to_ptr.hbm [resolvable:$true] %s45_s24  ;;  %s119_s0 = int_to_ptr.hbm [resolvable:$true] %s118_s0 }
  0x33   :  { %53 = dma.hbm_to_vmem [thread:$0]  %s46_s24, 128, %s48_s27, [#allocation10], %s2581_s14, %s2581_s14, %s2582_s25  }
  0x34   :  { %s2585_s21 = smov [#allocation17]   ;;  %s2586_s22 = smov [#allocation20]  }
  0x35   :  { %s70_s26 = sshll.u32 %s3297_s5, 4  ;;  %s98_s1 = sshll.u32 %s2585_s21, 4  ;;  %s71_s26 = int_to_ptr.hbm [resolvable:$true] %s70_s26  ;;  %s99_s1 = int_to_ptr.vmem [resolvable:$true] %s98_s1 }
  0x36   :  { %75 = dma.hbm_to_vmem [thread:$0]  %s71_s26, 16, %s73_s12, [#allocation13]  }
  0x37   :  { %101 = dma.hbm_to_vmem [thread:$0]  %s97_s29, 16, %s99_s1, [#allocation16]  }
  0x38   :  { %s120_s23 = sshll.u32 %s2586_s22, 4  ;;  %s144_s2 = sshll.u32 %s3278_s13, 4  ;;  %s121_s23 = int_to_ptr.vmem [resolvable:$true] %s120_s23  ;;  %s145_s2 = int_to_ptr.hbm [resolvable:$true] %s144_s2 }
  0x39   :  { %123 = dma.hbm_to_vmem [thread:$0]  %s119_s0, 16, %s121_s23, [#allocation19]  }
  0x3a   :  { %s166_s5 = sshll.u32 %s3280_s15, 4  ;;  %s2587_s26 = smov [#allocation23]   ;;  %s167_s5 = int_to_ptr.hbm [resolvable:$true] %s166_s5 }
  0x3b   :  { %s146_s9 = sshll.u32 %s2587_s26, 4  ;;  %s2588_s16 = smov [#allocation26]   ;;  %s147_s9 = int_to_ptr.vmem [resolvable:$true] %s146_s9 }
  0x3c   :  { %149 = dma.hbm_to_vmem [thread:$0]  %s145_s2, 16, %s147_s9, [#allocation22]  }
  0x3d   :  { %s168_s27 = sshll.u32 %s2588_s16, 4  ;;  %s190_s8 = sshll.u32 %s3282_s17, 4  ;;  %s169_s27 = int_to_ptr.vmem [resolvable:$true] %s168_s27  ;;  %s191_s8 = int_to_ptr.hbm [resolvable:$true] %s190_s8 }
  0x3e   :  { %171 = dma.hbm_to_vmem [thread:$0]  %s167_s5, 16, %s169_s27, [#allocation25]  }
  0x3f   :  { %s2589_s13 = smov [#allocation29]  }
  0x40   :  { %s192_s4 = sshll.u32 %s2589_s13, 4  ;;  %s193_s4 = int_to_ptr.vmem [resolvable:$true] %s192_s4 }
  0x41   :  { %195 = dma.hbm_to_vmem [thread:$0]  %s191_s8, 16, %s193_s4, [#allocation28]  }
  0x42   :  { %2550 = dma.done.wait [#allocation10], 128  }
  0x43   :  { %2551 = vsyncadd [#allocation10], 4294967168 }
  0x44   :  { %2552 = dma.done.wait [#allocation13], 32  }
  0x45   :  { %2553 = vsyncadd [#allocation13], 4294967264 }
  0x46   :  { %2554 = dma.done.wait [#allocation16], 32  }
  0x47   :  { %2555 = vsyncadd [#allocation16], 4294967264 }
  0x48   :  { %2556 = dma.done.wait [#allocation19], 32  }
  0x49   :  { %2557 = vsyncadd [#allocation19], 4294967264 }
  0x4a   :  { %2558 = dma.done.wait [#allocation22], 32  }
  0x4b   :  { %2559 = vsyncadd [#allocation22], 4294967264 }
  0x4c   :  { %2560 = dma.done.wait [#allocation25], 32  }
  0x4d   :  { %2561 = vsyncadd [#allocation25], 4294967264 }
  0x4e   :  { %2562 = dma.done.wait [#allocation28], 272  }
  0x4f   :  { %2563 = vsyncadd [#allocation28], 4294967024  ;;  %vm664_vm0 = vcmask 7168   ;;  %v2590_v0 = vmov -inf   ;;  %s2757_s15 = sld [smem:[#allocation8]]  ;;  %vm669_vm1 = vcmask 130048  }
  0x50   :  { %665 = vst.msk [vmem:[#allocation4] sm:$0xff] %vm664_vm0, %v2590_v0  ;;  %v2591_v1 = vmov 0.0   ;;  %v2058_v2 = vld [vmem:[#allocation9] sm:$0xff]   ;;  %vm259_vm2 = vcmask 261120   ;;  %v2592_v7 = vmov 32.0   ;;  %s3298_s30 = sld [smem:[#allocation44_spill]] }
  0x51   :  { %666 = vst.msk [vmem:[#allocation4 + $0x8] sm:$0xff] %vm664_vm0, %v2590_v0  ;;  %v2059_v3 = vunpack.c.l.bf16 %v2058_v2  ;;  %v2060_v5 = vunpack.c.h.bf16 %v2058_v2  ;;  %2120 = vrcp.f32 %v2592_v7  ;;  %v2117_v45 = vld [vmem:[#allocation12] ss:$0 sm:$0xff]  ;;  %v2118_v50 = vld [vmem:[#allocation14] ss:$0 sm:$0xff]  ;;  %s2593_s21 = smov 112  }
  0x52   :  { %667 = vst.msk [vmem:[#allocation5] sm:$0xff] %vm664_vm0, %v2591_v1  ;;  %v2119_v55 = vld [vmem:[#allocation15] ss:$0 sm:$0xff]  ;;  %s2594_s1 = smov 96   ;;  %v2595_v2 = vmov 1983009808  }
  0x53   :  { %668 = vst.msk [vmem:[#allocation5 + $0x8] sm:$0xff] %vm664_vm0, %v2591_v1  ;;  %v260_v4 = vsel %vm259_vm2, %v2059_v3, 0.0  ;;  %v263_v6 = vsel %vm259_vm2, %v2060_v5, 0.0  ;;  %vm368_vm10 = vcmask 1047556   ;;  %vm561_vm11 = vcmask 125952   ;;  %s2915_s22 = smov 0  }
  0x54   :  { %670 = vst.msk [vmem:[#allocation6] sm:$0xff] %vm669_vm1, %v2591_v1  ;;  %261 = vadd.xlane.f32.xlu0 %v260_v4 }
  0x55   :  { %671 = vst.msk [vmem:[#allocation6 + $0x8] sm:$0xff] %vm669_vm1, %v2591_v1 }
  0x56   :  { %v2044_v24 = vld [vmem:[%s3298_s30 + $0x8] sm:$0xff]  ;;  %v2043_v26 = vld [vmem:[%s3298_s30] sm:$0xff] }
  0x57   :  { %v2121_v8 = vpop.eup %2120  ;;  %351 = vmatpush.bf16.msra.mxu0 %v2044_v24 }
  0x58   :  { %v267_v9 = vmul.f32 32.0, %v2121_v8  ;;  %vm271_vm3 = vweird.f32 %v2121_v8 }
  0x5a   :  { %v268_v10 = vsub.f32 1.0, %v267_v9 }
  0x5b   :  { %352 = vmatpush.bf16.msra.mxu0 %v2043_v26 }
  0x5c   :  { %264 = vadd.xlane.f32.xlu0 %v263_v6  ;;  %v269_v11 = vmul.f32 %v2121_v8, %v268_v10  ;;  %v2596_v6 = vmov 1934713408  }
  0x5d   :  { %v393_v7 = vunpack.c.l.s4 %v2596_v6 }
  0x5e   :  { %v270_v12 = vadd.f32 %v2121_v8, %v269_v11 }
  0x5f   :  { %v2806_v11 = vunpack.c.0.s8 %v393_v7 }
  0x60   :  { %v2771_v13 = vsel %vm271_vm3, %v2121_v8, %v270_v12 }
  0xc7   :  { %v262_v14 = vpop.xlane.xlu0 %261 }
  0xc8   :  { %v273_v15 = vmul.f32 %v2771_v13, %v262_v14 }
  0xca   :  { %v275_v16 = vsub.f32 %v2059_v3, %v273_v15  ;;  %v371_v3 = vunpack.c.l.s4 %v2595_v2 }
  0xcc   :  { %v277_v17 = vmul.f32 %v275_v16, %v275_v16  ;;  %v2801_v4 = vunpack.c.0.s8 %v371_v3 }
  0xce   :  { %v279_v18 = vsel %vm259_vm2, %v277_v17, 0.0 }
  0xcf   :  { %280 = vadd.xlane.f32.xlu1 %v279_v18  ;;  %v265_v19 = vpop.xlane.xlu0 %264 }
  0xd0   :  { %v274_v20 = vmul.f32 %v2771_v13, %v265_v19 }
  0xd2   :  { %v276_v21 = vsub.f32 %v2060_v5, %v274_v20 }
  0xd4   :  { %v278_v22 = vmul.f32 %v276_v21, %v276_v21 }
  0xd6   :  { %v282_v23 = vsel %vm259_vm2, %v278_v22, 0.0 }
  0xd7   :  { %283 = vadd.xlane.f32.xlu1 %v282_v23 }
 0x142   :  { %v281_v25 = vpop.xlane.xlu1 %280 }
 0x143   :  { %v285_v27 = vmul.f32 %v281_v25, %v2771_v13 }
 0x145   :  { %v287_v28 = vadd.f32 1e-12, %v285_v27 }
 0x147   :  { %2122 = vrsqrt.f32 %v287_v28  ;;  %vm295_vm5 = vweird.f32 %v287_v28 }
 0x14a   :  { %v284_v29 = vpop.xlane.xlu1 %283 }
 0x14b   :  { %v286_v30 = vmul.f32 %v284_v29, %v2771_v13 }
 0x14d   :  { %v2123_v31 = vpop.eup %2122  ;;  %v288_v32 = vadd.f32 1e-12, %v286_v30 }
 0x14e   :  { %v290_v33 = vmul.f32 %v2123_v31, %v287_v28  ;;  %vm296_vm4 = vweird.f32 %v2123_v31 }
 0x14f   :  { %2124 = vrsqrt.f32 %v288_v32  ;;  %vm297_vm6 = vmor %vm295_vm5, %vm296_vm4  ;;  %vm305_vm8 = vweird.f32 %v288_v32 }
 0x150   :  { %v291_v34 = vmul.f32 %v2123_v31, %v290_v33 }
 0x152   :  { %v292_v35 = vmul.f32 0.5, %v291_v34 }
 0x154   :  { %v293_v36 = vsub.f32 1.5, %v292_v35 }
 0x155   :  { %v2125_v37 = vpop.eup %2124 }
 0x156   :  { %v294_v38 = vmul.f32 %v2123_v31, %v293_v36  ;;  %v300_v39 = vmul.f32 %v2125_v37, %v288_v32  ;;  %vm306_vm7 = vweird.f32 %v2125_v37 }
 0x157   :  { %vm307_vm9 = vmor %vm305_vm8, %vm306_vm7 }
 0x158   :  { %v301_v40 = vmul.f32 %v2125_v37, %v300_v39  ;;  %v298_v41 = vsel %vm297_vm6, %v2123_v31, %v294_v38 }
 0x159   :  { %v309_v44 = vmul.f32 %v298_v41, %v275_v16 }
 0x15a   :  { %v302_v42 = vmul.f32 0.5, %v301_v40 }
 0x15b   :  { %v314_v49 = vmul.f32 %v2117_v45, %v309_v44 }
 0x15c   :  { %v303_v43 = vsub.f32 1.5, %v302_v42 }
 0x15d   :  { %v2785_v52 = vadd.f32 %v2118_v50, %v314_v49 }
 0x15e   :  { %v304_v46 = vmul.f32 %v2125_v37, %v303_v43 }
 0x160   :  { %v308_v47 = vsel %vm307_vm9, %v2125_v37, %v304_v46 }
 0x161   :  { %v310_v48 = vmul.f32 %v308_v47, %v276_v21 }
 0x163   :  { %v315_v51 = vmul.f32 %v2117_v45, %v310_v48 }
 0x165   :  { %v2787_v53 = vadd.f32 %v2118_v50, %v315_v51 }
 0x167   :  { %v321_v54 = vpack.c.bf16 %v2787_v53, %v2785_v52 }
 0x169   :  { %1960 = vmatmul.msk.bf16.vlgmr.msra.gmra.mxu0 %vm259_vm2, %v321_v54 }
 0x1e6   :  { %v354_v56 = vpop.f32.mrf.mxu0 }
 0x1e7   :  { %v355_v57 = vadd.f32 %v2119_v55, %v354_v56 }
 0x1e9   :  { %461 = vrot.lane.b32.xlu2 %v355_v57, %s2593_s21  ;;  %v359_v58 = vmul.f32 0.25, %v355_v57 }
 0x1eb   :  { %364 = vrot.lane.b32.xlu1 %v359_v58, %s2593_s21  ;;  %v367_v5 = vrot.slane %v359_v58, 4  ;;  %v373_v9 = vperm.slane %v359_v58, %v2801_v4 }
 0x1ed   :  { %v369_v8 = vsel %vm368_vm10, 0.0, %v367_v5  ;;  %v390_v16 = vrot.slane %v373_v9, 4 }
 0x1ee   :  { %v356_v59 = vpop.f32.mrf.mxu0  ;;  %v377_v10 = vperm.slane %v369_v8, %v2801_v4 }
 0x1ef   :  { %v2794_v60 = vadd.f32 %v2119_v55, %v356_v59 }
 0x1f0   :  { %v402_v22 = vrot.slane %v377_v10, 4 }
 0x1f1   :  { %v2797_v61 = vmul.f32 0.25, %v2794_v60 }
 0x243   :  { %v462_v62 = vpop.permute.xlu2 %461 }
 0x244   :  { %v2107_v63 = vpack.i.bf16 %v462_v62, %v355_v57 }
 0x246   :  { %2113 = vrot.lane.b32.xlu0 %v2107_v63, %s2581_s14  ;;  %2108 = vrot.lane.b32.xlu2 %v2107_v63, %s2594_s1 }
 0x25d   :  { %v365_v12 = vpop.permute.xlu1 %364 }
 0x25e   :  { %v378_v14 = vrot.slane %v365_v12, 4  ;;  %v383_v15 = vperm.slane %v365_v12, %v2801_v4 }
 0x260   :  { %v379_v17 = vsel %vm368_vm10, 0.0, %v378_v14  ;;  %v388_v18 = vrot.slane %v383_v15, 4  ;;  %v391_v19 = vsel %vm368_vm10, %v383_v15, %v390_v16 }
 0x261   :  { %v387_v20 = vperm.slane %v379_v17, %v2801_v4  ;;  %v399_v21 = vperm.slane %v391_v19, %v2806_v11 }
 0x262   :  { %v389_v23 = vsel %vm368_vm10, %v388_v18, %v373_v9 }
 0x263   :  { %v395_v24 = vperm.slane %v389_v23, %v2806_v11  ;;  %v400_v25 = vrot.slane %v387_v20, 4  ;;  %v403_v26 = vsel %vm368_vm10, %v387_v20, %v402_v22  ;;  %v414_v27 = vrot.slane %v399_v21, 4 }
 0x264   :  { %v411_v28 = vperm.slane %v403_v26, %v2806_v11 }
 0x265   :  { %v401_v29 = vsel %vm368_vm10, %v400_v25, %v377_v10  ;;  %v412_v30 = vrot.slane %v395_v24, 4  ;;  %v415_v31 = vsel %vm368_vm10, 0.0, %v414_v27  ;;  %v420_v38 = vsel %vm368_vm10, %v414_v27, %v395_v24 }
 0x266   :  { %v407_v32 = vperm.slane %v401_v29, %v2806_v11  ;;  %v418_v33 = vrot.slane %v411_v28, 4  ;;  %v425_v34 = vrot.slane %v415_v31, 4  ;;  %v424_v43 = vperm.slane %v420_v38, %v2801_v4 }
 0x267   :  { %v413_v35 = vsel %vm368_vm10, 0.0, %v412_v30 }
 0x268   :  { %v416_v36 = vrot.slane %v407_v32, 4  ;;  %v419_v37 = vsel %vm368_vm10, 0.0, %v418_v33  ;;  %v426_v39 = vsel %vm368_vm10, %v425_v34, %v413_v35  ;;  %v431_v44 = vsel %vm368_vm10, %v418_v33, %v407_v32 }
 0x269   :  { %v430_v40 = vperm.slane %v426_v39, %v2801_v4  ;;  %v436_v41 = vrot.slane %v419_v37, 4  ;;  %v435_v49 = vperm.slane %v431_v44, %v2801_v4 }
 0x26a   :  { %v417_v42 = vsel %vm368_vm10, 0.0, %v416_v36 }
 0x26b   :  { %v437_v45 = vsel %vm368_vm10, %v436_v41, %v417_v42  ;;  %v442_v46 = vrot.slane %v430_v40, 4 }
 0x26c   :  { %v441_v47 = vperm.slane %v437_v45, %v2801_v4 }
 0x26d   :  { %v443_v48 = vsel %vm368_vm10, %v442_v46, %v424_v43 }
 0x26e   :  { %v447_v50 = vperm.slane %v443_v48, %v2806_v11  ;;  %v448_v51 = vrot.slane %v441_v47, 4 }
 0x270   :  { %v449_v54 = vsel %vm368_vm10, %v448_v51, %v435_v49  ;;  %v456_v55 = vrot.slane %v447_v50, 4 }
 0x271   :  { %v453_v56 = vperm.slane %v449_v54, %v2806_v11 }
 0x273   :  { %v454_v57 = vrot.slane %v453_v56, 4  ;;  %v2836_v58 = vsel %vm368_vm10, %v453_v56, %v456_v55 }
 0x274   :  { %v459_v59 = vpack.c.bf16 %v2836_v58, %v2836_v58 }
 0x275   :  { %v2841_v62 = vsel %vm368_vm10, %v454_v57, %v447_v50  ;;  %v361_v50 = vlaneseq }
 0x276   :  { %v458_v63 = vpack.c.bf16 %v2841_v62, %v2841_v62 }
 0x277   :  { %v2875_v57 = vand.u32 127, %v361_v50 }
 0x2a0   :  { %v2109_v2 = vpop.permute.xlu2 %2108 }
 0x2a1   :  { %v2111_v3 = vunpack.i.h.bf16 %v2109_v2  ;;  %v2110_v5 = vunpack.i.l.bf16 %v2109_v2 }
 0x2a3   :  { %v479_v6 = vrot.slane %v2111_v3, 4  ;;  %v484_v7 = vperm.slane %v2111_v3, %v2801_v4  ;;  %v469_v8 = vrot.slane %v2110_v5, 4  ;;  %v474_v9 = vperm.slane %v2110_v5, %v2801_v4 }
 0x2a5   :  { %v480_v10 = vsel %vm368_vm10, 0.0, %v479_v6  ;;  %v489_v12 = vrot.slane %v484_v7, 4  ;;  %v470_v14 = vsel %vm368_vm10, 0.0, %v469_v8  ;;  %v491_v15 = vrot.slane %v474_v9, 4 }
 0x2a6   :  { %v488_v16 = vperm.slane %v480_v10, %v2801_v4  ;;  %v478_v17 = vperm.slane %v470_v14, %v2801_v4 }
 0x2a7   :  { %v490_v18 = vsel %vm368_vm10, %v489_v12, %v474_v9  ;;  %v492_v19 = vsel %vm368_vm10, %v484_v7, %v491_v15 }
 0x2a8   :  { %v501_v20 = vrot.slane %v488_v16, 4  ;;  %v496_v21 = vperm.slane %v490_v18, %v2806_v11  ;;  %v500_v22 = vperm.slane %v492_v19, %v2806_v11  ;;  %v503_v23 = vrot.slane %v478_v17, 4 }
 0x2aa   :  { %v502_v24 = vsel %vm368_vm10, %v501_v20, %v478_v17  ;;  %v504_v25 = vsel %vm368_vm10, %v488_v16, %v503_v23  ;;  %v513_v26 = vrot.slane %v496_v21, 4  ;;  %v515_v27 = vrot.slane %v500_v22, 4 }
 0x2ab   :  { %v508_v28 = vperm.slane %v502_v24, %v2806_v11  ;;  %v512_v29 = vperm.slane %v504_v25, %v2806_v11 }
 0x2ac   :  { %v516_v30 = vsel %vm368_vm10, 0.0, %v515_v27  ;;  %v514_v34 = vsel %vm368_vm10, 0.0, %v513_v26  ;;  %v521_v36 = vsel %vm368_vm10, %v515_v27, %v496_v21 }
 0x2ad   :  { %v517_v31 = vrot.slane %v508_v28, 4  ;;  %v519_v32 = vrot.slane %v512_v29, 4  ;;  %v526_v33 = vrot.slane %v516_v30, 4  ;;  %v525_v41 = vperm.slane %v521_v36, %v2801_v4 }
 0x2af   :  { %v520_v35 = vsel %vm368_vm10, 0.0, %v519_v32  ;;  %v527_v37 = vsel %vm368_vm10, %v526_v33, %v514_v34  ;;  %v518_v40 = vsel %vm368_vm10, 0.0, %v517_v31  ;;  %v532_v42 = vsel %vm368_vm10, %v519_v32, %v508_v28 }
 0x2b0   :  { %v531_v38 = vperm.slane %v527_v37, %v2801_v4  ;;  %v537_v39 = vrot.slane %v520_v35, 4  ;;  %v536_v47 = vperm.slane %v532_v42, %v2801_v4 }
 0x2b2   :  { %v538_v43 = vsel %vm368_vm10, %v537_v39, %v518_v40  ;;  %v543_v44 = vrot.slane %v531_v38, 4 }
 0x2b3   :  { %v542_v45 = vperm.slane %v538_v43, %v2801_v4 }
 0x2b4   :  { %v544_v46 = vsel %vm368_vm10, %v543_v44, %v525_v41 }
 0x2b5   :  { %v548_v48 = vperm.slane %v544_v46, %v2806_v11  ;;  %v549_v49 = vrot.slane %v542_v45, 4 }
 0x2b7   :  { %v550_v51 = vsel %vm368_vm10, %v549_v49, %v536_v47  ;;  %v557_v54 = vrot.slane %v548_v48, 4 }
 0x2b8   :  { %v554_v55 = vperm.slane %v550_v51, %v2806_v11  ;;  %v2114_v56 = vpop.permute.xlu0 %2113 }
 0x2b9   :  { %v2116_v2 = vunpack.i.h.bf16 %v2114_v56  ;;  %v2115_v3 = vunpack.i.l.bf16 %v2114_v56 }
 0x2ba   :  { %v555_v5 = vrot.slane %v554_v55, 4  ;;  %v558_v6 = vsel %vm368_vm10, %v554_v55, %v557_v54 }
 0x2bb   :  { %v560_v7 = vpack.c.bf16 %v558_v6, %v558_v6  ;;  %v580_v8 = vrot.slane %v2116_v2, 4  ;;  %v585_v9 = vperm.slane %v2116_v2, %v2801_v4  ;;  %v570_v10 = vrot.slane %v2115_v3, 4 }
 0x2bc   :  { %v556_v12 = vsel %vm368_vm10, %v555_v5, %v548_v48  ;;  %v575_v14 = vperm.slane %v2115_v3, %v2801_v4 }
 0x2bd   :  { %v559_v15 = vpack.c.bf16 %v556_v12, %v556_v12  ;;  %563 = vst.msk [vmem:[#allocation2 + $0x4] sm:$0xf] %vm561_vm11, %v560_v7  ;;  %v581_v16 = vsel %vm368_vm10, 0.0, %v580_v8  ;;  %v590_v17 = vrot.slane %v585_v9, 4  ;;  %v571_v18 = vsel %vm368_vm10, 0.0, %v570_v10 }
 0x2be   :  { %v589_v19 = vperm.slane %v581_v16, %v2801_v4  ;;  %v579_v20 = vperm.slane %v571_v18, %v2801_v4  ;;  %v592_v21 = vrot.slane %v575_v14, 4 }
 0x2bf   :  { %562 = vst.msk [vmem:[#allocation2] sm:$0xf] %vm561_vm11, %v559_v15  ;;  %v591_v22 = vsel %vm368_vm10, %v590_v17, %v575_v14 }
 0x2c0   :  { %v602_v23 = vrot.slane %v589_v19, 4  ;;  %v593_v24 = vsel %vm368_vm10, %v585_v9, %v592_v21  ;;  %v597_v25 = vperm.slane %v591_v22, %v2806_v11  ;;  %v604_v26 = vrot.slane %v579_v20, 4 }
 0x2c1   :  { %v601_v27 = vperm.slane %v593_v24, %v2806_v11 }
 0x2c2   :  { %v603_v28 = vsel %vm368_vm10, %v602_v23, %v579_v20  ;;  %v605_v29 = vsel %vm368_vm10, %v589_v19, %v604_v26  ;;  %v614_v32 = vrot.slane %v597_v25, 4 }
 0x2c3   :  { %v609_v30 = vperm.slane %v603_v28, %v2806_v11  ;;  %v613_v31 = vperm.slane %v605_v29, %v2806_v11  ;;  %v616_v33 = vrot.slane %v601_v27, 4 }
 0x2c4   :  { %v615_v38 = vsel %vm368_vm10, 0.0, %v614_v32 }
 0x2c5   :  { %v617_v34 = vsel %vm368_vm10, 0.0, %v616_v33  ;;  %v618_v35 = vrot.slane %v609_v30, 4  ;;  %v620_v36 = vrot.slane %v613_v31, 4  ;;  %v622_v40 = vsel %vm368_vm10, %v616_v33, %v597_v25 }
 0x2c6   :  { %v627_v37 = vrot.slane %v617_v34, 4  ;;  %v626_v47 = vperm.slane %v622_v40, %v2801_v4 }
 0x2c7   :  { %v621_v39 = vsel %vm368_vm10, 0.0, %v620_v36  ;;  %v619_v43 = vsel %vm368_vm10, 0.0, %v618_v35  ;;  %v633_v45 = vsel %vm368_vm10, %v620_v36, %v609_v30 }
 0x2c8   :  { %v628_v41 = vsel %vm368_vm10, %v627_v37, %v615_v38  ;;  %v638_v42 = vrot.slane %v621_v39, 4  ;;  %v637_v50 = vperm.slane %v633_v45, %v2801_v4 }
 0x2c9   :  { %v632_v44 = vperm.slane %v628_v41, %v2801_v4 }
 0x2ca   :  { %v639_v46 = vsel %vm368_vm10, %v638_v42, %v619_v43 }
 0x2cb   :  { %v643_v48 = vperm.slane %v639_v46, %v2801_v4  ;;  %v644_v49 = vrot.slane %v632_v44, 4 }
 0x2cd   :  { %v645_v51 = vsel %vm368_vm10, %v644_v49, %v626_v47  ;;  %v650_v54 = vrot.slane %v643_v48, 4 }
 0x2ce   :  { %v649_v55 = vperm.slane %v645_v51, %v2806_v11 }
 0x2cf   :  { %v651_v56 = vsel %vm368_vm10, %v650_v54, %v637_v50 }
 0x2d0   :  { %v655_v2 = vperm.slane %v651_v56, %v2806_v11  ;;  %v658_v3 = vrot.slane %v649_v55, 4 }
 0x2d2   :  { %v656_v5 = vrot.slane %v655_v2, 4  ;;  %v659_v6 = vsel %vm368_vm10, %v655_v2, %v658_v3 }
 0x2d3   :  { %v661_v7 = vpack.c.bf16 %v659_v6, %v659_v6 }
 0x2d4   :  { %v657_v8 = vsel %vm368_vm10, %v656_v5, %v649_v55 }
 0x2d5   :  { %v660_v9 = vpack.c.bf16 %v657_v8, %v657_v8  ;;  %663 = vst.msk [vmem:[#allocation3 + $0x4] sm:$0xf] %vm561_vm11, %v661_v7 }
 0x2d7   :  { %662 = vst.msk [vmem:[#allocation3] sm:$0xf] %vm561_vm11, %v660_v9 }
 0x2d8 LB: > { %s1968_s23 = sshll.u32 %s2568_s22, 3  ;;  %v704_v18 = vstv %s2757_s15  ;;  %v2597_v19 = vmov -1e+09   ;;  %vm747_vm13 = vcmask 64512   ;;  %v2598_v29 = vmov 0   ;;  %v745_v30 = vld [vmem:[#allocation4] sm:$0xff]  ;;  %s2568_s22 = sphi %s2915_s22, %s688_s22  }
 0x2d9   : > { %s2921_s24 = sshra.s32 %s1968_s23, 3  ;;  %v702_v16 = vstv %s1968_s23  ;;  %2126 = vset.pattern.permute.xlu1 %v2598_v29  ;;  %2127 = vset.pattern.permute.xlu2 %v2598_v29  ;;  %v746_v35 = vld [vmem:[#allocation4 + $0x8] sm:$0xff]  ;;  %vm811_vm14 = vcmask 1043456   ;;  %v778_v6 = vld [vmem:[#allocation5] sm:$0xff]  ;;  %s688_s22 = sadd.s32 1, %s2568_s22  }
 0x2da   : > { %s1969_s25 = sshll.u32 %s2921_s24, 2  ;;  %v703_v17 = vadd.s32 %v702_v16, %v2875_v57  ;;  %2128 = vset.pattern.permute.xlu0 %v2598_v29  ;;  %p687_p0 = scmp.ge.s32.totalorder %s688_s22, 1 }
 0x2db   : > { %s695_s2 = scalar_lea.vmem [#allocation2], %s1969_s25  ;;  %s699_s7 = scalar_lea.vmem [#allocation3], %s1969_s25 }
 0x2dc   : > { %v696_v10 = vld [vmem:[%s695_s2] sm:$0xf]  ;;  %v697_v12 = vld [vmem:[%s695_s2 + $0x4] sm:$0xf]  ;;  %vm705_vm12 = vcmp.lt.s32.totalorder %v703_v17, %v704_v18  ;;  %v792_v17 = vld [vmem:[#allocation6] sm:$0xff]  ;;  %s3013_s3 = sld [smem:[#allocation8 + $0x1]] (%p687_p0) }
 0x2dd   : > { %v711_v14 = vsel %vm669_vm1, %v696_v10, 0  ;;  %v730_v15 = vsel %vm669_vm1, %v697_v12, 0  ;;  %v706_v20 = vsel %vm705_vm12, 0.0, %v2597_v19  ;;  %v779_v10 = vld [vmem:[#allocation5 + $0x8] sm:$0xff]  ;;  %s3129_s5 = smov (%p687_p0), 0  }
 0x2de   : > { %720 = vmatpush.bf16.xpose.msra.mxu0 %v711_v14  ;;  %739 = vmatpush.bf16.xpose.msra.mxu1 %v730_v15  ;;  %v700_v42 = vld [vmem:[%s699_s7] sm:$0xf]  ;;  %v701_v44 = vld [vmem:[%s699_s7 + $0x4] sm:$0xf] }
 0x2df   : > { %v813_v43 = vsel %vm811_vm14, %v700_v42, 0  ;;  %v832_v45 = vsel %vm811_vm14, %v701_v44, 0 }
 0x2e0   : > { %822 = vmatpush.bf16.msra.mxu2 %v813_v43  ;;  %841 = vmatpush.bf16.msra.mxu3 %v832_v45 }
 0x2e5   : > { %1971 = vmatmul.msk.bf16.vlgmr.msra.gmra.mxu0 %vm669_vm1, %v458_v63  ;;  %1972 = vmatmul.msk.bf16.vlgmr.msra.gmra.mxu1 %vm669_vm1, %v459_v59 }
 0x362   : > { %v722_v21 = vpop.f32.mrf.mxu0  ;;  %v741_v22 = vpop.f32.mrf.mxu1 }
 0x363   : > { %v723_v23 = vadd.f32 %v722_v21, %v706_v20  ;;  %v742_v25 = vadd.f32 %v741_v22, %v706_v20  ;;  %v793_v21 = vld [vmem:[#allocation6 + $0x8] sm:$0xff] }
 0x365   : > { %v748_v24 = vsel %vm747_vm13, %v723_v23, -inf  ;;  %v751_v28 = vsel %vm747_vm13, %v742_v25, -inf }
 0x366   : > { %749 = vmax.xlane.f32.xlu0 %v748_v24 }
 0x36a   : > { %v724_v26 = vpop.f32.mrf.mxu0  ;;  %v743_v27 = vpop.f32.mrf.mxu1 }
 0x36e   : > { %752 = vmax.xlane.f32.xlu0 %v751_v28 }
 0x3d9   : > { %v750_v31 = vpop.xlane.xlu0 %749 }
 0x3da   : > { %v754_v32 = vmax.f32 %v745_v30, %v750_v31 }
 0x3dc   : > { %v756_v33 = vsub.f32 %v745_v30, %v754_v32  ;;  %851 = vst.msk [vmem:[#allocation4] sm:$0xff] %vm664_vm0, %v754_v32  ;;  %764 = vperm.xlu1 %2126, %v754_v32   ;;  %v2599_v30 = vmov (%p687_p0), 0  }
 0x3dd   :  { %1265 = vst.msk [vmem:[#allocation4] sm:$0xff] (%p687_p0), %vm664_vm0, %v2590_v0  ;;  %2137 = vset.pattern.permute.xlu0 (%p687_p0), %v2599_v30 }
 0x3de   : > { %v758_v34 = vmul.f32 1.442695, %v756_v33 }
 0x3e0   : > { %2129 = vpow2.f32 %v758_v34 }
 0x3e1   : > { %v753_v36 = vpop.xlane.xlu0 %752 }
 0x3e2   : > { %v755_v37 = vmax.f32 %v746_v35, %v753_v36 }
 0x3e4   : > { %v757_v38 = vsub.f32 %v746_v35, %v755_v37  ;;  %852 = vst.msk [vmem:[#allocation4 + $0x8] sm:$0xff] %vm664_vm0, %v755_v37  ;;  %769 = vperm.xlu1 %2126, %v755_v37  }
 0x3e5   :  { %1266 = vst.msk [vmem:[#allocation4 + $0x8] sm:$0xff] (%p687_p0), %vm664_vm0, %v2590_v0 }
 0x3e6   : > { %v2130_v39 = vpop.eup %2129  ;;  %v760_v40 = vmul.f32 1.442695, %v757_v38 }
 0x3e7   : > { %796 = vperm.xlu2 %2127, %v2130_v39   ;;  %v780_v7 = vmul.f32 %v2130_v39, %v778_v6 }
 0x3e8   : > { %2131 = vpow2.f32 %v760_v40 }
 0x3ec   :  { %2138 = vset.pattern.permute.xlu1 (%p687_p0), %v2599_v30 }
 0x3ee   : > { %v2132_v41 = vpop.eup %2131 }
 0x3ef   : > { %801 = vperm.xlu2 %2127, %v2132_v41   ;;  %v781_v12 = vmul.f32 %v2132_v41, %v779_v10 }
 0x441   : > { %v797_v16 = vpop.permute.xlu2 %796 }
 0x442   : > { %v804_v18 = vmul.f32 %v797_v16, %v792_v17 }
 0x449   : > { %v802_v22 = vpop.permute.xlu2 %801 }
 0x44e   : > { %v765_v46 = vpop.permute.xlu1 %764 }
 0x44f   : > { %v772_v47 = vsub.f32 %v723_v23, %v765_v46  ;;  %v805_v23 = vmul.f32 %v802_v22, %v793_v21 }
 0x451   : > { %v774_v48 = vmul.f32 1.442695, %v772_v47 }
 0x453   : > { %2133 = vpow2.f32 %v774_v48 }
 0x456   : > { %v770_v49 = vpop.permute.xlu1 %769 }
 0x457   : > { %v773_v50 = vsub.f32 %v742_v25, %v770_v49 }
 0x459   : > { %v2134_v51 = vpop.eup %2133  ;;  %v776_v54 = vmul.f32 1.442695, %v773_v50 }
 0x45a   : > { %v782_v55 = vsel %vm747_vm13, %v2134_v51, 0.0  ;;  %v806_v56 = vpack.c.bf16 %v2134_v51, %v2134_v51 }
 0x45b   : > { %2135 = vpow2.f32 %v776_v54  ;;  %783 = vadd.xlane.f32.xlu0 %v782_v55 }
 0x45c   : > { %1973 = vmatmul.msk.bf16.vlgmr.msra.gmra.mxu2 %vm747_vm13, %v806_v56 }
 0x461   : > { %v2136_v2 = vpop.eup %2135 }
 0x462   : > { %v785_v3 = vsel %vm747_vm13, %v2136_v2, 0.0  ;;  %v807_v5 = vpack.c.bf16 %v2136_v2, %v2136_v2 }
 0x463   : > { %786 = vadd.xlane.f32.xlu1 %v785_v3 }
 0x464   : > { %1974 = vmatmul.msk.bf16.vlgmr.msra.gmra.mxu3 %vm747_vm13, %v807_v5 }
 0x4ce   : > { %v784_v8 = vpop.xlane.xlu0 %783 }
 0x4cf   : > { %v788_v9 = vadd.f32 %v784_v8, %v780_v7 }
 0x4d1   : > { %790 = vst.msk [vmem:[#allocation5] sm:$0xff] %vm664_vm0, %v788_v9 }
 0x4d6   : > { %v787_v14 = vpop.xlane.xlu1 %786 }
 0x4d7   : > { %v789_v15 = vadd.f32 %v787_v14, %v781_v12 }
 0x4d8   :  { %v855_v29 = vld [vmem:[#allocation5] sm:$0xff] (%p687_p0) }
 0x4d9   : > { %791 = vst.msk [vmem:[#allocation5 + $0x8] sm:$0xff] %vm664_vm0, %v789_v15 }
 0x4da   :  { %1267 = vst.msk [vmem:[#allocation5] sm:$0xff] (%p687_p0), %vm664_vm0, %v2591_v1 }
 0x4df   : > { %v824_v19 = vpop.f32.mrf.mxu2 }
 0x4e0   : > { %v847_v20 = vadd.f32 %v824_v19, %v804_v18  ;;  %v856_v28 = vld [vmem:[#allocation5 + $0x8] sm:$0xff] (%p687_p0) }
 0x4e1   :  { %2149 = vrcp.f32 (%p687_p0), %v856_v28  ;;  %1268 = vst.msk [vmem:[#allocation5 + $0x8] sm:$0xff] (%p687_p0), %vm664_vm0, %v2591_v1 }
 0x4e2   : > { %849 = vst.msk [vmem:[#allocation6] sm:$0xff] %vm669_vm1, %v847_v20  ;;  %2151 = vrcp.f32 (%p687_p0), %v855_v29 }
 0x4e7   : > { %v826_v24 = vpop.f32.mrf.mxu2  ;;  %v843_v25 = vpop.f32.mrf.mxu3 }
 0x4e8   : > { %v848_v26 = vadd.f32 %v843_v25, %v805_v23  ;;  %v2150_v58 = vpop.eup (%p687_p0), %2149 }
 0x4e9   :  { %v2152_v59 = vpop.eup (%p687_p0), %2151  ;;  %866 = vperm.xlu1 (%p687_p0), %2138, %v2150_v58   ;;  %v853_v63 = vld [vmem:[#allocation6] sm:$0xff] (%p687_p0) }
 0x4ea   : > { %850 = vst.msk [vmem:[#allocation6 + $0x8] sm:$0xff] %vm669_vm1, %v848_v26  ;;  %861 = vperm.xlu0 (%p687_p0), %2137, %v2152_v59  }
 0x4eb   :  { %690 = sbr.rel (!%p687_p0) target bundleno = 728 (0x2d8), region = 166  ;;  %1269 = vst.msk [vmem:[#allocation6] sm:$0xff] (%p687_p0), %vm669_vm1, %v2591_v1 }
 0x4ef   : > { %v845_v27 = vpop.f32.mrf.mxu3 }
 0x4f1   :  { %v854_v62 = vld [vmem:[#allocation6 + $0x8] sm:$0xff] }
 0x4f2   :  { %1063 = vrot.lane.b32.xlu0 %v2794_v60, %s2593_s21  ;;  %1270 = vst.msk [vmem:[#allocation6 + $0x8] sm:$0xff] %vm669_vm1, %v2591_v1 }
 0x55b   :  { %v867_v31 = vpop.permute.xlu1 %866 }
 0x55c   :  { %v870_v32 = vmul.f32 %v867_v31, %v854_v62  ;;  %v862_v33 = vpop.permute.xlu0 %861  ;;  %v970_v62 = vrot.slane %v2797_v61, 4 }
 0x55d   :  { %v869_v34 = vmul.f32 %v862_v33, %v853_v63 }
 0x55e   :  { %v881_v0 = vrot.slane %v870_v32, 4  ;;  %v886_v35 = vperm.slane %v870_v32, %v2801_v4  ;;  %v971_v33 = vsel %vm368_vm10, 0.0, %v970_v62 }
 0x55f   :  { %v871_v36 = vrot.slane %v869_v34, 4  ;;  %v876_v37 = vperm.slane %v869_v34, %v2801_v4 }
 0x560   :  { %v882_v38 = vsel %vm368_vm10, 0.0, %v881_v0  ;;  %v891_v39 = vrot.slane %v886_v35, 4 }
 0x561   :  { %v890_v40 = vperm.slane %v882_v38, %v2801_v4  ;;  %v872_v41 = vsel %vm368_vm10, 0.0, %v871_v36  ;;  %v893_v42 = vrot.slane %v876_v37, 4  ;;  %v979_v38 = vperm.slane %v971_v33, %v2801_v4 }
 0x562   :  { %v880_v1 = vperm.slane %v872_v41, %v2801_v4  ;;  %v892_v43 = vsel %vm368_vm10, %v891_v39, %v876_v37  ;;  %v975_v37 = vperm.slane %v2797_v61, %v2801_v4 }
 0x563   :  { %v903_v44 = vrot.slane %v890_v40, 4  ;;  %v894_v45 = vsel %vm368_vm10, %v886_v35, %v893_v42  ;;  %v898_v46 = vperm.slane %v892_v43, %v2806_v11 }
 0x564   :  { %v902_v47 = vperm.slane %v894_v45, %v2806_v11  ;;  %v905_v48 = vrot.slane %v880_v1, 4  ;;  %v1064_v49 = vpop.permute.xlu0 %1063 }
 0x565   :  { %v904_v50 = vsel %vm368_vm10, %v903_v44, %v880_v1  ;;  %v2144_v51 = vpack.i.bf16 %v1064_v49, %v2794_v60  ;;  %v915_v56 = vrot.slane %v898_v46, 4 }
 0x566   :  { %v906_v54 = vsel %vm368_vm10, %v890_v40, %v905_v48  ;;  %v910_v55 = vperm.slane %v904_v50, %v2806_v11  ;;  %v917_v2 = vrot.slane %v902_v47, 4  ;;  %v992_v50 = vrot.slane %v975_v37, 4 }
 0x567   :  { %v914_v3 = vperm.slane %v906_v54, %v2806_v11  ;;  %2145 = vrot.lane.b32.xlu2 %v2144_v51, %s2581_s14  ;;  %2140 = vrot.lane.b32.xlu1 %v2144_v51, %s2594_s1  ;;  %v916_v9 = vsel %vm368_vm10, 0.0, %v915_v56  ;;  %s2600_s14 = smov 16   ;;  %v1004_v51 = vrot.slane %v979_v38, 4 }
 0x568   :  { %v918_v5 = vsel %vm368_vm10, 0.0, %v917_v2  ;;  %v919_v6 = vrot.slane %v910_v55, 4  ;;  %v923_v60 = vsel %vm368_vm10, %v917_v2, %v898_v46 }
 0x569   :  { %v921_v7 = vrot.slane %v914_v3, 4  ;;  %v928_v8 = vrot.slane %v918_v5, 4  ;;  %v927_v17 = vperm.slane %v923_v60, %v2801_v4 }
 0x56a   :  { %v920_v16 = vsel %vm368_vm10, 0.0, %v919_v6 }
 0x56b   :  { %v929_v10 = vsel %vm368_vm10, %v928_v8, %v916_v9  ;;  %v922_v12 = vsel %vm368_vm10, 0.0, %v921_v7  ;;  %v934_v18 = vsel %vm368_vm10, %v921_v7, %v910_v55 }
 0x56c   :  { %v933_v14 = vperm.slane %v929_v10, %v2801_v4  ;;  %v939_v15 = vrot.slane %v922_v12, 4  ;;  %v938_v23 = vperm.slane %v934_v18, %v2801_v4 }
 0x56e   :  { %v940_v19 = vsel %vm368_vm10, %v939_v15, %v920_v16  ;;  %v945_v20 = vrot.slane %v933_v14, 4 }
 0x56f   :  { %v944_v21 = vperm.slane %v940_v19, %v2801_v4  ;;  %967 = vrot.lane.b32.xlu2 %v2797_v61, %s2593_s21 }
 0x570   :  { %v946_v22 = vsel %vm368_vm10, %v945_v20, %v927_v17 }
 0x571   :  { %v950_v24 = vperm.slane %v946_v22, %v2806_v11  ;;  %v951_v25 = vrot.slane %v944_v21, 4 }
 0x573   :  { %v952_v26 = vsel %vm368_vm10, %v951_v25, %v938_v23  ;;  %v959_v27 = vrot.slane %v950_v24, 4 }
 0x574   :  { %v956_v28 = vperm.slane %v952_v26, %v2806_v11 }
 0x576   :  { %v960_v29 = vsel %vm368_vm10, %v956_v28, %v959_v27  ;;  %v957_v58 = vrot.slane %v956_v28, 4 }
 0x577   :  { %962 = vrot.lane.b32.xlu0 %v960_v29, %s2600_s14 }
 0x578   :  { %v3011_v59 = vsel %vm368_vm10, %v957_v58, %v950_v24 }
 0x5c1   :  { %v2146_v63 = vpop.permute.xlu2 %2145 }
 0x5c2   :  { %v2148_v31 = vunpack.i.h.bf16 %v2146_v63  ;;  %v2147_v32 = vunpack.i.l.bf16 %v2146_v63 }
 0x5c4   :  { %v1181_v34 = vrot.slane %v2148_v31, 4  ;;  %v1186_v0 = vperm.slane %v2148_v31, %v2801_v4  ;;  %v1171_v35 = vrot.slane %v2147_v32, 4  ;;  %v1176_v36 = vperm.slane %v2147_v32, %v2801_v4 }
 0x5c6   :  { %v1182_v39 = vsel %vm368_vm10, 0.0, %v1181_v34  ;;  %v1191_v40 = vrot.slane %v1186_v0, 4  ;;  %v1172_v41 = vsel %vm368_vm10, 0.0, %v1171_v35  ;;  %v1193_v42 = vrot.slane %v1176_v36, 4 }
 0x5c7   :  { %v1190_v1 = vperm.slane %v1182_v39, %v2801_v4  ;;  %v1180_v43 = vperm.slane %v1172_v41, %v2801_v4 }
 0x5c8   :  { %v1192_v44 = vsel %vm368_vm10, %v1191_v40, %v1176_v36  ;;  %v1194_v45 = vsel %vm368_vm10, %v1186_v0, %v1193_v42 }
 0x5c9   :  { %v1203_v46 = vrot.slane %v1190_v1, 4  ;;  %v1198_v47 = vperm.slane %v1192_v44, %v2806_v11  ;;  %v1202_v61 = vperm.slane %v1194_v45, %v2806_v11  ;;  %v1205_v48 = vrot.slane %v1180_v43, 4  ;;  %v968_v49 = vpop.permute.xlu2 %967 }
 0x5ca   :  { %v980_v54 = vrot.slane %v968_v49, 4  ;;  %v985_v55 = vperm.slane %v968_v49, %v2801_v4 }
 0x5cb   :  { %v1204_v56 = vsel %vm368_vm10, %v1203_v46, %v1180_v43  ;;  %v1206_v2 = vsel %vm368_vm10, %v1190_v1, %v1205_v48  ;;  %v1215_v3 = vrot.slane %v1198_v47, 4  ;;  %v1217_v5 = vrot.slane %v1202_v61, 4 }
 0x5cc   :  { %v1210_v6 = vperm.slane %v1204_v56, %v2806_v11  ;;  %v1214_v7 = vperm.slane %v1206_v2, %v2806_v11  ;;  %v981_v8 = vsel %vm368_vm10, 0.0, %v980_v54  ;;  %v990_v9 = vrot.slane %v985_v55, 4 }
 0x5cd   :  { %v1218_v60 = vsel %vm368_vm10, 0.0, %v1217_v5  ;;  %v1223_v10 = vsel %vm368_vm10, %v1217_v5, %v1198_v47  ;;  %v989_v12 = vperm.slane %v981_v8, %v2801_v4  ;;  %v1216_v14 = vsel %vm368_vm10, 0.0, %v1215_v3 }
 0x5ce   :  { %v1219_v15 = vrot.slane %v1210_v6, 4  ;;  %v1221_v16 = vrot.slane %v1214_v7, 4  ;;  %v1228_v17 = vrot.slane %v1218_v60, 4  ;;  %v991_v18 = vsel %vm368_vm10, %v990_v9, %v975_v37 }
 0x5cf   :  { %v993_v19 = vsel %vm368_vm10, %v985_v55, %v992_v50  ;;  %v1002_v20 = vrot.slane %v989_v12, 4  ;;  %v1005_v21 = vsel %vm368_vm10, %v989_v12, %v1004_v51  ;;  %v1227_v23 = vperm.slane %v1223_v10, %v2801_v4 }
 0x5d0   :  { %v1222_v22 = vsel %vm368_vm10, 0.0, %v1221_v16  ;;  %v1229_v24 = vsel %vm368_vm10, %v1228_v17, %v1216_v14  ;;  %v1220_v25 = vsel %vm368_vm10, 0.0, %v1219_v15  ;;  %v997_v28 = vperm.slane %v991_v18, %v2806_v11 }
 0x5d1   :  { %v1233_v26 = vperm.slane %v1229_v24, %v2801_v4  ;;  %v1239_v27 = vrot.slane %v1222_v22, 4  ;;  %v1234_v29 = vsel %vm368_vm10, %v1221_v16, %v1210_v6  ;;  %v1001_v58 = vperm.slane %v993_v19, %v2806_v11 }
 0x5d2   :  { %v1003_v62 = vsel %vm368_vm10, %v1002_v20, %v979_v38  ;;  %v1013_v63 = vperm.slane %v1005_v21, %v2806_v11  ;;  %v1014_v34 = vrot.slane %v997_v28, 4  ;;  %v1238_v37 = vperm.slane %v1234_v29, %v2801_v4 }
 0x5d3   :  { %v1240_v31 = vsel %vm368_vm10, %v1239_v27, %v1220_v25  ;;  %v1245_v32 = vrot.slane %v1233_v26, 4  ;;  %v1009_v33 = vperm.slane %v1003_v62, %v2806_v11  ;;  %v1016_v35 = vrot.slane %v1001_v58, 4 }
 0x5d4   :  { %v1244_v0 = vperm.slane %v1240_v31, %v2801_v4  ;;  %v1020_v36 = vrot.slane %v1013_v63, 4  ;;  %v1015_v40 = vsel %vm368_vm10, 0.0, %v1014_v34 }
 0x5d5   :  { %v1246_v39 = vsel %vm368_vm10, %v1245_v32, %v1227_v23  ;;  %v1018_v41 = vrot.slane %v1009_v33, 4  ;;  %v1017_v1 = vsel %vm368_vm10, 0.0, %v1016_v35  ;;  %v1022_v44 = vsel %vm368_vm10, %v1016_v35, %v997_v28 }
 0x5d6   :  { %v1250_v38 = vperm.slane %v1246_v39, %v2806_v11  ;;  %v1251_v42 = vrot.slane %v1244_v0, 4  ;;  %v1021_v43 = vsel %vm368_vm10, 0.0, %v1020_v36  ;;  %v1027_v45 = vrot.slane %v1017_v1, 4 }
 0x5d7   :  { %v1019_v61 = vsel %vm368_vm10, 0.0, %v1018_v41  ;;  %v1033_v48 = vsel %vm368_vm10, %v1020_v36, %v1009_v33  ;;  %v1038_v51 = vrot.slane %v1021_v43, 4  ;;  %v1026_v55 = vperm.slane %v1022_v44, %v2801_v4 }
 0x5d8   :  { %v1252_v46 = vsel %vm368_vm10, %v1251_v42, %v1238_v37  ;;  %v1259_v47 = vrot.slane %v1250_v38, 4  ;;  %v1028_v50 = vsel %vm368_vm10, %v1027_v45, %v1015_v40  ;;  %v1037_v7 = vperm.slane %v1033_v48, %v2801_v4 }
 0x5d9   :  { %v1256_v49 = vperm.slane %v1252_v46, %v2806_v11  ;;  %v2141_v54 = vpop.permute.xlu1 %2140  ;;  %v1032_v56 = vperm.slane %v1028_v50, %v2801_v4  ;;  %v1039_v8 = vsel %vm368_vm10, %v1038_v51, %v1019_v61 }
 0x5da   :  { %v2143_v2 = vunpack.i.h.bf16 %v2141_v54  ;;  %v2142_v3 = vunpack.i.l.bf16 %v2141_v54  ;;  %v1043_v60 = vperm.slane %v1039_v8, %v2801_v4 }
 0x5db   :  { %v1257_v5 = vrot.slane %v1256_v49, 4  ;;  %v1260_v6 = vsel %vm368_vm10, %v1256_v49, %v1259_v47  ;;  %v1044_v10 = vrot.slane %v1032_v56, 4 }
 0x5dc   :  { %v1262_v9 = vpack.c.bf16 %v1260_v6, %v1260_v6  ;;  %v1081_v12 = vrot.slane %v2143_v2, 4  ;;  %v1086_v15 = vperm.slane %v2143_v2, %v2801_v4  ;;  %v1071_v16 = vrot.slane %v2142_v3, 4 }
 0x5dd   :  { %v1258_v14 = vsel %vm368_vm10, %v1257_v5, %v1250_v38  ;;  %v1076_v17 = vperm.slane %v2142_v3, %v2801_v4  ;;  %v1045_v19 = vsel %vm368_vm10, %v1044_v10, %v1026_v55  ;;  %v1050_v20 = vrot.slane %v1043_v60, 4 }
 0x5de   :  { %v1261_v18 = vpack.c.bf16 %v1258_v14, %v1258_v14  ;;  %1264 = vst.msk [vmem:[#allocation3 + $0x4] sm:$0xf] %vm561_vm11, %v1262_v9  ;;  %v1082_v21 = vsel %vm368_vm10, 0.0, %v1081_v12  ;;  %v1049_v22 = vperm.slane %v1045_v19, %v2806_v11  ;;  %v1091_v24 = vrot.slane %v1086_v15, 4 }
 0x5df   :  { %v1090_v23 = vperm.slane %v1082_v21, %v2801_v4  ;;  %v1072_v25 = vsel %vm368_vm10, 0.0, %v1071_v16  ;;  %v1051_v26 = vsel %vm368_vm10, %v1050_v20, %v1037_v7  ;;  %v1093_v28 = vrot.slane %v1076_v17, 4 }
 0x5e0   :  { %1263 = vst.msk [vmem:[#allocation3] sm:$0xf] %vm561_vm11, %v1261_v18  ;;  %v1080_v27 = vperm.slane %v1072_v25, %v2801_v4  ;;  %v1055_v29 = vperm.slane %v1051_v26, %v2806_v11  ;;  %v1058_v58 = vrot.slane %v1049_v22, 4  ;;  %v1092_v63 = vsel %vm368_vm10, %v1091_v24, %v1076_v17 }
 0x5e1   :  { %v1103_v62 = vrot.slane %v1090_v23, 4  ;;  %v1094_v31 = vsel %vm368_vm10, %v1086_v15, %v1093_v28  ;;  %v1098_v32 = vperm.slane %v1092_v63, %v2806_v11 }
 0x5e2   :  { %v1105_v33 = vrot.slane %v1080_v27, 4  ;;  %v1056_v34 = vrot.slane %v1055_v29, 4  ;;  %v3091_v0 = vsel %vm368_vm10, %v1055_v29, %v1058_v58  ;;  %v1102_v35 = vperm.slane %v1094_v31, %v2806_v11 }
 0x5e3   :  { %v1104_v36 = vsel %vm368_vm10, %v1103_v62, %v1080_v27  ;;  %v1061_v37 = vpack.c.bf16 %v3091_v0, %v3091_v0  ;;  %v1115_v42 = vrot.slane %v1098_v32, 4 }
 0x5e4   :  { %v1106_v39 = vsel %vm368_vm10, %v1090_v23, %v1105_v33  ;;  %v1110_v40 = vperm.slane %v1104_v36, %v2806_v11  ;;  %v3100_v41 = vsel %vm368_vm10, %v1056_v34, %v1049_v22  ;;  %v1117_v1 = vrot.slane %v1102_v35, 4 }
 0x5e5   :  { %v1114_v38 = vperm.slane %v1106_v39, %v2806_v11  ;;  %v1060_v43 = vpack.c.bf16 %v3100_v41, %v3100_v41  ;;  %v1116_v61 = vsel %vm368_vm10, 0.0, %v1115_v42 }
 0x5e6   :  { %v1118_v44 = vsel %vm368_vm10, 0.0, %v1117_v1  ;;  %v1119_v45 = vrot.slane %v1110_v40, 4  ;;  %v1123_v50 = vsel %vm368_vm10, %v1117_v1, %v1098_v32 }
 0x5e7   :  { %v1121_v46 = vrot.slane %v1114_v38, 4  ;;  %v1128_v47 = vrot.slane %v1118_v44, 4  ;;  %v1127_v6 = vperm.slane %v1123_v50, %v2801_v4 }
 0x5e8   :  { %v1120_v56 = vsel %vm368_vm10, 0.0, %v1119_v45 }
 0x5e9   :  { %v1122_v48 = vsel %vm368_vm10, 0.0, %v1121_v46  ;;  %v963_v49 = vpop.permute.xlu0 %962  ;;  %v1129_v51 = vsel %vm368_vm10, %v1128_v47, %v1116_v61  ;;  %v1134_v3 = vsel %vm368_vm10, %v1121_v46, %v1110_v40 }
 0x5ea   :  { %v1139_v54 = vrot.slane %v1122_v48, 4  ;;  %v3112_v55 = vsel %vm669_vm1, %v3011_v59, %v963_v49  ;;  %v1133_v2 = vperm.slane %v1129_v51, %v2801_v4  ;;  %v1138_v9 = vperm.slane %v1134_v3, %v2801_v4 }
 0x5ec   :  { %v1140_v5 = vsel %vm368_vm10, %v1139_v54, %v1120_v56  ;;  %v1145_v8 = vrot.slane %v1133_v2, 4 }
 0x5ed   :  { %v1144_v7 = vperm.slane %v1140_v5, %v2801_v4 }
 0x5ee   :  { %v1146_v60 = vsel %vm368_vm10, %v1145_v8, %v1127_v6 }
 0x5ef   :  { %v1151_v10 = vrot.slane %v1144_v7, 4  ;;  %v1150_v59 = vperm.slane %v1146_v60, %v2806_v11 }
 0x5f1   :  { %v1152_v12 = vsel %vm368_vm10, %v1151_v10, %v1138_v9  ;;  %v1159_v15 = vrot.slane %v1150_v59, 4 }
 0x5f2   :  { %v1156_v14 = vperm.slane %v1152_v12, %v2806_v11 }
 0x5f4   :  { %v1157_v16 = vrot.slane %v1156_v14, 4  ;;  %v1160_v17 = vsel %vm368_vm10, %v1156_v14, %v1159_v15 }
 0x5f5   :  { %v1162_v18 = vpack.c.bf16 %v1160_v17, %v1160_v17 }
 0x5f6   :  { %v1158_v19 = vsel %vm368_vm10, %v1157_v16, %v1150_v59 }
 0x5f7   :  { %v1161_v20 = vpack.c.bf16 %v1158_v19, %v1158_v19  ;;  %1164 = vst.msk [vmem:[#allocation2 + $0x4] sm:$0xf] %vm561_vm11, %v1162_v18 }
 0x5f9   :  { %1163 = vst.msk [vmem:[#allocation2] sm:$0xf] %vm561_vm11, %v1161_v20 }
 0x5fa LB: > { %s1983_s26 = sshll.u32 %s2572_s5, 3  ;;  %v1303_v27 = vstv %s3013_s3  ;;  %v2601_v28 = vmov -1e+09   ;;  %v2602_v36 = vmov 0   ;;  %v1344_v39 = vld [vmem:[#allocation4] sm:$0xff]  ;;  %v1345_v44 = vld [vmem:[#allocation4 + $0x8] sm:$0xff]  ;;  %s2572_s5 = sphi %s3129_s5, %s1287_s5  }
 0x5fb   : > { %s3135_s9 = sshra.s32 %s1983_s26, 3  ;;  %v1301_v25 = vstv %s1983_s26  ;;  %2153 = vset.pattern.permute.xlu1 %v2602_v36  ;;  %2154 = vset.pattern.permute.xlu2 %v2602_v36  ;;  %v1377_v15 = vld [vmem:[#allocation5] sm:$0xff]  ;;  %v1378_v19 = vld [vmem:[#allocation5 + $0x8] sm:$0xff]  ;;  %s1287_s5 = sadd.s32 1, %s2572_s5  }
 0x5fc   : > { %s1984_s16 = sshll.u32 %s3135_s9, 2  ;;  %v1302_v26 = vadd.s32 %v1301_v25, %v2875_v57  ;;  %2155 = vset.pattern.permute.xlu0 %v2602_v36  ;;  %p1286_p1 = scmp.ge.s32.totalorder %s1287_s5, 1 }
 0x5fd   : > { %s1294_s27 = scalar_lea.vmem [#allocation2], %s1984_s16  ;;  %s1298_s28 = scalar_lea.vmem [#allocation3], %s1984_s16  ;;  %2164 = vset.pattern.permute.xlu0 (%p1286_p1), %v2599_v30  ;;  %vm1754_vm7 = vcmask (%p1286_p1), 523264  }
 0x5fe   : > { %vm1304_vm15 = vcmp.lt.s32.totalorder %v1302_v26, %v1303_v27  ;;  %v1299_v50 = vld [vmem:[%s1298_s28] sm:$0xf]  ;;  %v1300_v54 = vld [vmem:[%s1298_s28 + $0x4] sm:$0xf]  ;;  %s3299_s11 = sld [smem:[#allocation45_spill]] (%p1286_p1)  ;;  %s2603_s26 = smov (%p1286_p1), [#allocation30]  }
 0x5ff   : > { %v1305_v29 = vsel %vm1304_vm15, 0.0, %v2601_v28  ;;  %v1412_v51 = vsel %vm811_vm14, %v1299_v50, 0  ;;  %v1431_v56 = vsel %vm811_vm14, %v1300_v54, 0  ;;  %v1392_v28 = vld [vmem:[#allocation6 + $0x8] sm:$0xff]  ;;  %vm1833_vm14 = vcmask (%p1286_p1), 1040384   ;;  %s1916_s9 = sshll.u32 (%p1286_p1), %s2603_s26, 4  ;;  %s1917_s9 = int_to_ptr.vmem [resolvable:$true] %s1916_s9 }
 0x600   : > { %v1295_v21 = vld [vmem:[%s1294_s27] sm:$0xf]  ;;  %v1296_v22 = vld [vmem:[%s1294_s27 + $0x4] sm:$0xf]  ;;  %1421 = vmatpush.bf16.msra.mxu2 %v1412_v51  ;;  %1440 = vmatpush.bf16.msra.mxu3 %v1431_v56 }
 0x601   : > { %v1310_v23 = vsel %vm669_vm1, %v1295_v21, 0  ;;  %v1329_v24 = vsel %vm669_vm1, %v1296_v22, 0 }
 0x602   : > { %1319 = vmatpush.bf16.xpose.msra.mxu0 %v1310_v23  ;;  %1338 = vmatpush.bf16.xpose.msra.mxu1 %v1329_v24  ;;  %v1391_v24 = vld [vmem:[#allocation6] sm:$0xff] }
 0x609   : > { %1986 = vmatmul.msk.bf16.vlgmr.msra.gmra.mxu0 %vm669_vm1, %v1060_v43  ;;  %1987 = vmatmul.msk.bf16.vlgmr.msra.gmra.mxu1 %vm669_vm1, %v1061_v37 }
 0x686   : > { %v1321_v58 = vpop.f32.mrf.mxu0  ;;  %v1340_v62 = vpop.f32.mrf.mxu1 }
 0x687   : > { %v1322_v63 = vadd.f32 %v1321_v58, %v1305_v29  ;;  %v1341_v32 = vadd.f32 %v1340_v62, %v1305_v29 }
 0x689   : > { %v1347_v31 = vsel %vm747_vm13, %v1322_v63, -inf  ;;  %v1350_v35 = vsel %vm747_vm13, %v1341_v32, -inf }
 0x68a   : > { %1348 = vmax.xlane.f32.xlu0 %v1347_v31 }
 0x68e   : > { %v1323_v33 = vpop.f32.mrf.mxu0  ;;  %v1342_v34 = vpop.f32.mrf.mxu1 }
 0x692   : > { %1351 = vmax.xlane.f32.xlu0 %v1350_v35 }
 0x6fd   : > { %v1349_v40 = vpop.xlane.xlu0 %1348 }
 0x6fe   : > { %v1353_v38 = vmax.f32 %v1344_v39, %v1349_v40 }
 0x700   : > { %v1355_v42 = vsub.f32 %v1344_v39, %v1353_v38  ;;  %1450 = vst.msk [vmem:[#allocation4] sm:$0xff] %vm664_vm0, %v1353_v38  ;;  %1363 = vperm.xlu1 %2153, %v1353_v38  }
 0x702   : > { %v1357_v1 = vmul.f32 1.442695, %v1355_v42  ;;  %v2046_v42 = vld [vmem:[%s3271_s6 + $0x8] sm:$0xff] (%p1286_p1) }
 0x703   :  { %1595 = vmatpush.bf16.msra.mxu0 (%p1286_p1), %v2046_v42 }
 0x704   : > { %2156 = vpow2.f32 %v1357_v1 }
 0x705   : > { %v1352_v45 = vpop.xlane.xlu0 %1351 }
 0x706   : > { %v1354_v46 = vmax.f32 %v1345_v44, %v1352_v45 }
 0x708   : > { %v1356_v47 = vsub.f32 %v1345_v44, %v1354_v46  ;;  %1451 = vst.msk [vmem:[#allocation4 + $0x8] sm:$0xff] %vm664_vm0, %v1354_v46  ;;  %1368 = vperm.xlu1 %2153, %v1354_v46  }
 0x70a   : > { %v2157_v61 = vpop.eup %2156  ;;  %v1359_v48 = vmul.f32 1.442695, %v1356_v47 }
 0x70b   : > { %1395 = vperm.xlu2 %2154, %v2157_v61   ;;  %v1379_v16 = vmul.f32 %v2157_v61, %v1377_v15 }
 0x70c   : > { %2158 = vpow2.f32 %v1359_v48 }
 0x712   : > { %v2159_v49 = vpop.eup %2158 }
 0x713   : > { %1400 = vperm.xlu2 %2154, %v2159_v49   ;;  %v1380_v20 = vmul.f32 %v2159_v49, %v1378_v19 }
 0x765   : > { %v1396_v23 = vpop.permute.xlu2 %1395 }
 0x766   : > { %v1403_v25 = vmul.f32 %v1396_v23, %v1391_v24 }
 0x76d   : > { %v1401_v29 = vpop.permute.xlu2 %1400 }
 0x76e   : > { %v1404_v58 = vmul.f32 %v1401_v29, %v1392_v28 }
 0x772   : > { %v1364_v2 = vpop.permute.xlu1 %1363 }
 0x773   : > { %v1371_v3 = vsub.f32 %v1322_v63, %v1364_v2 }
 0x775   : > { %v1373_v5 = vmul.f32 1.442695, %v1371_v3 }
 0x777   : > { %2160 = vpow2.f32 %v1373_v5 }
 0x77a   : > { %v1369_v6 = vpop.permute.xlu1 %1368 }
 0x77b   : > { %v1372_v7 = vsub.f32 %v1341_v32, %v1369_v6 }
 0x77d   : > { %v2161_v8 = vpop.eup %2160  ;;  %v1375_v9 = vmul.f32 1.442695, %v1372_v7 }
 0x77e   : > { %v1381_v60 = vsel %vm747_vm13, %v2161_v8, 0.0  ;;  %v1405_v10 = vpack.c.bf16 %v2161_v8, %v2161_v8 }
 0x77f   : > { %2162 = vpow2.f32 %v1375_v9  ;;  %1382 = vadd.xlane.f32.xlu0 %v1381_v60 }
 0x780   : > { %1988 = vmatmul.msk.bf16.vlgmr.msra.gmra.mxu2 %vm747_vm13, %v1405_v10 }
 0x785   : > { %v2163_v59 = vpop.eup %2162 }
 0x786   : > { %v1384_v12 = vsel %vm747_vm13, %v2163_v59, 0.0  ;;  %v1406_v14 = vpack.c.bf16 %v2163_v59, %v2163_v59 }
 0x787   : > { %1385 = vadd.xlane.f32.xlu1 %v1384_v12 }
 0x788   : > { %1989 = vmatmul.msk.bf16.vlgmr.msra.gmra.mxu3 %vm747_vm13, %v1406_v14 }
 0x7f2   : > { %v1383_v17 = vpop.xlane.xlu0 %1382 }
 0x7f3   : > { %v1387_v18 = vadd.f32 %v1383_v17, %v1379_v16 }
 0x7f5   : > { %1389 = vst.msk [vmem:[#allocation5] sm:$0xff] %vm664_vm0, %v1387_v18 }
 0x7fa   : > { %v1386_v21 = vpop.xlane.xlu1 %1385 }
 0x7fb   : > { %v1388_v22 = vadd.f32 %v1386_v21, %v1380_v20 }
 0x7fc   :  { %v1454_v33 = vld [vmem:[#allocation5] sm:$0xff] (%p1286_p1) }
 0x7fd   : > { %1390 = vst.msk [vmem:[#allocation5 + $0x8] sm:$0xff] %vm664_vm0, %v1388_v22  ;;  %2174 = vrcp.f32 (%p1286_p1), %v1454_v33 }
 0x803   : > { %v1423_v26 = vpop.f32.mrf.mxu2  ;;  %v2175_v35 = vpop.eup (%p1286_p1), %2174 }
 0x804   : > { %v1446_v27 = vadd.f32 %v1423_v26, %v1403_v25  ;;  %v1455_v34 = vld [vmem:[#allocation5 + $0x8] sm:$0xff] (%p1286_p1)  ;;  %1460 = vperm.xlu0 (%p1286_p1), %2164, %v2175_v35  }
 0x805   :  { %2176 = vrcp.f32 (%p1286_p1), %v1455_v34  ;;  %v2045_v34 = vld [vmem:[%s3271_s6] sm:$0xff] (%p1286_p1) }
 0x806   : > { %1448 = vst.msk [vmem:[#allocation6] sm:$0xff] %vm669_vm1, %v1446_v27  ;;  %1596 = vmatpush.bf16.msra.mxu0 (%p1286_p1), %v2045_v34 }
 0x80b   : > { %v1425_v62 = vpop.f32.mrf.mxu2  ;;  %v1442_v63 = vpop.f32.mrf.mxu3 }
 0x80c   : > { %v1447_v31 = vadd.f32 %v1442_v63, %v1404_v58  ;;  %v2177_v36 = vpop.eup (%p1286_p1), %2176 }
 0x80d   :  { %1465 = vperm.xlu0 (%p1286_p1), %2164, %v2177_v36   ;;  %v1452_v39 = vld [vmem:[#allocation6] sm:$0xff] (%p1286_p1) }
 0x80e   : > { %1449 = vst.msk [vmem:[#allocation6 + $0x8] sm:$0xff] %vm669_vm1, %v1447_v31 }
 0x80f   :  { %1289 = sbr.rel (!%p1286_p1) target bundleno = 1530 (0x5fa), region = 177 }
 0x813   : > { %v1444_v32 = vpop.f32.mrf.mxu3 }
 0x815   :  { %v1453_v44 = vld [vmem:[#allocation6 + $0x8] sm:$0xff] }
 0x876   :  { %v1461_v40 = vpop.permute.xlu0 %1460 }
 0x877   :  { %v1468_v38 = vmul.f32 %v1461_v40, %v1452_v39 }
 0x879   :  { %v1470_v1 = vrot.slane %v1468_v38, 4  ;;  %v1475_v30 = vperm.slane %v1468_v38, %v2801_v4 }
 0x87b   :  { %v1471_v57 = vsel %vm368_vm10, 0.0, %v1470_v1  ;;  %v1492_v43 = vrot.slane %v1475_v30, 4 }
 0x87c   :  { %v1479_v41 = vperm.slane %v1471_v57, %v2801_v4 }
 0x87e   :  { %v1504_v49 = vrot.slane %v1479_v41, 4 }
 0x87f   :  { %v1466_v0 = vpop.permute.xlu0 %1465 }
 0x880   :  { %v1469_v37 = vmul.f32 %v1466_v0, %v1453_v44 }
 0x882   :  { %v1480_v45 = vrot.slane %v1469_v37, 4  ;;  %v1485_v46 = vperm.slane %v1469_v37, %v2801_v4 }
 0x884   :  { %v1481_v47 = vsel %vm368_vm10, 0.0, %v1480_v45  ;;  %v1490_v61 = vrot.slane %v1485_v46, 4  ;;  %v1493_v48 = vsel %vm368_vm10, %v1485_v46, %v1492_v43 }
 0x885   :  { %v1489_v50 = vperm.slane %v1481_v47, %v2801_v4  ;;  %v1501_v51 = vperm.slane %v1493_v48, %v2806_v11 }
 0x886   :  { %v1491_v54 = vsel %vm368_vm10, %v1490_v61, %v1475_v30 }
 0x887   :  { %v1497_v56 = vperm.slane %v1491_v54, %v2806_v11  ;;  %v1502_v2 = vrot.slane %v1489_v50, 4  ;;  %v1505_v3 = vsel %vm368_vm10, %v1489_v50, %v1504_v49  ;;  %v1516_v5 = vrot.slane %v1501_v51, 4  ;;  %v2047_v49 = vld [vmem:[%s3275_s10] sm:$0xff] }
 0x888   :  { %v1513_v6 = vperm.slane %v1505_v3, %v2806_v11 }
 0x889   :  { %v1517_v7 = vsel %vm368_vm10, 0.0, %v1516_v5  ;;  %v1503_v8 = vsel %vm368_vm10, %v1502_v2, %v1479_v41  ;;  %v1514_v9 = vrot.slane %v1497_v56, 4  ;;  %v1522_v16 = vsel %vm368_vm10, %v1516_v5, %v1497_v56 }
 0x88a   :  { %v1520_v60 = vrot.slane %v1513_v6, 4  ;;  %v1527_v10 = vrot.slane %v1517_v7, 4  ;;  %v1509_v59 = vperm.slane %v1503_v8, %v2806_v11  ;;  %v1526_v21 = vperm.slane %v1522_v16, %v2801_v4 }
 0x88b   :  { %v1515_v12 = vsel %vm368_vm10, 0.0, %v1514_v9 }
 0x88c   :  { %v1518_v14 = vrot.slane %v1509_v59, 4  ;;  %v1521_v15 = vsel %vm368_vm10, 0.0, %v1520_v60  ;;  %v1528_v17 = vsel %vm368_vm10, %v1527_v10, %v1515_v12  ;;  %v1533_v22 = vsel %vm368_vm10, %v1520_v60, %v1509_v59 }
 0x88d   :  { %v1532_v18 = vperm.slane %v1528_v17, %v2801_v4  ;;  %v1538_v19 = vrot.slane %v1521_v15, 4  ;;  %v1537_v27 = vperm.slane %v1533_v22, %v2801_v4  ;;  %v2166_v17 = vld [vmem:[#allocation18] ss:$0 sm:$0xff]  ;;  %v2167_v22 = vld [vmem:[#allocation20] ss:$0 sm:$0xff] }
 0x88e   :  { %v1519_v20 = vsel %vm368_vm10, 0.0, %v1518_v14 }
 0x88f   :  { %v1539_v23 = vsel %vm368_vm10, %v1538_v19, %v1519_v20  ;;  %v1544_v24 = vrot.slane %v1532_v18, 4 }
 0x890   :  { %v1543_v25 = vperm.slane %v1539_v23, %v2801_v4 }
 0x891   :  { %v1545_v26 = vsel %vm368_vm10, %v1544_v24, %v1526_v21 }
 0x892   :  { %v1549_v28 = vperm.slane %v1545_v26, %v2806_v11  ;;  %v1550_v29 = vrot.slane %v1543_v25, 4 }
 0x894   :  { %v1551_v58 = vsel %vm368_vm10, %v1550_v29, %v1537_v27  ;;  %v1558_v62 = vrot.slane %v1549_v28, 4  ;;  %v2052_v27 = vld [vmem:[%s3299_s11 + $0x18] sm:$0xff]  ;;  %v2050_v29 = vld [vmem:[%s3299_s11 + $0x8] sm:$0xff] }
 0x895   :  { %v1555_v63 = vperm.slane %v1551_v58, %v2806_v11  ;;  %v2165_v11 = vld [vmem:[#allocation17] ss:$0 sm:$0xff]  ;;  %1762 = vmatpush.bf16.msra.mxu2 %v2052_v27  ;;  %v2049_v58 = vld [vmem:[%s3299_s11] sm:$0xff] }
 0x897   :  { %v1559_v31 = vsel %vm368_vm10, %v1555_v63, %v1558_v62  ;;  %v1556_v32 = vrot.slane %v1555_v63, 4  ;;  %v2168_v62 = vld [vmem:[#allocation21] ss:$0 sm:$0xff] }
 0x898   :  { %1561 = vrot.lane.b32.xlu1 %v1559_v31, %s2600_s14 }
 0x899   :  { %v1557_v33 = vsel %vm368_vm10, %v1556_v32, %v1549_v28  ;;  %v2051_v28 = vld [vmem:[%s3299_s11 + $0x10] sm:$0xff] }
 0x89a   :  { %1763 = vmatpush.bf16.msra.mxu2 %v2051_v28 }
 0x89e   :  { %1764 = vmatpush.bf16.msra.mxu2 %v2050_v29 }
 0x8a2   :  { %1765 = vmatpush.bf16.msra.mxu2 %v2049_v58 }
 0x90a   :  { %v1562_v4 = vpop.permute.xlu1 %1561 }
 0x90b   :  { %v1564_v35 = vsel %vm669_vm1, %v1557_v33, %v1562_v4 }
 0x90c   :  { %v1565_v36 = vpack.c.bf16 %v1564_v35, %v3112_v55 }
 0x90e   :  { %1998 = vmatmul.msk.bf16.vlgmr.msra.gmra.mxu0 %vm259_vm2, %v1565_v36 }
 0x98b   :  { %v1598_v39 = vpop.f32.mrf.mxu0 }
 0x98c   :  { %v1599_v40 = vadd.f32 %v2165_v11, %v1598_v39 }
 0x98e   :  { %v1603_v38 = vadd.f32 %v1599_v40, %v2785_v52 }
 0x990   :  { %v1607_v42 = vsel %vm259_vm2, %v1603_v38, 0.0 }
 0x991   :  { %1608 = vadd.xlane.f32.xlu1 %v1607_v42 }
 0x993   :  { %v1600_v1 = vpop.f32.mrf.mxu0 }
 0x994   :  { %v1601_v44 = vadd.f32 %v2165_v11, %v1600_v1 }
 0x996   :  { %v1604_v57 = vadd.f32 %v1601_v44, %v2787_v53  ;;  %v2048_v53 = vld [vmem:[%s3275_s10 + $0x8] sm:$0xff] }
 0x997   :  { %1691 = vmatpush.bf16.msra.mxu1 %v2048_v53 }
 0x998   :  { %v1610_v30 = vsel %vm259_vm2, %v1604_v57, 0.0 }
 0x999   :  { %1611 = vadd.xlane.f32.xlu2 %v1610_v30 }
 0x99b   :  { %1692 = vmatpush.bf16.msra.mxu1 %v2047_v49 }
 0xa04   :  { %v1609_v0 = vpop.xlane.xlu1 %1608 }
 0xa05   :  { %v1613_v55 = vmul.f32 %v1609_v0, %v2771_v13 }
 0xa07   :  { %v1615_v37 = vsub.f32 %v1603_v38, %v1613_v55 }
 0xa09   :  { %v1617_v41 = vmul.f32 %v1615_v37, %v1615_v37 }
 0xa0b   :  { %v1619_v43 = vsel %vm259_vm2, %v1617_v41, 0.0 }
 0xa0c   :  { %v1612_v45 = vpop.xlane.xlu2 %1611  ;;  %1620 = vadd.xlane.f32.xlu2 %v1619_v43 }
 0xa0d   :  { %v1614_v52 = vmul.f32 %v1612_v45, %v2771_v13 }
 0xa0f   :  { %v1616_v46 = vsub.f32 %v1604_v57, %v1614_v52 }
 0xa11   :  { %v1618_v47 = vmul.f32 %v1616_v46, %v1616_v46 }
 0xa13   :  { %v1622_v61 = vsel %vm259_vm2, %v1618_v47, 0.0 }
 0xa14   :  { %1623 = vadd.xlane.f32.xlu0 %v1622_v61 }
 0xa7f   :  { %v1621_v48 = vpop.xlane.xlu2 %1620 }
 0xa80   :  { %v1625_v50 = vmul.f32 %v1621_v48, %v2771_v13 }
 0xa82   :  { %v1627_v51 = vadd.f32 1e-12, %v1625_v50 }
 0xa84   :  { %2178 = vrsqrt.f32 %v1627_v51  ;;  %vm1635_vm1 = vweird.f32 %v1627_v51 }
 0xa87   :  { %v1624_v54 = vpop.xlane.xlu0 %1623 }
 0xa88   :  { %v1626_v56 = vmul.f32 %v1624_v54, %v2771_v13 }
 0xa8a   :  { %v2179_v2 = vpop.eup %2178  ;;  %v1628_v3 = vadd.f32 1e-12, %v1626_v56 }
 0xa8b   :  { %v1630_v5 = vmul.f32 %v2179_v2, %v1627_v51  ;;  %vm1636_vm0 = vweird.f32 %v2179_v2 }
 0xa8c   :  { %2180 = vrsqrt.f32 %v1628_v3  ;;  %vm1637_vm3 = vmor %vm1635_vm1, %vm1636_vm0  ;;  %vm1645_vm5 = vweird.f32 %v1628_v3 }
 0xa8d   :  { %v1631_v6 = vmul.f32 %v2179_v2, %v1630_v5 }
 0xa8f   :  { %v1632_v7 = vmul.f32 0.5, %v1631_v6 }
 0xa91   :  { %v1633_v8 = vsub.f32 1.5, %v1632_v7 }
 0xa92   :  { %v2181_v9 = vpop.eup %2180 }
 0xa93   :  { %v1634_v60 = vmul.f32 %v2179_v2, %v1633_v8  ;;  %v1640_v10 = vmul.f32 %v2181_v9, %v1628_v3  ;;  %vm1646_vm4 = vweird.f32 %v2181_v9 }
 0xa94   :  { %vm1647_vm6 = vmor %vm1645_vm5, %vm1646_vm4 }
 0xa95   :  { %v1641_v59 = vmul.f32 %v2181_v9, %v1640_v10  ;;  %v1638_v14 = vsel %vm1637_vm3, %v2179_v2, %v1634_v60  ;;  %v2054_v10 = vld [vmem:[#allocation27 + $0x8] sm:$0xff] }
 0xa96   :  { %v1649_v16 = vmul.f32 %v1638_v14, %v1615_v37  ;;  %1865 = vmatpush.bf16.msra.mxu3 %v2054_v10  ;;  %v2053_v14 = vld [vmem:[#allocation27] sm:$0xff] }
 0xa97   :  { %v1642_v12 = vmul.f32 0.5, %v1641_v59 }
 0xa98   :  { %v1654_v21 = vmul.f32 %v2166_v17, %v1649_v16 }
 0xa99   :  { %v1643_v15 = vsub.f32 1.5, %v1642_v12 }
 0xa9a   :  { %v1659_v24 = vadd.f32 %v2167_v22, %v1654_v21  ;;  %1866 = vmatpush.bf16.msra.mxu3 %v2053_v14 }
 0xa9b   :  { %v1644_v18 = vmul.f32 %v2181_v9, %v1643_v15 }
 0xa9d   :  { %v1648_v19 = vsel %vm1647_vm6, %v2181_v9, %v1644_v18 }
 0xa9e   :  { %v1650_v20 = vmul.f32 %v1648_v19, %v1616_v46  ;;  %v2169_v46 = vld [vmem:[#allocation23] ss:$0 sm:$0xff] }
 0xaa0   :  { %v1655_v23 = vmul.f32 %v2166_v17, %v1650_v20  ;;  %v2056_v17 = vld [vmem:[%s3283_s18 + $0x8] sm:$0xff] }
 0xaa1   :  { %1903 = vmatpush.bf16.msrb.mxu0 %v2056_v17 }
 0xaa2   :  { %v1660_v25 = vadd.f32 %v2167_v22, %v1655_v23 }
 0xaa4   :  { %v1661_v26 = vpack.c.bf16 %v1660_v25, %v1659_v24 }
 0xaa6   :  { %2007 = vmatmul.msk.bf16.vlgmr.msra.gmra.mxu1 %vm259_vm2, %v1661_v26 }
 0xb23   :  { %v1694_v63 = vpop.f32.mrf.mxu1 }
 0xb24   :  { %v1695_v31 = vadd.f32 %v2168_v62, %v1694_v63 }
 0xb26   :  { %v1701_v32 = vmul.f32 %v1695_v31, %v1695_v31  ;;  %v1699_v0 = vmul.f32 0.5, %v1695_v31 }
 0xb28   :  { %v1703_v33 = vmul.f32 %v1701_v32, %v1695_v31  ;;  %v2171_v32 = vld [vmem:[#allocation26] ss:$0 sm:$0xff] }
 0xb2a   :  { %v1705_v34 = vmul.f32 0.044715, %v1703_v33 }
 0xb2b   :  { %v1696_v4 = vpop.f32.mrf.mxu1 }
 0xb2c   :  { %v1707_v35 = vadd.f32 %v1705_v34, %v1695_v31  ;;  %v1697_v36 = vadd.f32 %v2168_v62, %v1696_v4  ;;  %v2170_v62 = vld [vmem:[#allocation24] ss:$0 sm:$0xff] }
 0xb2e   :  { %v1702_v11 = vmul.f32 %v1697_v36, %v1697_v36  ;;  %v1709_v39 = vmul.f32 0.7978846, %v1707_v35  ;;  %v1700_v55 = vmul.f32 0.5, %v1697_v36 }
 0xb30   :  { %v1704_v40 = vmul.f32 %v1702_v11, %v1697_v36  ;;  %2182 = vtanh.f32 %v1709_v39 }
 0xb32   :  { %v1706_v38 = vmul.f32 0.044715, %v1704_v40 }
 0xb34   :  { %v1708_v42 = vadd.f32 %v1706_v38, %v1697_v36 }
 0xb36   :  { %v1710_v1 = vmul.f32 0.7978846, %v1708_v42  ;;  %v2183_v44 = vpop.eup %2182  ;;  %v2055_v42 = vld [vmem:[%s3283_s18] sm:$0xff]  ;;  %s1918_s18 = sshll.u32 %s3285_s20, 4  ;;  %s1919_s18 = int_to_ptr.hbm [resolvable:$true] %s1918_s18 }
 0xb37   :  { %v1713_v57 = vadd.f32 1.0, %v2183_v44  ;;  %1904 = vmatpush.bf16.msrb.mxu0 %v2055_v42 }
 0xb38   :  { %2184 = vtanh.f32 %v1710_v1  ;;  %v2172_v1 = vld [vmem:[#allocation29] ss:$0 sm:$0xff] }
 0xb39   :  { %v1715_v41 = vmul.f32 %v1713_v57, %v1699_v0 }
 0xb3e   :  { %v2185_v30 = vpop.eup %2184 }
 0xb3f   :  { %v1714_v37 = vadd.f32 1.0, %v2185_v30 }
 0xb41   :  { %v1716_v43 = vmul.f32 %v1714_v37, %v1700_v55  ;;  %v2173_v37 = vld [vmem:[%s3284_s19] ss:$0 sm:$0xff] }
 0xb43   :  { %v1717_v45 = vpack.c.bf16 %v1716_v43, %v1715_v41 }
 0xb45   :  { %2024 = vmatmul.msk.bf16.vlgmr.msra.gmra.mxu2 %vm1754_vm7, %v1717_v45 }
 0xbc8   :  { %v1767_v52 = vpop.f32.mrf.mxu2 }
 0xbc9   :  { %v1768_v48 = vadd.f32 %v2169_v46, %v1767_v52 }
 0xbcb   :  { %v1772_v50 = vadd.f32 %v1768_v48, %v1659_v24 }
 0xbcd   :  { %v1776_v51 = vsel %vm259_vm2, %v1772_v50, 0.0 }
 0xbd0   :  { %v1769_v47 = vpop.f32.mrf.mxu2 }
 0xbd1   :  { %v1770_v61 = vadd.f32 %v2169_v46, %v1769_v47 }
 0xbd3   :  { %v1773_v53 = vadd.f32 %v1770_v61, %v1660_v25 }
 0xbd5   :  { %v1779_v49 = vsel %vm259_vm2, %v1773_v53, 0.0 }
 0xbd6   :  { %1780 = vadd.xlane.f32.xlu2 %v1779_v49 }
 0xbde   :  { %1777 = vadd.xlane.f32.xlu2 %v1776_v51 }
 0xc49   :  { %v1781_v54 = vpop.xlane.xlu2 %1780 }
 0xc4a   :  { %v1783_v56 = vmul.f32 %v1781_v54, %v2771_v13 }
 0xc4c   :  { %v1785_v2 = vsub.f32 %v1773_v53, %v1783_v56 }
 0xc4e   :  { %v1787_v3 = vmul.f32 %v1785_v2, %v1785_v2 }
 0xc50   :  { %v1791_v5 = vsel %vm259_vm2, %v1787_v3, 0.0 }
 0xc51   :  { %1792 = vadd.xlane.f32.xlu2 %v1791_v5  ;;  %v1778_v6 = vpop.xlane.xlu2 %1777 }
 0xc52   :  { %v1782_v7 = vmul.f32 %v1778_v6, %v2771_v13 }
 0xc54   :  { %v1784_v8 = vsub.f32 %v1772_v50, %v1782_v7 }
 0xc56   :  { %v1786_v9 = vmul.f32 %v1784_v8, %v1784_v8 }
 0xc58   :  { %v1788_v60 = vsel %vm259_vm2, %v1786_v9, 0.0 }
 0xc59   :  { %1789 = vadd.xlane.f32.xlu2 %v1788_v60 }
 0xcc4   :  { %v1793_v59 = vpop.xlane.xlu2 %1792 }
 0xcc5   :  { %v1795_v12 = vmul.f32 %v1793_v59, %v2771_v13 }
 0xcc7   :  { %v1797_v15 = vadd.f32 1e-12, %v1795_v12 }
 0xcc9   :  { %2186 = vrsqrt.f32 %v1797_v15  ;;  %vm1814_vm9 = vweird.f32 %v1797_v15 }
 0xccc   :  { %v1790_v16 = vpop.xlane.xlu2 %1789 }
 0xccd   :  { %v1794_v18 = vmul.f32 %v1790_v16, %v2771_v13 }
 0xccf   :  { %v2187_v19 = vpop.eup %2186  ;;  %v1796_v20 = vadd.f32 1e-12, %v1794_v18 }
 0xcd0   :  { %v1809_v21 = vmul.f32 %v2187_v19, %v1797_v15  ;;  %vm1815_vm8 = vweird.f32 %v2187_v19 }
 0xcd1   :  { %2188 = vrsqrt.f32 %v1796_v20  ;;  %vm1816_vm10 = vmor %vm1814_vm9, %vm1815_vm8  ;;  %vm1804_vm12 = vweird.f32 %v1796_v20 }
 0xcd2   :  { %v1810_v22 = vmul.f32 %v2187_v19, %v1809_v21 }
 0xcd4   :  { %v1811_v23 = vmul.f32 0.5, %v1810_v22 }
 0xcd6   :  { %v1812_v24 = vsub.f32 1.5, %v1811_v23 }
 0xcd7   :  { %v2189_v25 = vpop.eup %2188 }
 0xcd8   :  { %v1813_v26 = vmul.f32 %v2187_v19, %v1812_v24  ;;  %v1799_v27 = vmul.f32 %v2189_v25, %v1796_v20  ;;  %vm1805_vm11 = vweird.f32 %v2189_v25 }
 0xcd9   :  { %vm1806_vm13 = vmor %vm1804_vm12, %vm1805_vm11 }
 0xcda   :  { %v1817_v28 = vsel %vm1816_vm10, %v2187_v19, %v1813_v26  ;;  %v1800_v29 = vmul.f32 %v2189_v25, %v1799_v27 }
 0xcdb   :  { %v1819_v58 = vmul.f32 %v1817_v28, %v1785_v2 }
 0xcdc   :  { %v1801_v63 = vmul.f32 0.5, %v1800_v29 }
 0xcdd   :  { %v1824_v31 = vmul.f32 %v2170_v62, %v1819_v58 }
 0xcde   :  { %v1802_v13 = vsub.f32 1.5, %v1801_v63 }
 0xcdf   :  { %v1829_v35 = vadd.f32 %v2171_v32, %v1824_v31 }
 0xce0   :  { %v1803_v33 = vmul.f32 %v2189_v25, %v1802_v13 }
 0xce1   :  { %v1831_v39 = vrot.slane %v1829_v35, 7 }
 0xce2   :  { %v1807_v34 = vsel %vm1806_vm13, %v2189_v25, %v1803_v33 }
 0xce3   :  { %v1818_v4 = vmul.f32 %v1807_v34, %v1784_v8 }
 0xce5   :  { %v1823_v36 = vmul.f32 %v2170_v62, %v1818_v4 }
 0xce7   :  { %v1828_v11 = vadd.f32 %v2171_v32, %v1823_v36 }
 0xce9   :  { %v1834_v40 = vsel %vm1833_vm14, %v1828_v11, %v1831_v39 }
 0xcea   :  { %v1835_v38 = vpack.c.bf16 %v1834_v40, %v1834_v40 }
 0xcec   :  { %2033 = vmatmul.msk.bf16.vlgmr.msra.gmra.mxu3 %vm259_vm2, %v1835_v38 }
 0xd6f   :  { %v1868_v44 = vpop.f32.mrf.mxu3 }
 0xd70   :  { %v1869_v57 = vadd.f32 %v2172_v1, %v1868_v44 }
 0xd72   :  { %2190 = vtanh.f32 %v1869_v57 }
 0xd77   :  { %v1870_v30 = vpop.f32.mrf.mxu3 }
 0xd78   :  { %v2191_v0 = vpop.eup %2190 }
 0xd79   :  { %v1873_v55 = vpack.c.bf16 %v2191_v0, %v2191_v0 }
 0xd7b   :  { %2042 = vmatmul.msk.bf16.vlgmr.msrb.gmra.mxu0 %vm259_vm2, %v1873_v55 }
 0xdf8   :  { %v1906_v41 = vpop.f32.mrf.mxu0 }
 0xdf9   :  { %v1907_v43 = vadd.f32 %v2173_v37, %v1906_v41 }
 0xdfb   :  { %1910 = vst [vmem:[#allocation30] sm:$0x3] %v1907_v43 }
 0xdfc   :  { %1921 = dma.vmem_to_hbm [thread:$0]  %s1917_s9, 32, %s1919_s18, [#allocation11]  }
 0xe00   :  { %v1908_v45 = vpop.f32.mrf.mxu0 }
 0xe01   :  { %2564 = dma.done.wait [#allocation11], 32  }
 0xe02   :  { %2565 = vsyncadd [#allocation11], 4294967264 }
 0xe03   :  { %1926 = vsyncpa [#allocation10], 1 }
 0xe04   :  { %1927 = vsyncpa [#allocation13], 1 }
 0xe05   :  { %1928 = vsyncpa [#allocation16], 1 }
 0xe06   :  { %1929 = vsyncpa [#allocation19], 1 }
 0xe07   :  { %1930 = vsyncpa [#allocation22], 1 }
 0xe08   :  { %1931 = vsyncpa [#allocation25], 1 }
 0xe09   :  { %1932 = vsyncpa [#allocation28], 1 }
 0xe0a   :  { %1933 = vsyncpa [#allocation11], 1 }

</bundles_post_ra>
